<compile_context>
chip_gen: v6e
topology: v6e:2x2x1
jax: 0.10.0
libtpu: 0.0.40
codegen_flags: <defaults>
</compile_context>

<pallas_src>
import functools

import numpy as np
import jax
import jax.numpy as jnp
from jax.experimental import pallas as pl
from jax.experimental.pallas import tpu as pltpu


_MAX_TILE_N = 512                   # node rows per grid step (sweep 256/512/1024)
_KV_VMEM_BUDGET = 8 * 1024 * 1024   # cap for the two (TN, D2) f32 kv temporaries
_VMEM_LIMIT = 48 * 1024 * 1024      # explicit scoped-VMEM limit (v7x physical = 64 MiB)
_NUM_CORES = 2                      # stage-1 partial-accumulator split (v7x dual TC)
_GN_EPS = 1e-5


def _stage1_kernel(x_ref, bid_ref, wpreT_ref, bpre_ref, gstat_ref, gbcast_ref,
                   wqkvT_ref, rep_ref, tile_ref,
                   q_ref, xres_out_ref, ksum_ref, *, inv_h, inv_sqrt_h):
    """pre/GroupNorm + fused grouped q|k|v + kv outer product + segment sums."""
    i = pl.program_id(1)
    tn = x_ref.shape[0]
    width = x_ref.shape[1]
    ws = q_ref.shape[1]
    n_grp = gstat_ref.shape[1] // 2
    n_graphs = ksum_ref.shape[0]

    @pl.when(i == 0)
    def _():
        xres_out_ref[...] = jnp.zeros_like(xres_out_ref)
        ksum_ref[...] = jnp.zeros_like(ksum_ref)

    x = x_ref[...]                                                     # (TN, W)
    h = jnp.dot(x, wpreT_ref[...], preferred_element_type=jnp.float32) + bpre_ref[...]

    # GroupNorm (affine=False): paired stats matmul [h | h*h] @ blkdiag(gmat,gmat)
    hh = jnp.concatenate([h, h * h], axis=1)                           # (TN, 2W)
    stats = jnp.dot(hh, gstat_ref[...], preferred_element_type=jnp.float32) * inv_h
    mean_g = stats[:, :n_grp]
    var_g = stats[:, n_grp:] - mean_g * mean_g
    rstd_g = jax.lax.rsqrt(var_g + _GN_EPS)
    # paired broadcast back to channels: [mean | rstd] @ blkdiag(gmatT, gmatT)
    bc = jnp.dot(jnp.concatenate([mean_g, rstd_g], axis=1), gbcast_ref[...],
                 preferred_element_type=jnp.float32)                   # (TN, 2W)
    hn = (h - bc[:, :width]) * bc[:, width:]
    # TODO(synk): option (b) of the review — replace the two GroupNorm matmuls
    # with log2(H) pltpu.roll masked-add steps to take them off the MXU.

    # fused grouped q|k|v conv: one bf16 matmul, static lane slices afterwards
    qkv = jnp.dot(hn.astype(jnp.bfloat16), wqkvT_ref[...],
                  preferred_element_type=jnp.float32)                  # (TN, 3*WS)
    qk = jnp.exp(qkv[:, :2 * ws] * inv_sqrt_h)
    q = qk[:, :ws]
    k = qk[:, ws:]
    v = qkv[:, 2 * ws:]

    q_ref[...] = q.astype(q_ref.dtype)
    # TODO(synk): q is only WS lanes wide; if vst.msk store overhead shows up in
    # a profile, re-present it as a lane-dense slab via a wrapper-side reshape.

    # kv[n,(r,h,w)] = k[n,(r,h)] * v[n,(r,w)] via exact 0/1 repeat/tile matrices
    k_bf = k.astype(jnp.bfloat16)
    kv = (jnp.dot(k_bf, rep_ref[...], preferred_element_type=jnp.float32)
          * jnp.dot(v.astype(jnp.bfloat16), tile_ref[...],
                    preferred_element_type=jnp.float32))               # (TN, D2)

    # per-graph segment sums: one-hot built in-kernel from the int32 batch ids
    # (no N*B HBM one-hot traffic); padded rows carry an out-of-range id.
    ohT = (jax.lax.broadcasted_iota(jnp.int32, (n_graphs, tn), 0)
           == bid_ref[...]).astype(jnp.bfloat16)                       # (B, TN)
    xres_out_ref[...] += jnp.dot(ohT, kv.astype(jnp.bfloat16),
                                 preferred_element_type=jnp.float32)
    ksum_ref[...] += jnp.dot(ohT, k_bf, preferred_element_type=jnp.float32)


def _stage2_kernel(q_ref, bid_ref, xres_ref, ksum_ref,
                   gmat2_ref, gmat2T_ref, rep_ref, tileT_ref,
                   wpostT_ref, bpost_ref, scale_ref, y_ref):
    """Gather per-graph sums, normalize q, contract, post conv + exp(scale)."""
    tn = q_ref.shape[0]
    n_graphs = ksum_ref.shape[0]

    q = q_ref[...].astype(jnp.float32)                                 # (TN, WS)
    # one-hot gather (cheap for small B); exact 0/1 in bf16.
    # TODO(synk): for large batch counts (B >~ 256) switch to a scalar-prefetched
    # per-row gather instead of the one-hot gather matmuls.
    oh = (jax.lax.broadcasted_iota(jnp.int32, (tn, n_graphs), 1)
          == bid_ref[...]).astype(jnp.bfloat16)                        # (TN, B)
    ksum_g = jnp.dot(oh, ksum_ref[...], preferred_element_type=jnp.float32)   # (TN, WS)
    xres_g = jnp.dot(oh, xres_ref[...], preferred_element_type=jnp.float32)   # (TN, D2)

    denom = jnp.dot(q * ksum_g, gmat2_ref[...], preferred_element_type=jnp.float32)
    # clamp keeps padded rows (ksum_g == 0) finite; real rows have denom > 0.
    recip = pl.reciprocal(jnp.maximum(denom, 1e-12), approx=True)      # EUP slot
    qn = q * jnp.dot(recip, gmat2T_ref[...], preferred_element_type=jnp.float32)

    qe = jnp.dot(qn.astype(jnp.bfloat16), rep_ref[...],
                 preferred_element_type=jnp.float32)                   # (TN, D2)
    outv = jnp.dot((qe * xres_g).astype(jnp.bfloat16), tileT_ref[...],
                   preferred_element_type=jnp.float32)                 # (TN, WS)

    y = jnp.dot(outv.astype(jnp.bfloat16), wpostT_ref[...],
                preferred_element_type=jnp.float32) + bpost_ref[...]
    y_ref[...] = (y * scale_ref[...]).astype(y_ref.dtype)


@jax.jit
def att_message_forward(x, x_res, batch, params):
    """AttMessage.forward.  x: (N, W); x_res: (B, G*S, H, H); batch: (N,) int."""
    f32, bf16 = jnp.float32, jnp.bfloat16
    N, W = x.shape
    WS, H = params['wq'].shape        # grouped conv weight: (W*S, H)
    S = WS // W
    G = W // H
    GS = G * S
    D2 = GS * H * H
    B = x_res.shape[0]

    x = x.astype(f32)
    xres_flat = x_res.astype(f32).reshape(B, D2)

    # ---- one-off parameter prep (small XLA ops outside the hot kernels) ----
    wpreT = params['wpre'].astype(f32).T                       # (W, W)
    bpre = params['bpre'].astype(f32).reshape(1, W)
    wpostT = params['wpost'].astype(bf16).T                    # (WS, W) bf16
    bpost = params['bpost'].astype(f32).reshape(1, W)
    scale_exp = jnp.exp(params['scale'].astype(f32)).reshape(1, W)

    opg = H * S  # grouped-conv output channels per group

    def grouped_dense_T(wg):  # (WS, H) grouped weight -> dense (W, WS) block-diag^T
        dense = jnp.zeros((WS, W), f32)
        for g in range(G):
            dense = dense.at[g * opg:(g + 1) * opg, g * H:(g + 1) * H].set(
                wg[g * opg:(g + 1) * opg].astype(f32))
        return dense.T

    # fused q|k|v grouped conv: single (W, 3*WS) bf16 operand
    wqkvT = jnp.concatenate(
        [grouped_dense_T(params['wq']), grouped_dense_T(params['wk']),
         grouped_dense_T(params['wv'])], axis=1).astype(bf16)

    # constant 0/1 structure matrices (compile-time constants; exact in bf16)
    gmat_np = np.kron(np.eye(G), np.ones((H, 1))).astype(np.float32)        # (W, G)
    gstat = jnp.asarray(np.kron(np.eye(2), gmat_np), dtype=f32)             # (2W, 2G)
    gbcast = jnp.asarray(np.kron(np.eye(2), gmat_np.T), dtype=f32)          # (2G, 2W)
    gmat2_np = np.kron(np.eye(GS), np.ones((H, 1))).astype(np.float32)      # (WS, GS)
    rep_np = np.kron(np.eye(WS), np.ones((1, H)))                           # (WS, D2)
    tile_np = np.kron(np.eye(GS), np.kron(np.ones((1, H)), np.eye(H)))      # (WS, D2)
    gmat2 = jnp.asarray(gmat2_np, dtype=f32)
    gmat2T = jnp.asarray(gmat2_np.T, dtype=f32)
    rep = jnp.asarray(rep_np, dtype=bf16)
    tilem = jnp.asarray(tile_np, dtype=bf16)
    tilemT = jnp.asarray(tile_np.T, dtype=bf16)
    # TODO(synk): for very large D2 = G*S*H*H add a D2-chunk grid axis that
    # slices rep/tile/xres along their last dim instead of growing the blocks.

    # ---- node tiling: lane-aligned tiles (multiple of 128), VMEM-capped ----
    tn_cap = max(128, (_KV_VMEM_BUDGET // (8 * D2)) // 128 * 128)
    n_per_core = -(-N // _NUM_CORES)
    tn_needed = max(128, -(-n_per_core // 128) * 128)
    tn = int(min(_MAX_TILE_N, tn_cap, tn_needed))
    tiles_per_core = -(-N // (_NUM_CORES * tn))
    n_pad = _NUM_CORES * tiles_per_core * tn
    pad = n_pad - N

    batch_i32 = batch.astype(jnp.int32)
    if pad:
        x_p = jnp.pad(x, ((0, pad), (0, 0)))
        # padded rows get out-of-range graph id B -> zero one-hot contribution
        batch_p = jnp.pad(batch_i32, (0, pad), constant_values=B)
    else:
        x_p, batch_p = x, batch_i32
    batch_row = batch_p.reshape(1, n_pad)          # stage-1 lane layout
    batch_col = batch_p.reshape(n_pad, 1)          # stage-2 sublane layout

    T = tiles_per_core
    grid1 = (_NUM_CORES, T)

    q_pad, xres_parts, ksum_parts = pl.pallas_call(
        functools.partial(_stage1_kernel, inv_h=1.0 / H,
                          inv_sqrt_h=float(1.0 / np.sqrt(H))),
        out_shape=(
            jax.ShapeDtypeStruct((n_pad, WS), bf16),
            jax.ShapeDtypeStruct((_NUM_CORES, B, D2), f32),
            jax.ShapeDtypeStruct((_NUM_CORES, B, WS), f32),
        ),
        grid_spec=pltpu.PrefetchScalarGridSpec(
            num_scalar_prefetch=0,
            grid=grid1,
            in_specs=[
                pl.BlockSpec((tn, W), lambda c, i: (c * T + i, 0)),     # x tile
                pl.BlockSpec((1, tn), lambda c, i: (0, c * T + i)),     # batch ids
                pl.BlockSpec((W, W), lambda c, i: (0, 0)),              # wpreT
                pl.BlockSpec((1, W), lambda c, i: (0, 0)),              # bpre
                pl.BlockSpec((2 * W, 2 * G), lambda c, i: (0, 0)),      # GN stats
                pl.BlockSpec((2 * G, 2 * W), lambda c, i: (0, 0)),      # GN bcast
                pl.BlockSpec((W, 3 * WS), lambda c, i: (0, 0)),         # wqkvT
                pl.BlockSpec((WS, D2), lambda c, i: (0, 0)),            # repeat
                pl.BlockSpec((WS, D2), lambda c, i: (0, 0)),            # tile
            ],
            out_specs=(
                pl.BlockSpec((tn, WS), lambda c, i: (c * T + i, 0)),    # q (bf16)
                pl.BlockSpec((None, B, D2), lambda c, i: (c, 0, 0)),    # kv segsum
                pl.BlockSpec((None, B, WS), lambda c, i: (c, 0, 0)),    # k segsum
            ),
        ),
        compiler_params=pltpu.CompilerParams(
            dimension_semantics=("parallel", "arbitrary"),
            vmem_limit_bytes=_VMEM_LIMIT),
    )(x_p, batch_row, wpreT, bpre, gstat, gbcast, wqkvT, rep, tilem)

    # combine per-core partials and add the residual state (one cheap add each)
    xres_new_flat = xres_parts.sum(axis=0) + xres_flat
    ksum = ksum_parts.sum(axis=0)

    y_pad = pl.pallas_call(
        _stage2_kernel,
        out_shape=jax.ShapeDtypeStruct((n_pad, W), f32),
        grid_spec=pltpu.PrefetchScalarGridSpec(
            num_scalar_prefetch=0,
            grid=(n_pad // tn,),
            in_specs=[
                pl.BlockSpec((tn, WS), lambda i: (i, 0)),   # q tile (bf16)
                pl.BlockSpec((tn, 1), lambda i: (i, 0)),    # batch ids
                pl.BlockSpec((B, D2), lambda i: (0, 0)),    # x_res_new (bf16)
                pl.BlockSpec((B, WS), lambda i: (0, 0)),    # k_sum (bf16)
                pl.BlockSpec((WS, GS), lambda i: (0, 0)),   # head-sum matrix
                pl.BlockSpec((GS, WS), lambda i: (0, 0)),   # its transpose
                pl.BlockSpec((WS, D2), lambda i: (0, 0)),   # repeat matrix
                pl.BlockSpec((D2, WS), lambda i: (0, 0)),   # tile matrix^T
                pl.BlockSpec((WS, W), lambda i: (0, 0)),    # wpostT (bf16)
                pl.BlockSpec((1, W), lambda i: (0, 0)),     # bpost
                pl.BlockSpec((1, W), lambda i: (0, 0)),     # exp(scale)
            ],
            out_specs=pl.BlockSpec((tn, W), lambda i: (i, 0)),
        ),
        compiler_params=pltpu.CompilerParams(
            dimension_semantics=("parallel",),
            vmem_limit_bytes=_VMEM_LIMIT),
    )(q_pad, batch_col, xres_new_flat.astype(bf16), ksum.astype(bf16),
      gmat2, gmat2T, rep, tilemT, wpostT, bpost, scale_exp)

    y = y_pad[:N] if pad else y_pad
    return y, xres_new_flat.reshape(B, GS, H, H)


def _reference(x, x_res, batch, params):
    """Pure-JAX reference of the PyTorch forward (high-precision matmuls)."""
    f32 = jnp.float32
    hp = jax.lax.Precision.HIGHEST
    N, W = x.shape
    WS, H = params['wq'].shape
    S = WS // W
    G = W // H
    GS = G * S
    B = x_res.shape[0]

    x = x.astype(f32)
    h = jnp.dot(x, params['wpre'].astype(f32).T, precision=hp) + params['bpre'].astype(f32)
    hg = h.reshape(N, G, H)
    mean = hg.mean(-1, keepdims=True)
    var = hg.var(-1, keepdims=True)
    hn = (hg - mean) / jnp.sqrt(var + _GN_EPS)                  # (N, G, H)

    def grouped(wg):
        w_g = wg.astype(f32).reshape(G, H * S, H)
        out = jnp.einsum('ngh,goh->ngo', hn, w_g, precision=hp)
        return out.reshape(N, GS, H)

    inv = 1.0 / np.sqrt(H)
    q = jnp.exp(grouped(params['wq']) * inv)
    k = jnp.exp(grouped(params['wk']) * inv)
    v = grouped(params['wv'])

    kv = jnp.einsum('nrh,nrv->nrhv', k, v, precision=hp)
    kv_sum = jax.ops.segment_sum(kv, batch, num_segments=B) + x_res.astype(f32)
    k_sum = jax.ops.segment_sum(k, batch, num_segments=B)

    k_g = k_sum[batch]
    denom = jnp.einsum('nrh,nrh->nr', q, k_g, precision=hp)
    qn = q / denom[:, :, None]
    out = jnp.einsum('nrh,nrhv->nrv', qn, kv_sum[batch], precision=hp).reshape(N, WS)
    y = jnp.dot(out, params['wpost'].astype(f32).T, precision=hp) + params['bpost'].astype(f32)
    y = jnp.exp(params['scale'].astype(f32)) * y
    return y, kv_sum


if __name__ == "__main__":
    key = jax.random.PRNGKey(0)
    ks = jax.random.split(key, 10)

    # AttMessage(width=32, width_head=8, width_scale=2) on a small graph batch.
    W, H, S = 32, 8, 2
    G, WS = W // H, W * S
    GS = G * S
    N, B = 16, 2

    x = jax.random.normal(ks[0], (N, W), dtype=jnp.float32)
    x_res = 0.1 * jax.random.normal(ks[1], (B, GS, H, H), dtype=jnp.float32)
    batch = jax.random.randint(ks[2], (N,), 0, B)

    params = {
        'wpre': 0.2 * jax.random.normal(ks[3], (W, W), dtype=jnp.float32),
        'bpre': 0.1 * jax.random.normal(ks[4], (W,), dtype=jnp.float32),
        'wq': 0.15 * jax.random.normal(ks[5], (WS, H), dtype=jnp.float32),
        'wk': 0.15 * jax.random.normal(ks[6], (WS, H), dtype=jnp.float32),
        'wv': 0.3 * jax.random.normal(ks[7], (WS, H), dtype=jnp.float32),
        'wpost': 0.1 * jax.random.normal(ks[8], (W, WS), dtype=jnp.float32),
        'bpost': 0.05 * jax.random.normal(ks[9], (W,), dtype=jnp.float32),
        'scale': jnp.full((W,), float(np.log(0.01)), dtype=jnp.float32),  # ScaleLayer
    }

    y, xres_new = att_message_forward(x, x_res, batch, params)
    y = jax.block_until_ready(y)
    xres_new = jax.block_until_ready(xres_new)

    y_ref, xres_ref = _reference(x, x_res, batch, params)

    assert y.shape == (N, W), y.shape
    assert xres_new.shape == (B, GS, H, H), xres_new.shape
    assert bool(jnp.all(jnp.isfinite(y))) and bool(jnp.all(jnp.isfinite(xres_new)))

    # Tolerance (max-normalized) accounts for bf16 MXU operands with f32
    # accumulation and the approximate EUP reciprocal vs the f32 HIGHEST ref.
    def _check(got, ref, rel, name):
        err = float(jnp.max(jnp.abs(got.astype(jnp.float32) - ref)))
        scale = float(jnp.max(jnp.abs(ref))) + 1e-12
        assert err <= rel * scale, (name, err, scale)

    _check(y, y_ref, 4e-2, "y")
    _check(xres_new, xres_ref, 4e-2, "x_res")

    print("KERNEL_OK")
</pallas_src>

<mosaic_0001>
module attributes {stable_mosaic.version = 11 : i64} {
  func.func @_stage1_kernel(%arg0: i32, %arg1: i32, %arg2: memref<128x32xf32, #tpu.memory_space<vmem>>, %arg3: memref<1x128xi32, #tpu.memory_space<vmem>>, %arg4: memref<32x32xf32, #tpu.memory_space<vmem>>, %arg5: memref<1x32xf32, #tpu.memory_space<vmem>>, %arg6: memref<64x8xf32, #tpu.memory_space<vmem>>, %arg7: memref<8x64xf32, #tpu.memory_space<vmem>>, %arg8: memref<32x192xbf16, #tpu.memory_space<vmem>>, %arg9: memref<64x512xbf16, #tpu.memory_space<vmem>>, %arg10: memref<64x512xbf16, #tpu.memory_space<vmem>>, %arg11: memref<128x64xbf16, #tpu.memory_space<vmem>>, %arg12: memref<1x2x512xf32, #tpu.memory_space<vmem>>, %arg13: memref<1x2x64xf32, #tpu.memory_space<vmem>>) attributes {dimension_semantics = [#tpu.dimension_semantics<parallel>, #tpu.dimension_semantics<arbitrary>], iteration_bounds = array<i64: 2, 1>, scalar_prefetch = 0 : i64, scratch_operands = 0 : i64, tpu.core_type = #tpu.core_type<tc>, window_params = [{transform_indices = @transform_0, window_bounds = array<i64: 128, 32>}, {transform_indices = @transform_1, window_bounds = array<i64: 1, 128>}, {pipeline_mode = #tpu.pipeline_mode<synchronous>, transform_indices = @transform_2, window_bounds = array<i64: 32, 32>}, {pipeline_mode = #tpu.pipeline_mode<synchronous>, transform_indices = @transform_3, window_bounds = array<i64: 1, 32>}, {pipeline_mode = #tpu.pipeline_mode<synchronous>, transform_indices = @transform_4, window_bounds = array<i64: 64, 8>}, {pipeline_mode = #tpu.pipeline_mode<synchronous>, transform_indices = @transform_5, window_bounds = array<i64: 8, 64>}, {pipeline_mode = #tpu.pipeline_mode<synchronous>, transform_indices = @transform_6, window_bounds = array<i64: 32, 192>}, {pipeline_mode = #tpu.pipeline_mode<synchronous>, transform_indices = @transform_7, window_bounds = array<i64: 64, 512>}, {pipeline_mode = #tpu.pipeline_mode<synchronous>, transform_indices = @transform_8, window_bounds = array<i64: 64, 512>}, {transform_indices = @transform_9, window_bounds = array<i64: 128, 64>}, {transform_indices = @transform_10, window_bounds = array<i64: 1, 2, 512>}, {transform_indices = @transform_11, window_bounds = array<i64: 1, 2, 64>}]} {
    %c0_i32 = arith.constant 0 : i32
    %0 = arith.cmpi eq, %arg1, %c0_i32 : i32
    %1 = arith.extui %0 : i1 to i32
    %c0_i32_0 = arith.constant 0 : i32
    %2 = arith.cmpi ne, %1, %c0_i32_0 : i32
    scf.if %2 {
      %cst_42 = arith.constant 0.000000e+00 : f32
      %70 = vector.broadcast %cst_42 : f32 to vector<2x512xf32>
      %c0_43 = arith.constant 0 : index
      %c0_44 = arith.constant 0 : index
      %c0_45 = arith.constant 0 : index
      %71 = vector.load %arg12[%c0_43, %c0_44, %c0_45] : memref<1x2x512xf32, #tpu.memory_space<vmem>>, vector<1x2x512xf32>
      %72 = vector.shape_cast %71 : vector<1x2x512xf32> to vector<2x512xf32>
      %73 = vector.shape_cast %70 : vector<2x512xf32> to vector<1x2x512xf32>
      tpu.vector_store %arg12[%c0_43, %c0_44, %c0_45], %73 {strides = array<i32>} : memref<1x2x512xf32, #tpu.memory_space<vmem>>, vector<1x2x512xf32>,
      %cst_46 = arith.constant 0.000000e+00 : f32
      %74 = vector.broadcast %cst_46 : f32 to vector<2x64xf32>
      %c0_47 = arith.constant 0 : index
      %c0_48 = arith.constant 0 : index
      %c0_49 = arith.constant 0 : index
      %75 = vector.load %arg13[%c0_47, %c0_48, %c0_49] : memref<1x2x64xf32, #tpu.memory_space<vmem>>, vector<1x2x64xf32>
      %76 = vector.shape_cast %75 : vector<1x2x64xf32> to vector<2x64xf32>
      %77 = vector.shape_cast %74 : vector<2x64xf32> to vector<1x2x64xf32>
      tpu.vector_store %arg13[%c0_47, %c0_48, %c0_49], %77 {strides = array<i32>} : memref<1x2x64xf32, #tpu.memory_space<vmem>>, vector<1x2x64xf32>,
    } else {
    }
    %c0 = arith.constant 0 : index
    %c0_1 = arith.constant 0 : index
    %3 = vector.load %arg2[%c0, %c0_1] : memref<128x32xf32, #tpu.memory_space<vmem>>, vector<128x32xf32>
    %c0_2 = arith.constant 0 : index
    %c0_3 = arith.constant 0 : index
    %4 = vector.load %arg4[%c0_2, %c0_3] : memref<32x32xf32, #tpu.memory_space<vmem>>, vector<32x32xf32>
    %cst = arith.constant dense<0.000000e+00> : vector<128x32xf32>
    %5 = tpu.matmul %3, %4, %cst {dimension_numbers = #tpu.dot_dimension_numbers<[1], [0], [0], [1], [0, 0, 1, 1], [], []>} : vector<128x32xf32>, vector<32x32xf32>, vector<128x32xf32> -> vector<128x32xf32>
    %c0_4 = arith.constant 0 : index
    %c0_5 = arith.constant 0 : index
    %6 = vector.load %arg5[%c0_4, %c0_5] : memref<1x32xf32, #tpu.memory_space<vmem>>, vector<1x32xf32>
    %7 = vector.broadcast %6 : vector<1x32xf32> to vector<128x32xf32>
    %8 = arith.addf %5, %7 : vector<128x32xf32>
    %9 = arith.mulf %8, %8 : vector<128x32xf32>
    %10 = tpu.concatenate %8, %9 in 1 : vector<128x32xf32>, vector<128x32xf32> -> vector<128x64xf32>
    %c0_6 = arith.constant 0 : index
    %c0_7 = arith.constant 0 : index
    %11 = vector.load %arg6[%c0_6, %c0_7] : memref<64x8xf32, #tpu.memory_space<vmem>>, vector<64x8xf32>
    %cst_8 = arith.constant dense<0.000000e+00> : vector<128x8xf32>
    %12 = tpu.matmul %10, %11, %cst_8 {dimension_numbers = #tpu.dot_dimension_numbers<[1], [0], [0], [1], [0, 0, 1, 1], [], []>} : vector<128x64xf32>, vector<64x8xf32>, vector<128x8xf32> -> vector<128x8xf32>
    %cst_9 = arith.constant 1.250000e-01 : f32
    %13 = vector.broadcast %cst_9 : f32 to vector<128x8xf32>
    %14 = arith.mulf %12, %13 : vector<128x8xf32>
    %15 = vector.extract_strided_slice %14 {offsets = [0, 0], sizes = [128, 4], strides = [1, 1]} : vector<128x8xf32> to vector<128x4xf32>
    %16 = vector.extract_strided_slice %14 {offsets = [0, 4], sizes = [128, 4], strides = [1, 1]} : vector<128x8xf32> to vector<128x4xf32>
    %17 = arith.mulf %15, %15 : vector<128x4xf32>
    %18 = arith.subf %16, %17 : vector<128x4xf32>
    %cst_10 = arith.constant 9.99999974E-6 : f32
    %19 = vector.broadcast %cst_10 : f32 to vector<128x4xf32>
    %20 = arith.addf %18, %19 : vector<128x4xf32>
    %21 = math.rsqrt %20 : vector<128x4xf32>
    %22 = tpu.concatenate %15, %21 in 1 : vector<128x4xf32>, vector<128x4xf32> -> vector<128x8xf32>
    %c0_11 = arith.constant 0 : index
    %c0_12 = arith.constant 0 : index
    %23 = vector.load %arg7[%c0_11, %c0_12] : memref<8x64xf32, #tpu.memory_space<vmem>>, vector<8x64xf32>
    %cst_13 = arith.constant dense<0.000000e+00> : vector<128x64xf32>
    %24 = tpu.matmul %22, %23, %cst_13 {dimension_numbers = #tpu.dot_dimension_numbers<[1], [0], [0], [1], [0, 0, 1, 1], [], []>} : vector<128x8xf32>, vector<8x64xf32>, vector<128x64xf32> -> vector<128x64xf32>
    %25 = vector.extract_strided_slice %24 {offsets = [0, 0], sizes = [128, 32], strides = [1, 1]} : vector<128x64xf32> to vector<128x32xf32>
    %26 = arith.subf %8, %25 : vector<128x32xf32>
    %27 = vector.extract_strided_slice %24 {offsets = [0, 32], sizes = [128, 32], strides = [1, 1]} : vector<128x64xf32> to vector<128x32xf32>
    %28 = arith.mulf %26, %27 : vector<128x32xf32>
    %29 = arith.truncf %28 : vector<128x32xf32> to vector<128x32xbf16>
    %c0_14 = arith.constant 0 : index
    %c0_15 = arith.constant 0 : index
    %30 = vector.load %arg8[%c0_14, %c0_15] : memref<32x192xbf16, #tpu.memory_space<vmem>>, vector<32x192xbf16>
    %cst_16 = arith.constant dense<0.000000e+00> : vector<128x192xf32>
    %31 = tpu.matmul %29, %30, %cst_16 {dimension_numbers = #tpu.dot_dimension_numbers<[1], [0], [0], [1], [0, 0, 1, 1], [], []>} : vector<128x32xbf16>, vector<32x192xbf16>, vector<128x192xf32> -> vector<128x192xf32>
    %32 = vector.extract_strided_slice %31 {offsets = [0, 0], sizes = [128, 128], strides = [1, 1]} : vector<128x192xf32> to vector<128x128xf32>
    %cst_17 = arith.constant 0.353553385 : f32
    %33 = vector.broadcast %cst_17 : f32 to vector<128x128xf32>
    %34 = arith.mulf %32, %33 : vector<128x128xf32>
    %35 = math.exp %34 : vector<128x128xf32>
    %36 = vector.extract_strided_slice %35 {offsets = [0, 0], sizes = [128, 64], strides = [1, 1]} : vector<128x128xf32> to vector<128x64xf32>
    %37 = vector.extract_strided_slice %35 {offsets = [0, 64], sizes = [128, 64], strides = [1, 1]} : vector<128x128xf32> to vector<128x64xf32>
    %38 = vector.extract_strided_slice %31 {offsets = [0, 128], sizes = [128, 64], strides = [1, 1]} : vector<128x192xf32> to vector<128x64xf32>
    %39 = arith.truncf %36 : vector<128x64xf32> to vector<128x64xbf16>
    %c0_18 = arith.constant 0 : index
    %c0_19 = arith.constant 0 : index
    %40 = vector.load %arg11[%c0_18, %c0_19] : memref<128x64xbf16, #tpu.memory_space<vmem>>, vector<128x64xbf16>
    tpu.vector_store %arg11[%c0_18, %c0_19], %39 {strides = array<i32>} : memref<128x64xbf16, #tpu.memory_space<vmem>>, vector<128x64xbf16>,
    %41 = arith.truncf %37 : vector<128x64xf32> to vector<128x64xbf16>
    %c0_20 = arith.constant 0 : index
    %c0_21 = arith.constant 0 : index
    %42 = vector.load %arg9[%c0_20, %c0_21] : memref<64x512xbf16, #tpu.memory_space<vmem>>, vector<64x512xbf16>
    %cst_22 = arith.constant dense<0.000000e+00> : vector<128x512xf32>
    %43 = tpu.matmul %41, %42, %cst_22 {dimension_numbers = #tpu.dot_dimension_numbers<[1], [0], [0], [1], [0, 0, 1, 1], [], []>} : vector<128x64xbf16>, vector<64x512xbf16>, vector<128x512xf32> -> vector<128x512xf32>
    %44 = arith.truncf %38 : vector<128x64xf32> to vector<128x64xbf16>
    %c0_23 = arith.constant 0 : index
    %c0_24 = arith.constant 0 : index
    %45 = vector.load %arg10[%c0_23, %c0_24] : memref<64x512xbf16, #tpu.memory_space<vmem>>, vector<64x512xbf16>
    %cst_25 = arith.constant dense<0.000000e+00> : vector<128x512xf32>
    %46 = tpu.matmul %44, %45, %cst_25 {dimension_numbers = #tpu.dot_dimension_numbers<[1], [0], [0], [1], [0, 0, 1, 1], [], []>} : vector<128x64xbf16>, vector<64x512xbf16>, vector<128x512xf32> -> vector<128x512xf32>
    %47 = arith.mulf %43, %46 : vector<128x512xf32>
    %48 = tpu.iota {dimensions = array<i32: 0>} : vector<2x128xi32>
    %c0_26 = arith.constant 0 : index
    %c0_27 = arith.constant 0 : index
    %49 = vector.load %arg3[%c0_26, %c0_27] : memref<1x128xi32, #tpu.memory_space<vmem>>, vector<1x128xi32>
    %50 = vector.broadcast %49 : vector<1x128xi32> to vector<2x128xi32>
    %51 = arith.cmpi eq, %48, %50 : vector<2x128xi32>
    %52 = arith.extui %51 : vector<2x128xi1> to vector<2x128xi32>
    %53 = arith.sitofp %52 : vector<2x128xi32> to vector<2x128xf32>
    %54 = arith.truncf %53 : vector<2x128xf32> to vector<2x128xbf16>
    %c0_28 = arith.constant 0 : index
    %c0_29 = arith.constant 0 : index
    %c0_30 = arith.constant 0 : index
    %55 = vector.load %arg12[%c0_28, %c0_29, %c0_30] : memref<1x2x512xf32, #tpu.memory_space<vmem>>, vector<1x2x512xf32>
    %56 = vector.shape_cast %55 : vector<1x2x512xf32> to vector<2x512xf32>
    %57 = arith.truncf %47 : vector<128x512xf32> to vector<128x512xbf16>
    %cst_31 = arith.constant dense<0.000000e+00> : vector<2x512xf32>
    %58 = tpu.matmul %54, %57, %cst_31 {dimension_numbers = #tpu.dot_dimension_numbers<[1], [0], [0], [1], [0, 0, 1, 1], [], []>} : vector<2x128xbf16>, vector<128x512xbf16>, vector<2x512xf32> -> vector<2x512xf32>
    %59 = arith.addf %56, %58 : vector<2x512xf32>
    %c0_32 = arith.constant 0 : index
    %c0_33 = arith.constant 0 : index
    %c0_34 = arith.constant 0 : index
    %60 = vector.load %arg12[%c0_32, %c0_33, %c0_34] : memref<1x2x512xf32, #tpu.memory_space<vmem>>, vector<1x2x512xf32>
    %61 = vector.shape_cast %60 : vector<1x2x512xf32> to vector<2x512xf32>
    %62 = vector.shape_cast %59 : vector<2x512xf32> to vector<1x2x512xf32>
    tpu.vector_store %arg12[%c0_32, %c0_33, %c0_34], %62 {strides = array<i32>} : memref<1x2x512xf32, #tpu.memory_space<vmem>>, vector<1x2x512xf32>,
    %c0_35 = arith.constant 0 : index
    %c0_36 = arith.constant 0 : index
    %c0_37 = arith.constant 0 : index
    %63 = vector.load %arg13[%c0_35, %c0_36, %c0_37] : memref<1x2x64xf32, #tpu.memory_space<vmem>>, vector<1x2x64xf32>
    %64 = vector.shape_cast %63 : vector<1x2x64xf32> to vector<2x64xf32>
    %cst_38 = arith.constant dense<0.000000e+00> : vector<2x64xf32>
    %65 = tpu.matmul %54, %41, %cst_38 {dimension_numbers = #tpu.dot_dimension_numbers<[1], [0], [0], [1], [0, 0, 1, 1], [], []>} : vector<2x128xbf16>, vector<128x64xbf16>, vector<2x64xf32> -> vector<2x64xf32>
    %66 = arith.addf %64, %65 : vector<2x64xf32>
    %c0_39 = arith.constant 0 : index
    %c0_40 = arith.constant 0 : index
    %c0_41 = arith.constant 0 : index
    %67 = vector.load %arg13[%c0_39, %c0_40, %c0_41] : memref<1x2x64xf32, #tpu.memory_space<vmem>>, vector<1x2x64xf32>
    %68 = vector.shape_cast %67 : vector<1x2x64xf32> to vector<2x64xf32>
    %69 = vector.shape_cast %66 : vector<2x64xf32> to vector<1x2x64xf32>
    tpu.vector_store %arg13[%c0_39, %c0_40, %c0_41], %69 {strides = array<i32>} : memref<1x2x64xf32, #tpu.memory_space<vmem>>, vector<1x2x64xf32>,
    return
  }
  func.func @transform_0(%arg0: i32, %arg1: i32) -> (i32, i32) {
    %c1_i32 = arith.constant 1 : i32
    %0 = arith.muli %arg0, %c1_i32 : i32
    %1 = arith.addi %0, %arg1 : i32
    %c0_i32 = arith.constant 0 : i32
    %c0_i32_0 = arith.constant 0 : i32
    return %1, %c0_i32 : i32, i32
  }
  func.func @transform_1(%arg0: i32, %arg1: i32) -> (i32, i32) {
    %c1_i32 = arith.constant 1 : i32
    %0 = arith.muli %arg0, %c1_i32 : i32
    %1 = arith.addi %0, %arg1 : i32
    %c0_i32 = arith.constant 0 : i32
    %c0_i32_0 = arith.constant 0 : i32
    return %c0_i32, %1 : i32, i32
  }
  func.func @transform_2(%arg0: i32, %arg1: i32) -> (i32, i32) {
    %c0_i32 = arith.constant 0 : i32
    %c0_i32_0 = arith.constant 0 : i32
    %c0_i32_1 = arith.constant 0 : i32
    return %c0_i32, %c0_i32_0 : i32, i32
  }
  func.func @transform_3(%arg0: i32, %arg1: i32) -> (i32, i32) {
    %c0_i32 = arith.constant 0 : i32
    %c0_i32_0 = arith.constant 0 : i32
    %c0_i32_1 = arith.constant 0 : i32
    return %c0_i32, %c0_i32_0 : i32, i32
  }
  func.func @transform_4(%arg0: i32, %arg1: i32) -> (i32, i32) {
    %c0_i32 = arith.constant 0 : i32
    %c0_i32_0 = arith.constant 0 : i32
    %c0_i32_1 = arith.constant 0 : i32
    return %c0_i32, %c0_i32_0 : i32, i32
  }
  func.func @transform_5(%arg0: i32, %arg1: i32) -> (i32, i32) {
    %c0_i32 = arith.constant 0 : i32
    %c0_i32_0 = arith.constant 0 : i32
    %c0_i32_1 = arith.constant 0 : i32
    return %c0_i32, %c0_i32_0 : i32, i32
  }
  func.func @transform_6(%arg0: i32, %arg1: i32) -> (i32, i32) {
    %c0_i32 = arith.constant 0 : i32
    %c0_i32_0 = arith.constant 0 : i32
    %c0_i32_1 = arith.constant 0 : i32
    return %c0_i32, %c0_i32_0 : i32, i32
  }
  func.func @transform_7(%arg0: i32, %arg1: i32) -> (i32, i32) {
    %c0_i32 = arith.constant 0 : i32
    %c0_i32_0 = arith.constant 0 : i32
    %c0_i32_1 = arith.constant 0 : i32
    return %c0_i32, %c0_i32_0 : i32, i32
  }
  func.func @transform_8(%arg0: i32, %arg1: i32) -> (i32, i32) {
    %c0_i32 = arith.constant 0 : i32
    %c0_i32_0 = arith.constant 0 : i32
    %c0_i32_1 = arith.constant 0 : i32
    return %c0_i32, %c0_i32_0 : i32, i32
  }
  func.func @transform_9(%arg0: i32, %arg1: i32) -> (i32, i32) {
    %c1_i32 = arith.constant 1 : i32
    %0 = arith.muli %arg0, %c1_i32 : i32
    %1 = arith.addi %0, %arg1 : i32
    %c0_i32 = arith.constant 0 : i32
    %c0_i32_0 = arith.constant 0 : i32
    return %1, %c0_i32 : i32, i32
  }
  func.func @transform_10(%arg0: i32, %arg1: i32) -> (i32, i32, i32) {
    %c0_i32 = arith.constant 0 : i32
    %c0_i32_0 = arith.constant 0 : i32
    %c0_i32_1 = arith.constant 0 : i32
    return %arg0, %c0_i32, %c0_i32_0 : i32, i32, i32
  }
  func.func @transform_11(%arg0: i32, %arg1: i32) -> (i32, i32, i32) {
    %c0_i32 = arith.constant 0 : i32
    %c0_i32_0 = arith.constant 0 : i32
    %c0_i32_1 = arith.constant 0 : i32
    return %arg0, %c0_i32, %c0_i32_0 : i32, i32, i32
  }
}

module attributes {stable_mosaic.version = 11 : i64} {
  func.func @_stage2_kernel(%arg0: i32, %arg1: memref<128x64xbf16, #tpu.memory_space<vmem>>, %arg2: memref<128x1xi32, #tpu.memory_space<vmem>>, %arg3: memref<2x512xbf16, #tpu.memory_space<vmem>>, %arg4: memref<2x64xbf16, #tpu.memory_space<vmem>>, %arg5: memref<64x8xf32, #tpu.memory_space<vmem>>, %arg6: memref<8x64xf32, #tpu.memory_space<vmem>>, %arg7: memref<64x512xbf16, #tpu.memory_space<vmem>>, %arg8: memref<512x64xbf16, #tpu.memory_space<vmem>>, %arg9: memref<64x32xbf16, #tpu.memory_space<vmem>>, %arg10: memref<1x32xf32, #tpu.memory_space<vmem>>, %arg11: memref<1x32xf32, #tpu.memory_space<vmem>>, %arg12: memref<128x32xf32, #tpu.memory_space<vmem>>) attributes {dimension_semantics = [#tpu.dimension_semantics<parallel>], iteration_bounds = array<i64: 2>, scalar_prefetch = 0 : i64, scratch_operands = 0 : i64, tpu.core_type = #tpu.core_type<tc>, window_params = [{transform_indices = @transform_0, window_bounds = array<i64: 128, 64>}, {transform_indices = @transform_1, window_bounds = array<i64: 128, 1>}, {pipeline_mode = #tpu.pipeline_mode<synchronous>, transform_indices = @transform_2, window_bounds = array<i64: 2, 512>}, {pipeline_mode = #tpu.pipeline_mode<synchronous>, transform_indices = @transform_3, window_bounds = array<i64: 2, 64>}, {pipeline_mode = #tpu.pipeline_mode<synchronous>, transform_indices = @transform_4, window_bounds = array<i64: 64, 8>}, {pipeline_mode = #tpu.pipeline_mode<synchronous>, transform_indices = @transform_5, window_bounds = array<i64: 8, 64>}, {pipeline_mode = #tpu.pipeline_mode<synchronous>, transform_indices = @transform_6, window_bounds = array<i64: 64, 512>}, {pipeline_mode = #tpu.pipeline_mode<synchronous>, transform_indices = @transform_7, window_bounds = array<i64: 512, 64>}, {pipeline_mode = #tpu.pipeline_mode<synchronous>, transform_indices = @transform_8, window_bounds = array<i64: 64, 32>}, {pipeline_mode = #tpu.pipeline_mode<synchronous>, transform_indices = @transform_9, window_bounds = array<i64: 1, 32>}, {pipeline_mode = #tpu.pipeline_mode<synchronous>, transform_indices = @transform_10, window_bounds = array<i64: 1, 32>}, {transform_indices = @transform_11, window_bounds = array<i64: 128, 32>}]} {
    %c0 = arith.constant 0 : index
    %c0_0 = arith.constant 0 : index
    %0 = vector.load %arg1[%c0, %c0_0] : memref<128x64xbf16, #tpu.memory_space<vmem>>, vector<128x64xbf16>
    %1 = arith.extf %0 : vector<128x64xbf16> to vector<128x64xf32>
    %2 = tpu.iota {dimensions = array<i32: 1>} : vector<128x2xi32>
    %c0_1 = arith.constant 0 : index
    %c0_2 = arith.constant 0 : index
    %3 = vector.load %arg2[%c0_1, %c0_2] : memref<128x1xi32, #tpu.memory_space<vmem>>, vector<128x1xi32>
    %4 = vector.broadcast %3 : vector<128x1xi32> to vector<128x2xi32>
    %5 = arith.cmpi eq, %2, %4 : vector<128x2xi32>
    %6 = arith.extui %5 : vector<128x2xi1> to vector<128x2xi32>
    %7 = arith.sitofp %6 : vector<128x2xi32> to vector<128x2xf32>
    %8 = arith.truncf %7 : vector<128x2xf32> to vector<128x2xbf16>
    %c0_3 = arith.constant 0 : index
    %c0_4 = arith.constant 0 : index
    %9 = vector.load %arg4[%c0_3, %c0_4] : memref<2x64xbf16, #tpu.memory_space<vmem>>, vector<2x64xbf16>
    %cst = arith.constant dense<0.000000e+00> : vector<128x64xf32>
    %10 = tpu.matmul %8, %9, %cst {dimension_numbers = #tpu.dot_dimension_numbers<[1], [0], [0], [1], [0, 0, 1, 1], [], []>} : vector<128x2xbf16>, vector<2x64xbf16>, vector<128x64xf32> -> vector<128x64xf32>
    %c0_5 = arith.constant 0 : index
    %c0_6 = arith.constant 0 : index
    %11 = vector.load %arg3[%c0_5, %c0_6] : memref<2x512xbf16, #tpu.memory_space<vmem>>, vector<2x512xbf16>
    %cst_7 = arith.constant dense<0.000000e+00> : vector<128x512xf32>
    %12 = tpu.matmul %8, %11, %cst_7 {dimension_numbers = #tpu.dot_dimension_numbers<[1], [0], [0], [1], [0, 0, 1, 1], [], []>} : vector<128x2xbf16>, vector<2x512xbf16>, vector<128x512xf32> -> vector<128x512xf32>
    %13 = arith.mulf %1, %10 : vector<128x64xf32>
    %c0_8 = arith.constant 0 : index
    %c0_9 = arith.constant 0 : index
    %14 = vector.load %arg5[%c0_8, %c0_9] : memref<64x8xf32, #tpu.memory_space<vmem>>, vector<64x8xf32>
    %cst_10 = arith.constant dense<0.000000e+00> : vector<128x8xf32>
    %15 = tpu.matmul %13, %14, %cst_10 {dimension_numbers = #tpu.dot_dimension_numbers<[1], [0], [0], [1], [0, 0, 1, 1], [], []>} : vector<128x64xf32>, vector<64x8xf32>, vector<128x8xf32> -> vector<128x8xf32>
    %cst_11 = arith.constant 9.99999996E-13 : f32
    %16 = vector.broadcast %cst_11 : f32 to vector<128x8xf32>
    %17 = arith.maximumf %15, %16 : vector<128x8xf32>
    %18 = tpu.reciprocal %17 {approx = true} : vector<128x8xf32> -> vector<128x8xf32>
    %c0_12 = arith.constant 0 : index
    %c0_13 = arith.constant 0 : index
    %19 = vector.load %arg6[%c0_12, %c0_13] : memref<8x64xf32, #tpu.memory_space<vmem>>, vector<8x64xf32>
    %cst_14 = arith.constant dense<0.000000e+00> : vector<128x64xf32>
    %20 = tpu.matmul %18, %19, %cst_14 {dimension_numbers = #tpu.dot_dimension_numbers<[1], [0], [0], [1], [0, 0, 1, 1], [], []>} : vector<128x8xf32>, vector<8x64xf32>, vector<128x64xf32> -> vector<128x64xf32>
    %21 = arith.mulf %1, %20 : vector<128x64xf32>
    %22 = arith.truncf %21 : vector<128x64xf32> to vector<128x64xbf16>
    %c0_15 = arith.constant 0 : index
    %c0_16 = arith.constant 0 : index
    %23 = vector.load %arg7[%c0_15, %c0_16] : memref<64x512xbf16, #tpu.memory_space<vmem>>, vector<64x512xbf16>
    %cst_17 = arith.constant dense<0.000000e+00> : vector<128x512xf32>
    %24 = tpu.matmul %22, %23, %cst_17 {dimension_numbers = #tpu.dot_dimension_numbers<[1], [0], [0], [1], [0, 0, 1, 1], [], []>} : vector<128x64xbf16>, vector<64x512xbf16>, vector<128x512xf32> -> vector<128x512xf32>
    %25 = arith.mulf %24, %12 : vector<128x512xf32>
    %26 = arith.truncf %25 : vector<128x512xf32> to vector<128x512xbf16>
    %c0_18 = arith.constant 0 : index
    %c0_19 = arith.constant 0 : index
    %27 = vector.load %arg8[%c0_18, %c0_19] : memref<512x64xbf16, #tpu.memory_space<vmem>>, vector<512x64xbf16>
    %cst_20 = arith.constant dense<0.000000e+00> : vector<128x64xf32>
    %28 = tpu.matmul %26, %27, %cst_20 {dimension_numbers = #tpu.dot_dimension_numbers<[1], [0], [0], [1], [0, 0, 1, 1], [], []>} : vector<128x512xbf16>, vector<512x64xbf16>, vector<128x64xf32> -> vector<128x64xf32>
    %29 = arith.truncf %28 : vector<128x64xf32> to vector<128x64xbf16>
    %c0_21 = arith.constant 0 : index
    %c0_22 = arith.constant 0 : index
    %30 = vector.load %arg9[%c0_21, %c0_22] : memref<64x32xbf16, #tpu.memory_space<vmem>>, vector<64x32xbf16>
    %cst_23 = arith.constant dense<0.000000e+00> : vector<128x32xf32>
    %31 = tpu.matmul %29, %30, %cst_23 {dimension_numbers = #tpu.dot_dimension_numbers<[1], [0], [0], [1], [0, 0, 1, 1], [], []>} : vector<128x64xbf16>, vector<64x32xbf16>, vector<128x32xf32> -> vector<128x32xf32>
    %c0_24 = arith.constant 0 : index
    %c0_25 = arith.constant 0 : index
    %32 = vector.load %arg10[%c0_24, %c0_25] : memref<1x32xf32, #tpu.memory_space<vmem>>, vector<1x32xf32>
    %33 = vector.broadcast %32 : vector<1x32xf32> to vector<128x32xf32>
    %34 = arith.addf %31, %33 : vector<128x32xf32>
    %c0_26 = arith.constant 0 : index
    %c0_27 = arith.constant 0 : index
    %35 = vector.load %arg11[%c0_26, %c0_27] : memref<1x32xf32, #tpu.memory_space<vmem>>, vector<1x32xf32>
    %36 = vector.broadcast %35 : vector<1x32xf32> to vector<128x32xf32>
    %37 = arith.mulf %34, %36 : vector<128x32xf32>
    %c0_28 = arith.constant 0 : index
    %c0_29 = arith.constant 0 : index
    %38 = vector.load %arg12[%c0_28, %c0_29] : memref<128x32xf32, #tpu.memory_space<vmem>>, vector<128x32xf32>
    tpu.vector_store %arg12[%c0_28, %c0_29], %37 {strides = array<i32>} : memref<128x32xf32, #tpu.memory_space<vmem>>, vector<128x32xf32>,
    return
  }
  func.func @transform_0(%arg0: i32) -> (i32, i32) {
    %c0_i32 = arith.constant 0 : i32
    %c0_i32_0 = arith.constant 0 : i32
    return %arg0, %c0_i32 : i32, i32
  }
  func.func @transform_1(%arg0: i32) -> (i32, i32) {
    %c0_i32 = arith.constant 0 : i32
    %c0_i32_0 = arith.constant 0 : i32
    return %arg0, %c0_i32 : i32, i32
  }
  func.func @transform_2(%arg0: i32) -> (i32, i32) {
    %c0_i32 = arith.constant 0 : i32
    %c0_i32_0 = arith.constant 0 : i32
    %c0_i32_1 = arith.constant 0 : i32
    return %c0_i32, %c0_i32_0 : i32, i32
  }
  func.func @transform_3(%arg0: i32) -> (i32, i32) {
    %c0_i32 = arith.constant 0 : i32
    %c0_i32_0 = arith.constant 0 : i32
    %c0_i32_1 = arith.constant 0 : i32
    return %c0_i32, %c0_i32_0 : i32, i32
  }
  func.func @transform_4(%arg0: i32) -> (i32, i32) {
    %c0_i32 = arith.constant 0 : i32
    %c0_i32_0 = arith.constant 0 : i32
    %c0_i32_1 = arith.constant 0 : i32
    return %c0_i32, %c0_i32_0 : i32, i32
  }
  func.func @transform_5(%arg0: i32) -> (i32, i32) {
    %c0_i32 = arith.constant 0 : i32
    %c0_i32_0 = arith.constant 0 : i32
    %c0_i32_1 = arith.constant 0 : i32
    return %c0_i32, %c0_i32_0 : i32, i32
  }
  func.func @transform_6(%arg0: i32) -> (i32, i32) {
    %c0_i32 = arith.constant 0 : i32
    %c0_i32_0 = arith.constant 0 : i32
    %c0_i32_1 = arith.constant 0 : i32
    return %c0_i32, %c0_i32_0 : i32, i32
  }
  func.func @transform_7(%arg0: i32) -> (i32, i32) {
    %c0_i32 = arith.constant 0 : i32
    %c0_i32_0 = arith.constant 0 : i32
    %c0_i32_1 = arith.constant 0 : i32
    return %c0_i32, %c0_i32_0 : i32, i32
  }
  func.func @transform_8(%arg0: i32) -> (i32, i32) {
    %c0_i32 = arith.constant 0 : i32
    %c0_i32_0 = arith.constant 0 : i32
    %c0_i32_1 = arith.constant 0 : i32
    return %c0_i32, %c0_i32_0 : i32, i32
  }
  func.func @transform_9(%arg0: i32) -> (i32, i32) {
    %c0_i32 = arith.constant 0 : i32
    %c0_i32_0 = arith.constant 0 : i32
    %c0_i32_1 = arith.constant 0 : i32
    return %c0_i32, %c0_i32_0 : i32, i32
  }
  func.func @transform_10(%arg0: i32) -> (i32, i32) {
    %c0_i32 = arith.constant 0 : i32
    %c0_i32_0 = arith.constant 0 : i32
    %c0_i32_1 = arith.constant 0 : i32
    return %c0_i32, %c0_i32_0 : i32, i32
  }
  func.func @transform_11(%arg0: i32) -> (i32, i32) {
    %c0_i32 = arith.constant 0 : i32
    %c0_i32_0 = arith.constant 0 : i32
    return %arg0, %c0_i32 : i32, i32
  }
}

</mosaic_0001>

<bundles_post_ra>
// kernel: att_message_forward.2
= control target key start
LH: loop header
LB: loop body
LE: loop exit
PB: predicated region body
PF: predicated region fallthrough
CT: control target
= control target key end

     0   :  { %s3486_s17 = smov 0   ;;  %s3488_s18 = smov 0   ;;  %s4617_s0 = inlined_call_operand.vmem [shape: f32[256,32], index: 0, kind: input, shape index: {}]   ;;  %s4618_s1 = inlined_call_operand.vmem [shape: s32[1,256], index: 1, kind: input, shape index: {}]   ;;  %s4619_s2 = inlined_call_operand.vmem [shape: f32[32,32], index: 2, kind: input, shape index: {}]   ;;  %s4620_s3 = inlined_call_operand.vmem [shape: f32[1,32], index: 3, kind: input, shape index: {}]   ;;  %s4621_s4 = inlined_call_operand.vmem [shape: f32[64,8], index: 4, kind: input, shape index: {}]   ;;  %s4622_s5 = inlined_call_operand.vmem [shape: f32[8,64], index: 5, kind: input, shape index: {}]   ;;  %s4623_s6 = inlined_call_operand.vmem [shape: bf16[32,192], index: 6, kind: input, shape index: {}]   ;;  %s4624_s7 = inlined_call_operand.vmem [shape: bf16[64,512], index: 7, kind: input, shape index: {}]   ;;  %s4625_s8 = inlined_call_operand.vmem [shape: bf16[64,512], index: 8, kind: input, shape index: {}]   ;;  %s4626_s9 = inlined_call_operand.vmem [shape: bf16[256,64], index: 9, kind: output, shape index: {0}]   ;;  %s4627_s10 = inlined_call_operand.vmem [shape: f32[2,2,512], index: 10, kind: output, shape index: {1}]   ;;  %s4628_s11 = inlined_call_operand.vmem [shape: f32[2,2,64], index: 11, kind: output, shape index: {2}]  }
   0x1   :  { %s3490_s19 = smov 0  }
   0x2 LB: > { %s34_s20 = sadd.s32 1, %s3411_s18  ;;  %p2862_p0 = scmp.ge.s32.totalorder %s3415_s19, 1  ;;  %s3415_s19 = sphi %s3490_s19, %s22_s19   ;;  %s3411_s18 = sphi %s3488_s18, %s4728_s18   ;;  %s3407_s17 = sphi %s3486_s17, %s4727_s17  }
   0x3   : > { %p36_p1 = scmp.ge.s32.totalorder %s34_s20, 2  ;;  %p373_p2 = scmp.lt.s32.totalorder %s3415_s19, 3 }
   0x5   : > { %s4730_s20 = smov (%p36_p1, %s34_s20), 0  ;;  %p374_p3 = pnand %p2862_p0, %p373_p2 }
   0x7   : > { %377 = sbr.rel (%p374_p3) target bundleno = 1909 (0x775), region = 56 }
   0xc   : > { %v485_v0 = vld [vmem:[%s4619_s2 + $0x18] sm:$0xff]  ;;  %v484_v1 = vld [vmem:[%s4619_s2 + $0x10] sm:$0xff]  ;;  %s2863_s25 = sshll.u32 %s3407_s17, 4  ;;  %v483_v2 = vld [vmem:[%s4619_s2 + $0x8] sm:$0xff]  ;;  %vm493_vm0 = vcmask 261120   ;;  %s3417_s23 = smov 32  }
   0xd   : > { %3108 = vmatprep.subr.mxu0 %v485_v0  ;;  %p430_p4 = scmp.lt.s32.totalorder %s2863_s25, 31  ;;  %v482_v3 = vld [vmem:[%s4619_s2] sm:$0xff]  ;;  %v790_v20 = vld [vmem:[%s4621_s4 + $0x38] sm:$0xff]  ;;  %v789_v21 = vld [vmem:[%s4621_s4 + $0x30] sm:$0xff]  ;;  %vm791_vm1 = vcmask 523264   ;;  %s3418_s24 = smov 4  }
   0xe   : > { %3109 = vmatpush3.msra.mxu0 %v485_v0  ;;  %3226 = vmatprep.subr.mxu1 %v790_v20  ;;  %v788_v22 = vld [vmem:[%s4621_s4 + $0x28] sm:$0xff]  ;;  %v787_v23 = vld [vmem:[%s4621_s4 + $0x20] sm:$0xff]  ;;  %v786_v24 = vld [vmem:[%s4621_s4 + $0x18] sm:$0xff]  ;;  %vm1129_vm2 = vcmask 31744   ;;  %vm1147_vm3 = vcmask 64512   ;;  %s3420_s21 = smov 96  }
   0xf   : > { %3110 = vmatprep.subr.mxu0 %v484_v1  ;;  %s4732_s25 = smov (!%p430_p4, %s2863_s25), 31  ;;  %3234 = vmatpush3.msra.mxu1 %v790_v20  ;;  %v785_v25 = vld [vmem:[%s4621_s4 + $0x10] sm:$0xff]  ;;  %v784_v26 = vld [vmem:[%s4621_s4 + $0x8] sm:$0xff]  ;;  %v783_v27 = vld [vmem:[%s4621_s4] sm:$0xff]  ;;  %vm1718_vm4 = vcmask 519168   ;;  %p437_p5 = scmp.lt.s32.totalorder %s3407_s17, 1 }
  0x10   : > { %3111 = vmatpush3.msra.mxu0 %v484_v1  ;;  %s2864_s30 = sshll.u32 %s4732_s25, 3  ;;  %3227 = vmatprep.subr.mxu1 %v789_v21  ;;  %v2870_v29 = vld [vmem:[%s4620_s3] ss:$0 sm:$0xff]  ;;  %s2866_s27 = sshll.u32 %s4732_s25, 2  ;;  %vm3423_vm7 = vmmov 0   ;;  %vm464_vm8 = vcmask 517120  }
  0x11   : > { %3112 = vmatprep.subr.mxu0 %v483_v2  ;;  %s3525_s14 = scalar_lea.vmem %s4617_s0, %s2864_s30  ;;  %3235 = vmatpush3.msra.mxu1 %v789_v21  ;;  %s3987_s30 = scalar_lea.vmem %s4626_s9, %s2866_s27 }
  0x12   : > { %3113 = vmatpush3.msra.mxu0 %v483_v2  ;;  %v466_v4 = vld [vmem:[%s3525_s14] sm:$0xff]  ;;  %v467_v5 = vld [vmem:[%s3525_s14 + $0x8] sm:$0xff]  ;;  %v468_v6 = vld [vmem:[%s3525_s14 + $0x10] sm:$0xff]  ;;  %3228 = vmatprep.subr.mxu1 %v788_v22  ;;  %s3421_s25 = smov 64   ;;  %s4734_s17 = smov (!%p437_p5, %s3407_s17), 1 }
  0x13   : > { %3114 = vmatprep.subr.mxu0 %v482_v3  ;;  %3116 = vmatprep.mubr.msk.f32.mxu0 %vm493_vm0, %v466_v4  ;;  %v469_v7 = vld [vmem:[%s3525_s14 + $0x18] sm:$0xff]  ;;  %v470_v8 = vld [vmem:[%s3525_s14 + $0x20] sm:$0xff]  ;;  %v471_v9 = vld [vmem:[%s3525_s14 + $0x28] sm:$0xff]  ;;  %s439_s16 = scalar_lea.vmem %s4618_s1, %s4734_s17  ;;  %s3021_s26 = sshll.u32 %s4734_s17, 3 }
  0x14   : > { %3115 = vmatpush3.msra.mxu0 %v482_v3  ;;  %v472_v10 = vld [vmem:[%s3525_s14 + $0x30] sm:$0xff]  ;;  %v473_v11 = vld [vmem:[%s3525_s14 + $0x38] sm:$0xff]  ;;  %v474_v12 = vld [vmem:[%s3525_s14 + $0x40] sm:$0xff]  ;;  %3236 = vmatpush3.msra.mxu1 %v788_v22  ;;  %s453_s29 = scalar_lea.vmem %s4627_s10, %s3021_s26 }
  0x15   : > { %3117 = vmatmul.mubr.msk.f32.vlgmr.msra.gmra.mxu0 %vm493_vm0, %v467_v5  ;;  %v475_v13 = vld [vmem:[%s3525_s14 + $0x48] sm:$0xff]  ;;  %v476_v14 = vld [vmem:[%s3525_s14 + $0x50] sm:$0xff]  ;;  %v477_v15 = vld [vmem:[%s3525_s14 + $0x58] sm:$0xff]  ;;  %3140 = vmatprep.subr.mxu0 %v790_v20 }
  0x16   : > { %3119 = vmatprep.mubr.msk.f32.mxu0 %vm493_vm0, %v468_v6  ;;  %v478_v16 = vld [vmem:[%s3525_s14 + $0x60] sm:$0xff]  ;;  %v479_v17 = vld [vmem:[%s3525_s14 + $0x68] sm:$0xff]  ;;  %v480_v18 = vld [vmem:[%s3525_s14 + $0x70] sm:$0xff]  ;;  %3141 = vmatpush3.msra.mxu0 %v790_v20 }
  0x17   : > { %v481_v19 = vld [vmem:[%s3525_s14 + $0x78] sm:$0xff]  ;;  %3142 = vmatprep.subr.mxu0 %v789_v21  ;;  %3229 = vmatprep.subr.mxu1 %v787_v23 }
  0x18   : > { %3143 = vmatpush3.msra.mxu0 %v789_v21  ;;  %3237 = vmatpush3.msra.mxu1 %v787_v23 }
  0x19   : > { %3120 = vmatmul.mubr.msk.f32.gmra.mxu0 %vm493_vm0, %v469_v7  ;;  %3144 = vmatprep.subr.mxu0 %v788_v22 }
  0x1a   : > { %3122 = vmatprep.mubr.msk.f32.mxu0 %vm493_vm0, %v470_v8  ;;  %3145 = vmatpush3.msra.mxu0 %v788_v22 }
  0x1b   : > { %3146 = vmatprep.subr.mxu0 %v787_v23  ;;  %3230 = vmatprep.subr.mxu1 %v786_v24 }
  0x1c   : > { %3147 = vmatpush3.msra.mxu0 %v787_v23  ;;  %3238 = vmatpush3.msra.mxu1 %v786_v24 }
  0x1d   : > { %3123 = vmatmul.mubr.msk.f32.gmra.mxu0 %vm493_vm0, %v471_v9  ;;  %3148 = vmatprep.subr.mxu0 %v786_v24 }
  0x1e   : > { %3125 = vmatprep.mubr.msk.f32.mxu0 %vm493_vm0, %v472_v10  ;;  %3149 = vmatpush3.msra.mxu0 %v786_v24 }
  0x1f   : > { %3150 = vmatprep.subr.mxu0 %v785_v25  ;;  %3231 = vmatprep.subr.mxu1 %v785_v25 }
  0x20   : > { %3151 = vmatpush3.msra.mxu0 %v785_v25  ;;  %3239 = vmatpush3.msra.mxu1 %v785_v25 }
  0x21   : > { %3126 = vmatmul.mubr.msk.f32.gmra.mxu0 %vm493_vm0, %v473_v11  ;;  %3152 = vmatprep.subr.mxu0 %v784_v26 }
  0x22   : > { %3128 = vmatprep.mubr.msk.f32.mxu0 %vm493_vm0, %v474_v12  ;;  %3232 = vmatprep.subr.mxu1 %v784_v26 }
  0x23   : > { %3153 = vmatpush3.msra.mxu0 %v784_v26  ;;  %3240 = vmatpush3.msra.mxu1 %v784_v26 }
  0x24   : > { %3154 = vmatprep.subr.mxu0 %v783_v27  ;;  %3233 = vmatprep.subr.mxu1 %v783_v27 }
  0x25   : > { %3129 = vmatmul.mubr.msk.f32.gmra.mxu0 %vm493_vm0, %v475_v13  ;;  %3241 = vmatpush3.msra.mxu1 %v783_v27 }
  0x26   : > { %3131 = vmatprep.mubr.msk.f32.mxu0 %vm493_vm0, %v476_v14  ;;  %3155 = vmatpush3.msra.mxu0 %v783_v27 }
  0x29   : > { %3132 = vmatmul.mubr.msk.f32.gmra.mxu0 %vm493_vm0, %v477_v15 }
  0x2a   : > { %3134 = vmatprep.mubr.msk.f32.mxu0 %vm493_vm0, %v478_v16 }
  0x2d   : > { %3135 = vmatmul.mubr.msk.f32.gmra.mxu0 %vm493_vm0, %v479_v17 }
  0x2e   : > { %3137 = vmatprep.mubr.msk.f32.mxu0 %vm493_vm0, %v480_v18 }
  0x31   : > { %3138 = vmatmul.mubr.msk.f32.gmra.mxu0 %vm493_vm0, %v481_v19 }
  0xd5   : > { %v3118_v28 = vpop.f32.mrf.mxu0 }
  0xd6   : > { %v3588_v33 = vadd.f32 %v3118_v28, %v2870_v29 }
  0xd7   : > { %v608_v30 = vpop.f32.mrf.mxu0 }
  0xd8   : > { %v3586_v31 = vadd.f32 %v2870_v29, %v608_v30  ;;  %v688_v40 = vmul.f32 %v3588_v33, %v3588_v33 }
  0xd9   : > { %v3121_v32 = vpop.f32.mrf.mxu0 }
  0xda   : > { %v687_v34 = vmul.f32 %v3586_v31, %v3586_v31  ;;  %v3595_v38 = vadd.f32 %v3121_v32, %v2870_v29 }
  0xdb   : > { %v618_v35 = vpop.f32.mrf.mxu0 }
  0xdc   : > { %v3592_v36 = vadd.f32 %v2870_v29, %v618_v35  ;;  %719 = vrot.lane.b32.xlu0 %v687_v34, %s3417_s23  ;;  %v690_v45 = vmul.f32 %v3595_v38, %v3595_v38 }
  0xdd   : > { %v3124_v37 = vpop.f32.mrf.mxu0 }
  0xde   : > { %v689_v39 = vmul.f32 %v3592_v36, %v3592_v36  ;;  %v3601_v42 = vadd.f32 %v3124_v37, %v2870_v29 }
  0xdf   : > { %v628_v41 = vpop.f32.mrf.mxu0 }
  0xe0   : > { %v3603_v43 = vadd.f32 %v2870_v29, %v628_v41  ;;  %723 = vrot.lane.b32.xlu1 %v689_v39, %s3417_s23  ;;  %721 = vrot.lane.b32.xlu0 %v688_v40, %s3417_s23  ;;  %v692_v50 = vmul.f32 %v3601_v42, %v3601_v42 }
  0xe1   : > { %v3127_v44 = vpop.f32.mrf.mxu0 }
  0xe2   : > { %v691_v46 = vmul.f32 %v3603_v43, %v3603_v43  ;;  %v3611_v48 = vadd.f32 %v3127_v44, %v2870_v29 }
  0xe3   : > { %v638_v47 = vpop.f32.mrf.mxu0 }
  0xe4   : > { %v3613_v49 = vadd.f32 %v2870_v29, %v638_v47  ;;  %725 = vrot.lane.b32.xlu1 %v690_v45, %s3417_s23  ;;  %727 = vrot.lane.b32.xlu0 %v691_v46, %s3417_s23  ;;  %v694_v56 = vmul.f32 %v3611_v48, %v3611_v48 }
  0xe5   : > { %v3130_v51 = vpop.f32.mrf.mxu0 }
  0xe6   : > { %v693_v52 = vmul.f32 %v3613_v49, %v3613_v49  ;;  %v3621_v54 = vadd.f32 %v3130_v51, %v2870_v29 }
  0xe7   : > { %v648_v53 = vpop.f32.mrf.mxu0 }
  0xe8   : > { %v3623_v55 = vadd.f32 %v2870_v29, %v648_v53  ;;  %729 = vrot.lane.b32.xlu1 %v692_v50, %s3417_s23  ;;  %731 = vrot.lane.b32.xlu0 %v693_v52, %s3417_s23  ;;  %v696_v62 = vmul.f32 %v3621_v54, %v3621_v54 }
  0xe9   : > { %v3133_v57 = vpop.f32.mrf.mxu0 }
  0xea   : > { %v695_v58 = vmul.f32 %v3623_v55, %v3623_v55  ;;  %v3631_v60 = vadd.f32 %v3133_v57, %v2870_v29 }
  0xeb   : > { %v658_v59 = vpop.f32.mrf.mxu0 }
  0xec   : > { %v3633_v61 = vadd.f32 %v2870_v29, %v658_v59  ;;  %733 = vrot.lane.b32.xlu1 %v694_v56, %s3417_s23  ;;  %735 = vrot.lane.b32.xlu0 %v695_v58, %s3417_s23  ;;  %v698_v4 = vmul.f32 %v3631_v60, %v3631_v60 }
  0xed   : > { %v3136_v63 = vpop.f32.mrf.mxu0 }
  0xee   : > { %v697_v0 = vmul.f32 %v3633_v61, %v3633_v61  ;;  %v3641_v2 = vadd.f32 %v3136_v63, %v2870_v29 }
  0xef   : > { %v668_v1 = vpop.f32.mrf.mxu0 }
  0xf0   : > { %v3643_v3 = vadd.f32 %v2870_v29, %v668_v1  ;;  %737 = vrot.lane.b32.xlu1 %v696_v62, %s3417_s23  ;;  %739 = vrot.lane.b32.xlu0 %v697_v0, %s3417_s23  ;;  %v700_v10 = vmul.f32 %v3641_v2, %v3641_v2 }
  0xf1   : > { %v3139_v5 = vpop.f32.mrf.mxu0 }
  0xf2   : > { %v699_v6 = vmul.f32 %v3643_v3, %v3643_v3  ;;  %v3651_v8 = vadd.f32 %v3139_v5, %v2870_v29 }
  0xf3   : > { %v678_v7 = vpop.f32.mrf.mxu0 }
  0xf4   : > { %v3653_v9 = vadd.f32 %v2870_v29, %v678_v7  ;;  %741 = vrot.lane.b32.xlu1 %v698_v4, %s3417_s23  ;;  %743 = vrot.lane.b32.xlu0 %v699_v6, %s3417_s23  ;;  %v702_v12 = vmul.f32 %v3651_v8, %v3651_v8 }
  0xf6   : > { %v701_v11 = vmul.f32 %v3653_v9, %v3653_v9 }
  0xf8   : > { %745 = vrot.lane.b32.xlu1 %v700_v10, %s3417_s23  ;;  %747 = vrot.lane.b32.xlu0 %v701_v11, %s3417_s23 }
  0xfc   : > { %749 = vrot.lane.b32.xlu1 %v702_v12, %s3417_s23 }
 0x14e   : > { %v720_v13 = vpop.permute.xlu0 %719 }
 0x14f   : > { %v767_v14 = vsel %vm493_vm0, %v3586_v31, %v720_v13 }
 0x150   : > { %3156 = vmatprep.mubr.msk.f32.mxu0 %vm791_vm1, %v767_v14  ;;  %v1146_v14 = vld [vmem:[%s4622_s5] sm:$0xff] }
 0x151   : > { %3180 = vmatprep.subr.mxu0 %v1146_v14 }
 0x152   : > { %v724_v15 = vpop.permute.xlu1 %723  ;;  %v722_v16 = vpop.permute.xlu0 %721 }
 0x153   : > { %v768_v17 = vsel %vm493_vm0, %v3588_v33, %v722_v16  ;;  %v769_v18 = vsel %vm493_vm0, %v3592_v36, %v724_v15 }
 0x154   : > { %3157 = vmatmul.mubr.msk.f32.vlgmr.msra.gmra.mxu0 %vm791_vm1, %v768_v17  ;;  %3159 = vmatprep.mubr.msk.f32.mxu1 %vm791_vm1, %v769_v18 }
 0x155   : > { %3181 = vmatpush3.msra.mxu0 %v1146_v14 }
 0x156   : > { %v726_v19 = vpop.permute.xlu1 %725  ;;  %v728_v20 = vpop.permute.xlu0 %727 }
 0x157   : > { %v770_v21 = vsel %vm493_vm0, %v3595_v38, %v726_v19  ;;  %v771_v22 = vsel %vm493_vm0, %v3603_v43, %v728_v20 }
 0x158   : > { %3160 = vmatmul.mubr.msk.f32.vlgmr.msra.gmra.mxu1 %vm791_vm1, %v770_v21 }
 0x159   : > { %3162 = vmatprep.mubr.msk.f32.mxu1 %vm791_vm1, %v771_v22 }
 0x15a   : > { %v730_v23 = vpop.permute.xlu1 %729  ;;  %v732_v24 = vpop.permute.xlu0 %731 }
 0x15b   : > { %v772_v25 = vsel %vm493_vm0, %v3601_v42, %v730_v23  ;;  %v773_v26 = vsel %vm493_vm0, %v3613_v49, %v732_v24 }
 0x15c   : > { %3163 = vmatmul.mubr.msk.f32.gmra.mxu1 %vm791_vm1, %v772_v25 }
 0x15d   : > { %3165 = vmatprep.mubr.msk.f32.mxu1 %vm791_vm1, %v773_v26 }
 0x15e   : > { %v734_v27 = vpop.permute.xlu1 %733  ;;  %v736_v28 = vpop.permute.xlu0 %735 }
 0x15f   : > { %v774_v29 = vsel %vm493_vm0, %v3611_v48, %v734_v27  ;;  %v775_v30 = vsel %vm493_vm0, %v3623_v55, %v736_v28 }
 0x160   : > { %3166 = vmatmul.mubr.msk.f32.gmra.mxu1 %vm791_vm1, %v774_v29 }
 0x161   : > { %3168 = vmatprep.mubr.msk.f32.mxu1 %vm791_vm1, %v775_v30 }
 0x162   : > { %v738_v32 = vpop.permute.xlu1 %737  ;;  %v740_v34 = vpop.permute.xlu0 %739 }
 0x163   : > { %v776_v35 = vsel %vm493_vm0, %v3621_v54, %v738_v32  ;;  %v777_v37 = vsel %vm493_vm0, %v3633_v61, %v740_v34 }
 0x164   : > { %3169 = vmatmul.mubr.msk.f32.gmra.mxu1 %vm791_vm1, %v776_v35 }
 0x165   : > { %3171 = vmatprep.mubr.msk.f32.mxu1 %vm791_vm1, %v777_v37 }
 0x166   : > { %v742_v39 = vpop.permute.xlu1 %741  ;;  %v744_v40 = vpop.permute.xlu0 %743 }
 0x167   : > { %v778_v41 = vsel %vm493_vm0, %v3631_v60, %v742_v39  ;;  %v779_v44 = vsel %vm493_vm0, %v3643_v3, %v744_v40 }
 0x168   : > { %3172 = vmatmul.mubr.msk.f32.gmra.mxu1 %vm791_vm1, %v778_v41 }
 0x169   : > { %3174 = vmatprep.mubr.msk.f32.mxu1 %vm791_vm1, %v779_v44 }
 0x16a   : > { %v746_v45 = vpop.permute.xlu1 %745  ;;  %v748_v46 = vpop.permute.xlu0 %747 }
 0x16b   : > { %v780_v47 = vsel %vm493_vm0, %v3641_v2, %v746_v45  ;;  %v781_v50 = vsel %vm493_vm0, %v3653_v9, %v748_v46 }
 0x16c   : > { %3175 = vmatmul.mubr.msk.f32.gmra.mxu1 %vm791_vm1, %v780_v47 }
 0x16d   : > { %3177 = vmatprep.mubr.msk.f32.mxu1 %vm791_vm1, %v781_v50 }
 0x16e   : > { %v750_v51 = vpop.permute.xlu1 %749 }
 0x16f   : > { %v782_v52 = vsel %vm493_vm0, %v3651_v8, %v750_v51 }
 0x170   : > { %3178 = vmatmul.mubr.msk.f32.gmra.mxu1 %vm791_vm1, %v782_v52 }
 0x214   : > { %v3158_v53 = vpop.f32.mrf.mxu0 }
 0x215   : > { %v3714_v56 = vmul.f32 0.125, %v3158_v53 }
 0x216   : > { %v906_v57 = vpop.f32.mrf.mxu0 }
 0x217   : > { %v3716_v58 = vmul.f32 0.125, %v906_v57  ;;  %v1002_v59 = vmul.f32 %v3714_v56, %v3714_v56 }
 0x218   : > { %v3161_v62 = vpop.f32.mrf.mxu1 }
 0x219   : > { %v3720_v63 = vmul.f32 0.125, %v3161_v62  ;;  %1035 = vrot.lane.b32.xlu1 %v1002_v59, %s3418_s24  ;;  %v1001_v0 = vmul.f32 %v3716_v58, %v3716_v58 }
 0x21a   : > { %v916_v1 = vpop.f32.mrf.mxu1 }
 0x21b   : > { %v3725_v4 = vmul.f32 0.125, %v916_v1  ;;  %1033 = vrot.lane.b32.xlu0 %v1001_v0, %s3418_s24  ;;  %v1004_v5 = vmul.f32 %v3720_v63, %v3720_v63 }
 0x21c   : > { %v3164_v6 = vpop.f32.mrf.mxu1 }
 0x21d   : > { %v3730_v7 = vmul.f32 0.125, %v3164_v6  ;;  %1039 = vrot.lane.b32.xlu1 %v1004_v5, %s3418_s24  ;;  %v1003_v10 = vmul.f32 %v3725_v4, %v3725_v4 }
 0x21e   : > { %v926_v11 = vpop.f32.mrf.mxu1 }
 0x21f   : > { %v3735_v12 = vmul.f32 0.125, %v926_v11  ;;  %1037 = vrot.lane.b32.xlu0 %v1003_v10, %s3418_s24  ;;  %v1006_v13 = vmul.f32 %v3730_v7, %v3730_v7 }
 0x220   : > { %v3167_v15 = vpop.f32.mrf.mxu1 }
 0x221   : > { %v3743_v16 = vmul.f32 0.125, %v3167_v15  ;;  %1043 = vrot.lane.b32.xlu1 %v1006_v13, %s3418_s24  ;;  %v1005_v17 = vmul.f32 %v3735_v12, %v3735_v12 }
 0x222   : > { %v936_v18 = vpop.f32.mrf.mxu1 }
 0x223   : > { %v3748_v19 = vmul.f32 0.125, %v936_v18  ;;  %1041 = vrot.lane.b32.xlu0 %v1005_v17, %s3418_s24  ;;  %v1008_v20 = vmul.f32 %v3743_v16, %v3743_v16 }
 0x224   : > { %v3170_v21 = vpop.f32.mrf.mxu1 }
 0x225   : > { %v3753_v22 = vmul.f32 0.125, %v3170_v21  ;;  %1047 = vrot.lane.b32.xlu1 %v1008_v20, %s3418_s24  ;;  %v1007_v23 = vmul.f32 %v3748_v19, %v3748_v19 }
 0x226   : > { %v946_v24 = vpop.f32.mrf.mxu1 }
 0x227   : > { %v3758_v25 = vmul.f32 0.125, %v946_v24  ;;  %1045 = vrot.lane.b32.xlu0 %v1007_v23, %s3418_s24  ;;  %v1010_v26 = vmul.f32 %v3753_v22, %v3753_v22 }
 0x228   : > { %v3173_v27 = vpop.f32.mrf.mxu1 }
 0x229   : > { %v3763_v28 = vmul.f32 0.125, %v3173_v27  ;;  %1051 = vrot.lane.b32.xlu1 %v1010_v26, %s3418_s24  ;;  %v1009_v29 = vmul.f32 %v3758_v25, %v3758_v25 }
 0x22a   : > { %v956_v30 = vpop.f32.mrf.mxu1 }
 0x22b   : > { %v3768_v32 = vmul.f32 0.125, %v956_v30  ;;  %1049 = vrot.lane.b32.xlu0 %v1009_v29, %s3418_s24  ;;  %v1012_v34 = vmul.f32 %v3763_v28, %v3763_v28 }
 0x22c   : > { %v3176_v35 = vpop.f32.mrf.mxu1 }
 0x22d   : > { %v3773_v37 = vmul.f32 0.125, %v3176_v35  ;;  %1055 = vrot.lane.b32.xlu1 %v1012_v34, %s3418_s24  ;;  %v1011_v39 = vmul.f32 %v3768_v32, %v3768_v32 }
 0x22e   : > { %v966_v40 = vpop.f32.mrf.mxu1 }
 0x22f   : > { %v3778_v41 = vmul.f32 0.125, %v966_v40  ;;  %1053 = vrot.lane.b32.xlu0 %v1011_v39, %s3418_s24  ;;  %v1014_v44 = vmul.f32 %v3773_v37, %v3773_v37 }
 0x230   : > { %v3179_v45 = vpop.f32.mrf.mxu1 }
 0x231   : > { %v3783_v46 = vmul.f32 0.125, %v3179_v45  ;;  %1059 = vrot.lane.b32.xlu1 %v1014_v44, %s3418_s24  ;;  %v1013_v47 = vmul.f32 %v3778_v41, %v3778_v41 }
 0x232   : > { %v976_v50 = vpop.f32.mrf.mxu1 }
 0x233   : > { %v3788_v51 = vmul.f32 0.125, %v976_v50  ;;  %1057 = vrot.lane.b32.xlu0 %v1013_v47, %s3418_s24  ;;  %v1016_v52 = vmul.f32 %v3783_v46, %v3783_v46 }
 0x235   : > { %1063 = vrot.lane.b32.xlu1 %v1016_v52, %s3418_s24  ;;  %v1015_v53 = vmul.f32 %v3788_v51, %v3788_v51 }
 0x237   : > { %1061 = vrot.lane.b32.xlu0 %v1015_v53, %s3418_s24 }
 0x28b   : > { %v1036_v57 = vpop.permute.xlu1 %1035 }
 0x28c   : > { %v1082_v59 = vsub.f32 %v3714_v56, %v1036_v57 }
 0x28d   : > { %v1034_v62 = vpop.permute.xlu0 %1033 }
 0x28e   : > { %v1098_v0 = vadd.f32 1e-05, %v1082_v59  ;;  %v1081_v1 = vsub.f32 %v3716_v58, %v1034_v62 }
 0x28f   : > { %v1040_v5 = vpop.permute.xlu1 %1039 }
 0x290   : > { %v1097_v6 = vadd.f32 1e-05, %v1081_v1  ;;  %v1084_v10 = vsub.f32 %v3720_v63, %v1040_v5  ;;  %3329 = vrsqrt.f32 %v1098_v0 }
 0x291   : > { %v1038_v11 = vpop.permute.xlu0 %1037 }
 0x292   : > { %3331 = vrsqrt.f32 %v1097_v6  ;;  %v1100_v13 = vadd.f32 1e-05, %v1084_v10  ;;  %v1083_v14 = vsub.f32 %v3725_v4, %v1038_v11 }
 0x293   : > { %v1044_v15 = vpop.permute.xlu1 %1043 }
 0x294   : > { %v1099_v17 = vadd.f32 1e-05, %v1083_v14  ;;  %v1086_v18 = vsub.f32 %v3730_v7, %v1044_v15  ;;  %3333 = vrsqrt.f32 %v1100_v13 }
 0x295   : > { %v1042_v20 = vpop.permute.xlu0 %1041 }
 0x296   : > { %3335 = vrsqrt.f32 %v1099_v17  ;;  %v1102_v21 = vadd.f32 1e-05, %v1086_v18  ;;  %v1085_v23 = vsub.f32 %v3735_v12, %v1042_v20 }
 0x297   : > { %v1048_v24 = vpop.permute.xlu1 %1047 }
 0x298   : > { %v1101_v26 = vadd.f32 1e-05, %v1085_v23  ;;  %v1088_v27 = vsub.f32 %v3743_v16, %v1048_v24  ;;  %3337 = vrsqrt.f32 %v1102_v21 }
 0x299   : > { %v1046_v29 = vpop.permute.xlu0 %1045 }
 0x29a   : > { %3339 = vrsqrt.f32 %v1101_v26  ;;  %v1104_v30 = vadd.f32 1e-05, %v1088_v27  ;;  %v1087_v34 = vsub.f32 %v3748_v19, %v1046_v29 }
 0x29b   : > { %v1052_v35 = vpop.permute.xlu1 %1051 }
 0x29c   : > { %v1103_v39 = vadd.f32 1e-05, %v1087_v34  ;;  %v1090_v40 = vsub.f32 %v3753_v22, %v1052_v35  ;;  %3341 = vrsqrt.f32 %v1104_v30 }
 0x29d   : > { %v1050_v44 = vpop.permute.xlu0 %1049  ;;  %v3330_v45 = vpop.eup %3329 }
 0x29e   : > { %3343 = vrsqrt.f32 %v1103_v39  ;;  %v1106_v47 = vadd.f32 1e-05, %v1090_v40  ;;  %v1089_v50 = vsub.f32 %v3758_v25, %v1050_v44  ;;  %v1131_v1 = vsel %vm1129_vm2, %v3714_v56, %v3330_v45 }
 0x29f   : > { %v3332_v52 = vpop.eup %3331  ;;  %v1056_v53 = vpop.permute.xlu1 %1055 }
 0x2a0   : > { %v1105_v57 = vadd.f32 1e-05, %v1089_v50  ;;  %v1092_v59 = vsub.f32 %v3763_v28, %v1056_v53  ;;  %v1130_v62 = vsel %vm1129_vm2, %v3716_v58, %v3332_v52  ;;  %3345 = vrsqrt.f32 %v1106_v47 }
 0x2a1   : > { %3182 = vmatprep.mubr.msk.f32.mxu0 %vm1147_vm3, %v1130_v62  ;;  %v1054_v0 = vpop.permute.xlu0 %1053  ;;  %v3334_v5 = vpop.eup %3333 }
 0x2a2   : > { %3347 = vrsqrt.f32 %v1105_v57  ;;  %v1108_v6 = vadd.f32 1e-05, %v1092_v59  ;;  %v1091_v10 = vsub.f32 %v3768_v32, %v1054_v0  ;;  %3183 = vmatmul.mubr.msk.f32.vlgmr.msra.gmra.mxu0 %vm1147_vm3, %v1131_v1  ;;  %v1133_v56 = vsel %vm1129_vm2, %v3720_v63, %v3334_v5 }
 0x2a3   : > { %v3336_v11 = vpop.eup %3335  ;;  %v1060_v13 = vpop.permute.xlu1 %1059  ;;  %v4629_v1 = vmov 0  }
 0x2a4   : > { %v1107_v14 = vadd.f32 1e-05, %v1091_v10  ;;  %v1094_v15 = vsub.f32 %v3773_v37, %v1060_v13  ;;  %v1132_v58 = vsel %vm1129_vm2, %v3725_v4, %v3336_v11  ;;  %3349 = vrsqrt.f32 %v1108_v6  ;;  %1525 = vmatprep.mubr.bf16.mxu1 %v4629_v1 }
 0x2a5   : > { %3185 = vmatprep.mubr.msk.f32.mxu0 %vm1147_vm3, %v1132_v58  ;;  %v1058_v17 = vpop.permute.xlu0 %1057  ;;  %v3338_v18 = vpop.eup %3337 }
 0x2a6   : > { %3351 = vrsqrt.f32 %v1107_v14  ;;  %v1110_v20 = vadd.f32 1e-05, %v1094_v15  ;;  %v1093_v21 = vsub.f32 %v3778_v41, %v1058_v17  ;;  %3186 = vmatmul.mubr.msk.f32.gmra.mxu0 %vm1147_vm3, %v1133_v56  ;;  %v1135_v63 = vsel %vm1129_vm2, %v3730_v7, %v3338_v18 }
 0x2a7   : > { %v3340_v23 = vpop.eup %3339  ;;  %v1064_v24 = vpop.permute.xlu1 %1063 }
 0x2a8   : > { %v1109_v26 = vadd.f32 1e-05, %v1093_v21  ;;  %v1096_v27 = vsub.f32 %v3783_v46, %v1064_v24  ;;  %v1134_v4 = vsel %vm1129_vm2, %v3735_v12, %v3340_v23  ;;  %3353 = vrsqrt.f32 %v1110_v20 }
 0x2a9   : > { %3188 = vmatprep.mubr.msk.f32.mxu0 %vm1147_vm3, %v1134_v4  ;;  %v1062_v29 = vpop.permute.xlu0 %1061  ;;  %v3342_v30 = vpop.eup %3341 }
 0x2aa   : > { %3355 = vrsqrt.f32 %v1109_v26  ;;  %v1112_v34 = vadd.f32 1e-05, %v1096_v27  ;;  %v1095_v35 = vsub.f32 %v3788_v51, %v1062_v29  ;;  %3189 = vmatmul.mubr.msk.f32.gmra.mxu0 %vm1147_vm3, %v1135_v63  ;;  %v1137_v12 = vsel %vm1129_vm2, %v3743_v16, %v3342_v30 }
 0x2ab   : > { %v3344_v39 = vpop.eup %3343 }
 0x2ac   : > { %v1111_v40 = vadd.f32 1e-05, %v1095_v35  ;;  %v1136_v44 = vsel %vm1129_vm2, %v3748_v19, %v3344_v39  ;;  %3357 = vrsqrt.f32 %v1112_v34 }
 0x2ad   : > { %3191 = vmatprep.mubr.msk.f32.mxu0 %vm1147_vm3, %v1136_v44  ;;  %v3346_v45 = vpop.eup %3345 }
 0x2ae   : > { %3359 = vrsqrt.f32 %v1111_v40  ;;  %3192 = vmatmul.mubr.msk.f32.gmra.mxu0 %vm1147_vm3, %v1137_v12  ;;  %v1139_v50 = vsel %vm1129_vm2, %v3753_v22, %v3346_v45 }
 0x2af   : > { %v3348_v7 = vpop.eup %3347 }
 0x2b0   : > { %v1138_v47 = vsel %vm1129_vm2, %v3758_v25, %v3348_v7 }
 0x2b1   : > { %3194 = vmatprep.mubr.msk.f32.mxu0 %vm1147_vm3, %v1138_v47  ;;  %v3350_v19 = vpop.eup %3349 }
 0x2b2   : > { %3195 = vmatmul.mubr.msk.f32.gmra.mxu0 %vm1147_vm3, %v1139_v50  ;;  %v1141_v53 = vsel %vm1129_vm2, %v3763_v28, %v3350_v19 }
 0x2b3   : > { %v3352_v52 = vpop.eup %3351 }
 0x2b4   : > { %v1140_v16 = vsel %vm1129_vm2, %v3768_v32, %v3352_v52 }
 0x2b5   : > { %3197 = vmatprep.mubr.msk.f32.mxu0 %vm1147_vm3, %v1140_v16  ;;  %v3354_v57 = vpop.eup %3353 }
 0x2b6   : > { %3198 = vmatmul.mubr.msk.f32.gmra.mxu0 %vm1147_vm3, %v1141_v53  ;;  %v1143_v22 = vsel %vm1129_vm2, %v3773_v37, %v3354_v57  ;;  %v3277_v37 = vld [vmem:[%s4623_s6 + $0x14] ss:$8 sps:$4 sm:$0xff]  }
 0x2b7   : > { %v3356_v25 = vpop.eup %3355  ;;  %1505 = vmatprep.subr.bf16.mxu1 %v3277_v37 }
 0x2b8   : > { %v1142_v59 = vsel %vm1129_vm2, %v3778_v41, %v3356_v25  ;;  %v3275_v41 = vld [vmem:[%s4623_s6 + $0x10] ss:$8 sps:$4 sm:$0xff]  }
 0x2b9   : > { %3200 = vmatprep.mubr.msk.f32.mxu0 %vm1147_vm3, %v1142_v59  ;;  %v3358_v62 = vpop.eup %3357  ;;  %1506 = vmatpush1.bf16.msra.mxu1 %v3275_v41 }
 0x2ba   : > { %3201 = vmatmul.mubr.msk.f32.gmra.mxu0 %vm1147_vm3, %v1143_v22  ;;  %v1145_v28 = vsel %vm1129_vm2, %v3783_v46, %v3358_v62  ;;  %v3278_v46 = vld [vmem:[%s4623_s6] ss:$8 sps:$4 sm:$0xff]  }
 0x2bb   : > { %v3360_v32 = vpop.eup %3359 }
 0x2bc   : > { %v1144_v0 = vsel %vm1129_vm2, %v3788_v51, %v3360_v32  ;;  %v3280_v51 = vld [vmem:[%s4623_s6 + $0x4] ss:$8 sps:$4 sm:$0xff]  }
 0x2bd   : > { %3203 = vmatprep.mubr.msk.f32.mxu0 %vm1147_vm3, %v1144_v0  ;;  %1507 = vmatprep.subr.bf16.mxu1 %v3280_v51 }
 0x2be   : > { %3204 = vmatmul.mubr.msk.f32.gmra.mxu0 %vm1147_vm3, %v1145_v28  ;;  %1508 = vmatpush1.bf16.msra.mxu1 %v3278_v46 }
 0x2bf   : > { %1903 = vmatprep.mubr.bf16.mxu0 %v4629_v1 }
 0x362   : > { %v3184_v5 = vpop.f32.mrf.mxu0 }
 0x363   : > { %1375 = vrot.lane.b32.xlu1 %v3184_v5, %s3420_s21  ;;  %v1342_v4 = vsub.f32 %v3588_v33, %v3184_v5 }
 0x364   : > { %v1262_v6 = vpop.f32.mrf.mxu0 }
 0x365   : > { %1373 = vrot.lane.b32.xlu0 %v1262_v6, %s3420_s21  ;;  %v1341_v29 = vsub.f32 %v3586_v31, %v1262_v6 }
 0x366   : > { %v3187_v10 = vpop.f32.mrf.mxu0 }
 0x367   : > { %1379 = vrot.lane.b32.xlu1 %v3187_v10, %s3420_s21  ;;  %v1344_v39 = vsub.f32 %v3595_v38, %v3187_v10 }
 0x368   : > { %v1272_v11 = vpop.f32.mrf.mxu0 }
 0x369   : > { %1377 = vrot.lane.b32.xlu0 %v1272_v11, %s3420_s21  ;;  %v1343_v40 = vsub.f32 %v3592_v36, %v1272_v11 }
 0x36a   : > { %v3190_v13 = vpop.f32.mrf.mxu0 }
 0x36b   : > { %1383 = vrot.lane.b32.xlu1 %v3190_v13, %s3420_s21  ;;  %v1346_v33 = vsub.f32 %v3601_v42, %v3190_v13 }
 0x36c   : > { %v1282_v14 = vpop.f32.mrf.mxu0 }
 0x36d   : > { %1381 = vrot.lane.b32.xlu0 %v1282_v14, %s3420_s21  ;;  %v1345_v31 = vsub.f32 %v3603_v43, %v1282_v14 }
 0x36e   : > { %v3193_v15 = vpop.f32.mrf.mxu0 }
 0x36f   : > { %1387 = vrot.lane.b32.xlu1 %v3193_v15, %s3420_s21  ;;  %v1348_v36 = vsub.f32 %v3611_v48, %v3193_v15 }
 0x370   : > { %v1292_v58 = vpop.f32.mrf.mxu0 }
 0x371   : > { %1385 = vrot.lane.b32.xlu0 %v1292_v58, %s3420_s21  ;;  %v1347_v53 = vsub.f32 %v3613_v49, %v1292_v58 }
 0x372   : > { %v3196_v17 = vpop.f32.mrf.mxu0 }
 0x373   : > { %1391 = vrot.lane.b32.xlu1 %v3196_v17, %s3420_s21  ;;  %v1350_v42 = vsub.f32 %v3621_v54, %v3196_v17 }
 0x374   : > { %v1302_v56 = vpop.f32.mrf.mxu0 }
 0x375   : > { %1389 = vrot.lane.b32.xlu0 %v1302_v56, %s3420_s21  ;;  %v1349_v43 = vsub.f32 %v3623_v55, %v1302_v56 }
 0x376   : > { %v3199_v18 = vpop.f32.mrf.mxu0 }
 0x377   : > { %1395 = vrot.lane.b32.xlu1 %v3199_v18, %s3420_s21  ;;  %v1352_v49 = vsub.f32 %v3631_v60, %v3199_v18 }
 0x378   : > { %v1312_v20 = vpop.f32.mrf.mxu0 }
 0x379   : > { %1393 = vrot.lane.b32.xlu0 %v1312_v20, %s3420_s21  ;;  %v1351_v37 = vsub.f32 %v3633_v61, %v1312_v20  ;;  %v3281_v20 = vld [vmem:[%s4624_s7 + $0x60] ss:$16 sps:$4 sm:$0xff]  }
 0x37a   : > { %v3202_v21 = vpop.f32.mrf.mxu0 }
 0x37b   : > { %1399 = vrot.lane.b32.xlu1 %v3202_v21, %s3420_s21  ;;  %v1354_v54 = vsub.f32 %v3641_v2, %v3202_v21  ;;  %v3284_v21 = vld [vmem:[%s4624_s7 + $0x68] ss:$16 sps:$4 sm:$0xff]  }
 0x37c   : > { %v1322_v23 = vpop.f32.mrf.mxu0 }
 0x37d   : > { %1397 = vrot.lane.b32.xlu0 %v1322_v23, %s3420_s21  ;;  %v1353_v55 = vsub.f32 %v3643_v3, %v1322_v23  ;;  %v3289_v23 = vld [vmem:[%s4624_s7 + $0x44] ss:$16 sps:$4 sm:$0xff]  }
 0x37e   : > { %v3889_v24 = vpop.f32.mrf.mxu0 }
 0x37f   : > { %1403 = vrot.lane.b32.xlu1 %v3889_v24, %s3420_s21  ;;  %v1356_v58 = vsub.f32 %v3651_v8, %v3889_v24  ;;  %v3286_v8 = vld [vmem:[%s4624_s7 + $0x6c] ss:$16 sps:$4 sm:$0xff]  }
 0x380   : > { %v3893_v26 = vpop.f32.mrf.mxu0  ;;  %v3292_v24 = vld [vmem:[%s4624_s7 + $0x4c] ss:$16 sps:$4 sm:$0xff]   ;;  %1992 = vmatprep.subr.bf16.mxu1 %v3286_v8 }
 0x381   : > { %1401 = vrot.lane.b32.xlu0 %v3893_v26, %s3420_s21  ;;  %v1355_v2 = vsub.f32 %v3653_v9, %v3893_v26  ;;  %v3283_v9 = vld [vmem:[%s4624_s7 + $0x64] ss:$16 sps:$4 sm:$0xff]   ;;  %v3287_v26 = vld [vmem:[%s4624_s7 + $0x40] ss:$16 sps:$4 sm:$0xff]   ;;  %s2869_s21 = sshll.u32 %s4734_s17, 1 }
 0x382   : > { %1879 = vmatprep.subr.bf16.mxu0 %v3283_v9  ;;  %s457_s24 = scalar_lea.vmem %s4628_s11, %s2869_s21 }
 0x383   : > { %1880 = vmatpush1.bf16.msra.mxu0 %v3281_v20 }
 0x384   : > { %1881 = vmatprep.subr.bf16.mxu0 %v3289_v23 }
 0x387   : > { %1882 = vmatpush1.bf16.msra.mxu0 %v3287_v26 }
 0x3d5   : > { %v1376_v27 = vpop.permute.xlu1 %1375 }
 0x3d6   : > { %v1422_v30 = vmul.f32 %v1376_v27, %v1342_v4  ;;  %v3290_v27 = vld [vmem:[%s4624_s7 + $0x48] ss:$16 sps:$4 sm:$0xff]   ;;  %v3295_v4 = vld [vmem:[%s4624_s7 + $0x24] ss:$16 sps:$4 sm:$0xff]  }
 0x3d7   : > { %v1374_v63 = vpop.permute.xlu0 %1373  ;;  %1883 = vmatprep.subr.bf16.mxu0 %v3295_v4 }
 0x3d8   : > { %v1421_v34 = vmul.f32 %v1374_v63, %v1341_v29  ;;  %v3298_v29 = vld [vmem:[%s4624_s7 + $0x2c] ss:$16 sps:$4 sm:$0xff]   ;;  %v3293_v63 = vld [vmem:[%s4624_s7 + $0x20] ss:$16 sps:$4 sm:$0xff]  }
 0x3d9   : > { %v1380_v35 = vpop.permute.xlu1 %1379  ;;  %1884 = vmatpush1.bf16.msra.mxu0 %v3293_v63 }
 0x3da   : > { %v1437_v44 = vpack.c.bf16 %v1422_v30, %v1421_v34  ;;  %v1424_v45 = vmul.f32 %v1380_v35, %v1344_v39  ;;  %v3296_v30 = vld [vmem:[%s4624_s7 + $0x28] ss:$16 sps:$4 sm:$0xff]   ;;  %v3301_v34 = vld [vmem:[%s4624_s7 + $0x4] ss:$16 sps:$4 sm:$0xff]   ;;  %v3304_v35 = vld [vmem:[%s4624_s7 + $0xc] ss:$16 sps:$4 sm:$0xff]  }
 0x3db   : > { %v1378_v12 = vpop.permute.xlu0 %1377  ;;  %v3299_v39 = vld [vmem:[%s4624_s7] ss:$16 sps:$4 sm:$0xff]   ;;  %1885 = vmatprep.subr.bf16.mxu0 %v3301_v34 }
 0x3dc   : > { %v1423_v7 = vmul.f32 %v1378_v12, %v1343_v40  ;;  %2923 = vmatmul.mubr.msk.bf16.vlgmr.msra.gmra.mxu1 %vm493_vm0, %v1437_v44  ;;  %v3302_v40 = vld [vmem:[%s4624_s7 + $0x8] ss:$16 sps:$4 sm:$0xff]  }
 0x3dd   : > { %v1384_v47 = vpop.permute.xlu1 %1383  ;;  %1535 = vmatprep.mubr.bf16.mxu1 %v4629_v1  ;;  %1993 = vmatpush1.bf16.msra.mxu1 %v3284_v21 }
 0x3de   : > { %v1438_v50 = vpack.c.bf16 %v1424_v45, %v1423_v7  ;;  %v1426_v52 = vmul.f32 %v1384_v47, %v1346_v33  ;;  %1994 = vmatprep.subr.bf16.mxu1 %v3292_v24  ;;  %1886 = vmatpush1.bf16.msra.mxu0 %v3299_v39 }
 0x3df   : > { %v1382_v19 = vpop.permute.xlu0 %1381 }
 0x3e0   : > { %v1425_v16 = vmul.f32 %v1382_v19, %v1345_v31 }
 0x3e1   : > { %v1388_v38 = vpop.permute.xlu1 %1387  ;;  %1995 = vmatpush1.bf16.msra.mxu1 %v3290_v27  ;;  %v3307_v27 = vld [vmem:[%s4625_s8 + $0x64] ss:$16 sps:$4 sm:$0xff]  }
 0x3e2   : > { %v1439_v57 = vpack.c.bf16 %v1426_v52, %v1425_v16  ;;  %v1428_v59 = vmul.f32 %v1388_v38, %v1348_v36  ;;  %1996 = vmatprep.subr.bf16.mxu1 %v3298_v29  ;;  %2233 = vmatprep.subr.bf16.mxu0 %v3307_v27  ;;  %v3311_v27 = vld [vmem:[%s4625_s8 + $0x68] ss:$16 sps:$4 sm:$0xff]  }
 0x3e3   : > { %v1386_v25 = vpop.permute.xlu0 %1385 }
 0x3e4   : > { %v1427_v22 = vmul.f32 %v1386_v25, %v1347_v53  ;;  %2924 = vmatmul.mubr.msk.bf16.gmra.mxu1 %vm493_vm0, %v1438_v50 }
 0x3e5   : > { %v1392_v62 = vpop.permute.xlu1 %1391  ;;  %1545 = vmatprep.mubr.bf16.mxu1 %v4629_v1  ;;  %1997 = vmatpush1.bf16.msra.mxu1 %v3296_v30 }
 0x3e6   : > { %v1440_v32 = vpack.c.bf16 %v1428_v59, %v1427_v22  ;;  %v1430_v28 = vmul.f32 %v1392_v62, %v1350_v42  ;;  %1998 = vmatprep.subr.bf16.mxu1 %v3304_v35 }
 0x3e7   : > { %v1390_v0 = vpop.permute.xlu0 %1389 }
 0x3e8   : > { %v1429_v41 = vmul.f32 %v1390_v0, %v1349_v43 }
 0x3e9   : > { %v1396_v48 = vpop.permute.xlu1 %1395  ;;  %1999 = vmatpush1.bf16.msra.mxu1 %v3302_v40 }
 0x3ea   : > { %v1441_v51 = vpack.c.bf16 %v1430_v28, %v1429_v41  ;;  %v1432_v5 = vmul.f32 %v1396_v48, %v1352_v49 }
 0x3eb   : > { %v1394_v46 = vpop.permute.xlu0 %1393 }
 0x3ec   : > { %v1431_v6 = vmul.f32 %v1394_v46, %v1351_v37  ;;  %2925 = vmatmul.mubr.msk.bf16.gmra.mxu1 %vm493_vm0, %v1439_v57 }
 0x3ed   : > { %v1400_v10 = vpop.permute.xlu1 %1399  ;;  %1555 = vmatprep.mubr.bf16.mxu1 %v4629_v1 }
 0x3ee   : > { %v1442_v11 = vpack.c.bf16 %v1432_v5, %v1431_v6  ;;  %v1434_v14 = vmul.f32 %v1400_v10, %v1354_v54 }
 0x3ef   : > { %v1398_v13 = vpop.permute.xlu0 %1397 }
 0x3f0   : > { %v1433_v15 = vmul.f32 %v1398_v13, %v1353_v55 }
 0x3f1   : > { %v1404_v3 = vpop.permute.xlu1 %1403 }
 0x3f2   : > { %v1443_v60 = vpack.c.bf16 %v1434_v14, %v1433_v15  ;;  %v1436_v56 = vmul.f32 %v1404_v3, %v1356_v58 }
 0x3f3   : > { %v1402_v61 = vpop.permute.xlu0 %1401 }
 0x3f4   : > { %2926 = vmatmul.mubr.msk.bf16.gmra.mxu1 %vm493_vm0, %v1440_v32  ;;  %v1435_v17 = vmul.f32 %v1402_v61, %v1355_v2 }
 0x3f5   : > { %1565 = vmatprep.mubr.bf16.mxu1 %v4629_v1 }
 0x3f6   : > { %v1444_v18 = vpack.c.bf16 %v1436_v56, %v1435_v17 }
 0x3fc   : > { %2927 = vmatmul.mubr.msk.bf16.gmra.mxu1 %vm493_vm0, %v1441_v51 }
 0x3fd   : > { %1575 = vmatprep.mubr.bf16.mxu1 %v4629_v1 }
 0x404   : > { %2928 = vmatmul.mubr.msk.bf16.gmra.mxu1 %vm493_vm0, %v1442_v11 }
 0x405   : > { %1585 = vmatprep.mubr.bf16.mxu1 %v4629_v1 }
 0x40c   : > { %2929 = vmatmul.mubr.msk.bf16.gmra.mxu1 %vm493_vm0, %v1443_v60 }
 0x40d   : > { %1595 = vmatprep.mubr.bf16.mxu1 %v4629_v1 }
 0x414   : > { %2930 = vmatmul.mubr.msk.bf16.gmra.mxu1 %vm493_vm0, %v1444_v18 }
 0x415   : > { %2016 = vmatprep.mubr.bf16.mxu1 %v4629_v1 }
 0x49c   : > { %v1527_v44 = vpop.f32.mrf.mxu1 }
 0x49d   : > { %v1606_v12 = vmul.f32 0.35355338, %v1527_v44 }
 0x49e   : > { %v1529_v45 = vpop.f32.mrf.mxu1 }
 0x49f   : > { %v1622_v7 = vmul.f32 1.442695, %v1606_v12 }
 0x4a0   : > { %v1531_v47 = vpop.f32.mrf.mxu1 }
 0x4a1   : > { %3361 = vpow2.f32 %v1622_v7  ;;  %v1607_v33 = vmul.f32 0.35355338, %v1531_v47 }
 0x4a2   : > { %v1533_v31 = vpop.f32.mrf.mxu1 }
 0x4a3   : > { %v1624_v50 = vmul.f32 1.442695, %v1607_v33  ;;  %v3979_v19 = vpack.c.bf16 %v1533_v31, %v1529_v45 }
 0x4a4   : > { %v1537_v52 = vpop.f32.mrf.mxu1 }
 0x4a5   : > { %3363 = vpow2.f32 %v1624_v50  ;;  %v1608_v16 = vmul.f32 0.35355338, %v1537_v52 }
 0x4a6   : > { %v1539_v38 = vpop.f32.mrf.mxu1 }
 0x4a7   : > { %v1626_v36 = vmul.f32 1.442695, %v1608_v16 }
 0x4a8   : > { %v1541_v53 = vpop.f32.mrf.mxu1 }
 0x4a9   : > { %3365 = vpow2.f32 %v1626_v36  ;;  %v1609_v57 = vmul.f32 0.35355338, %v1541_v53 }
 0x4aa   : > { %v1543_v25 = vpop.f32.mrf.mxu1 }
 0x4ab   : > { %v1628_v59 = vmul.f32 1.442695, %v1609_v57  ;;  %v3982_v22 = vpack.c.bf16 %v1543_v25, %v1539_v38 }
 0x4ac   : > { %v1547_v62 = vpop.f32.mrf.mxu1 }
 0x4ad   : > { %3367 = vpow2.f32 %v1628_v59  ;;  %v1610_v42 = vmul.f32 0.35355338, %v1547_v62 }
 0x4ae   : > { %v3362_v43 = vpop.eup %3361  ;;  %v1549_v32 = vpop.f32.mrf.mxu1 }
 0x4af   : > { %v3022_v0 = vpack.c.bf16 %v3362_v43, %v3362_v43  ;;  %v1630_v28 = vmul.f32 1.442695, %v1610_v42 }
 0x4b0   : > { %v1551_v41 = vpop.f32.mrf.mxu1 }
 0x4b1   : > { %1719 = vst.msk [vmem:[%s3987_s30] sm:$0xf] %vm1718_vm4, %v3022_v0  ;;  %3369 = vpow2.f32 %v1630_v28  ;;  %v1611_v48 = vmul.f32 0.35355338, %v1551_v41  ;;  %v3313_v41 = vld [vmem:[%s4625_s8 + $0x6c] ss:$16 sps:$4 sm:$0xff]  }
 0x4b2   : > { %v3364_v49 = vpop.eup %3363  ;;  %v1553_v37 = vpop.f32.mrf.mxu1  ;;  %2346 = vmatprep.subr.bf16.mxu1 %v3313_v41 }
 0x4b3   : > { %v3023_v51 = vpack.c.bf16 %v3364_v49, %v3364_v49  ;;  %v1632_v46 = vmul.f32 1.442695, %v1611_v48  ;;  %v3991_v5 = vpack.c.bf16 %v1553_v37, %v1549_v32  ;;  %v1654_v6 = vpack.c.bf16 %v3364_v49, %v3362_v43 }
 0x4b4   : > { %v1557_v10 = vpop.f32.mrf.mxu1 }
 0x4b5   : > { %1720 = vst.msk [vmem:[%s3987_s30 + $0x4] sm:$0xf] %vm1718_vm4, %v3023_v51  ;;  %3371 = vpow2.f32 %v1632_v46  ;;  %v1612_v54 = vmul.f32 0.35355338, %v1557_v10  ;;  %1751 = vrot.lane.b32.xlu0 %v1654_v6, %s3421_s25 }
 0x4b6   : > { %v3366_v55 = vpop.eup %3365  ;;  %v1559_v11 = vpop.f32.mrf.mxu1 }
 0x4b7   : > { %v3024_v13 = vpack.c.bf16 %v3366_v55, %v3366_v55  ;;  %v1634_v14 = vmul.f32 1.442695, %v1612_v54 }
 0x4b8   : > { %v1561_v15 = vpop.f32.mrf.mxu1 }
 0x4b9   : > { %1721 = vst.msk [vmem:[%s3987_s30 + $0x8] sm:$0xf] %vm1718_vm4, %v3024_v13  ;;  %3373 = vpow2.f32 %v1634_v14  ;;  %v1613_v60 = vmul.f32 0.35355338, %v1561_v15 }
 0x4ba   : > { %v3368_v61 = vpop.eup %3367  ;;  %v1563_v2 = vpop.f32.mrf.mxu1 }
 0x4bb   : > { %v3025_v3 = vpack.c.bf16 %v3368_v61, %v3368_v61  ;;  %v1636_v58 = vmul.f32 1.442695, %v1613_v60  ;;  %v3998_v17 = vpack.c.bf16 %v1563_v2, %v1559_v11  ;;  %v1655_v56 = vpack.c.bf16 %v3368_v61, %v3366_v55 }
 0x4bc   : > { %v1567_v18 = vpop.f32.mrf.mxu1 }
 0x4bd   : > { %1722 = vst.msk [vmem:[%s3987_s30 + $0xc] sm:$0xf] %vm1718_vm4, %v3025_v3  ;;  %3375 = vpow2.f32 %v1636_v58  ;;  %v1614_v20 = vmul.f32 0.35355338, %v1567_v18  ;;  %1753 = vrot.lane.b32.xlu1 %v1655_v56, %s3421_s25 }
 0x4be   : > { %v3370_v9 = vpop.eup %3369  ;;  %v1569_v21 = vpop.f32.mrf.mxu1 }
 0x4bf   : > { %v3026_v8 = vpack.c.bf16 %v3370_v9, %v3370_v9  ;;  %v1638_v23 = vmul.f32 1.442695, %v1614_v20 }
 0x4c0   : > { %v1571_v24 = vpop.f32.mrf.mxu1 }
 0x4c1   : > { %1723 = vst.msk [vmem:[%s3987_s30 + $0x10] sm:$0xf] %vm1718_vm4, %v3026_v8  ;;  %3377 = vpow2.f32 %v1638_v23  ;;  %v1615_v26 = vmul.f32 0.35355338, %v1571_v24 }
 0x4c2   : > { %v3372_v4 = vpop.eup %3371  ;;  %v1573_v29 = vpop.f32.mrf.mxu1 }
 0x4c3   : > { %v3027_v63 = vpack.c.bf16 %v3372_v4, %v3372_v4  ;;  %v1640_v30 = vmul.f32 1.442695, %v1615_v26  ;;  %v4008_v34 = vpack.c.bf16 %v1573_v29, %v1569_v21  ;;  %v1656_v35 = vpack.c.bf16 %v3372_v4, %v3370_v9  ;;  %v3305_v26 = vld [vmem:[%s4625_s8 + $0x60] ss:$16 sps:$4 sm:$0xff]   ;;  %v3310_v29 = vld [vmem:[%s4625_s8 + $0x44] ss:$16 sps:$4 sm:$0xff]  }
 0x4c4   : > { %v1577_v39 = vpop.f32.mrf.mxu1 }
 0x4c5   : > { %1724 = vst.msk [vmem:[%s3987_s30 + $0x14] sm:$0xf] %vm1718_vm4, %v3027_v63  ;;  %3379 = vpow2.f32 %v1640_v30  ;;  %v1616_v40 = vmul.f32 0.35355338, %v1577_v39  ;;  %1755 = vrot.lane.b32.xlu0 %v1656_v35, %s3421_s25  ;;  %v3316_v63 = vld [vmem:[%s4625_s8 + $0x4c] ss:$16 sps:$4 sm:$0xff]  }
 0x4c6   : > { %v3374_v44 = vpop.eup %3373  ;;  %v1579_v12 = vpop.f32.mrf.mxu1  ;;  %v3308_v30 = vld [vmem:[%s4625_s8 + $0x40] ss:$16 sps:$4 sm:$0xff]   ;;  %v3314_v35 = vld [vmem:[%s4625_s8 + $0x48] ss:$16 sps:$4 sm:$0xff]   ;;  %v3319_v39 = vld [vmem:[%s4625_s8 + $0x2c] ss:$16 sps:$4 sm:$0xff]  }
 0x4c7   : > { %v3028_v45 = vpack.c.bf16 %v3374_v44, %v3374_v44  ;;  %v1642_v7 = vmul.f32 1.442695, %v1616_v40  ;;  %v3322_v40 = vld [vmem:[%s4625_s8 + $0x24] ss:$16 sps:$4 sm:$0xff]  }
 0x4c8   : > { %v1581_v47 = vpop.f32.mrf.mxu1 }
 0x4c9   : > { %1725 = vst.msk [vmem:[%s3987_s30 + $0x18] sm:$0xf] %vm1718_vm4, %v3028_v45  ;;  %3381 = vpow2.f32 %v1642_v7  ;;  %v1617_v33 = vmul.f32 0.35355338, %v1581_v47  ;;  %v3325_v7 = vld [vmem:[%s4625_s8 + $0xc] ss:$16 sps:$4 sm:$0xff]  }
 0x4ca   : > { %v3376_v31 = vpop.eup %3375  ;;  %v1583_v50 = vpop.f32.mrf.mxu1  ;;  %v3328_v47 = vld [vmem:[%s4625_s8 + $0x4] ss:$16 sps:$4 sm:$0xff]  }
 0x4cb   : > { %v3029_v52 = vpack.c.bf16 %v3376_v31, %v3376_v31  ;;  %v1644_v16 = vmul.f32 1.442695, %v1617_v33  ;;  %v4015_v38 = vpack.c.bf16 %v1583_v50, %v1579_v12  ;;  %v1657_v36 = vpack.c.bf16 %v3376_v31, %v3374_v44  ;;  %v3317_v44 = vld [vmem:[%s4625_s8 + $0x28] ss:$16 sps:$4 sm:$0xff]   ;;  %v3320_v12 = vld [vmem:[%s4625_s8 + $0x20] ss:$16 sps:$4 sm:$0xff]  }
 0x4cc   : > { %v1587_v53 = vpop.f32.mrf.mxu1  ;;  %v3323_v33 = vld [vmem:[%s4625_s8 + $0x8] ss:$16 sps:$4 sm:$0xff]   ;;  %v3326_v31 = vld [vmem:[%s4625_s8] ss:$16 sps:$4 sm:$0xff]  }
 0x4cd   : > { %1726 = vst.msk [vmem:[%s3987_s30 + $0x1c] sm:$0xf] %vm1718_vm4, %v3029_v52  ;;  %3383 = vpow2.f32 %v1644_v16  ;;  %v1618_v57 = vmul.f32 0.35355338, %v1587_v53  ;;  %1757 = vrot.lane.b32.xlu1 %v1657_v36, %s3421_s25  ;;  %v4630_v52 = vmov 0.0  }
 0x4ce   : > { %v3378_v25 = vpop.eup %3377  ;;  %v1589_v59 = vpop.f32.mrf.mxu1 }
 0x4cf   : > { %v3030_v62 = vpack.c.bf16 %v3378_v25, %v3378_v25  ;;  %v1646_v42 = vmul.f32 1.442695, %v1618_v57 }
 0x4d0   : > { %v1591_v43 = vpop.f32.mrf.mxu1 }
 0x4d1   : > { %1727 = vst.msk [vmem:[%s3987_s30 + $0x20] sm:$0xf] %vm1718_vm4, %v3030_v62  ;;  %3385 = vpow2.f32 %v1646_v42  ;;  %v1619_v32 = vmul.f32 0.35355338, %v1591_v43 }
 0x4d2   : > { %v3380_v0 = vpop.eup %3379  ;;  %v1593_v28 = vpop.f32.mrf.mxu1 }
 0x4d3   : > { %v3031_v48 = vpack.c.bf16 %v3380_v0, %v3380_v0  ;;  %v1648_v49 = vmul.f32 1.442695, %v1619_v32  ;;  %v4025_v37 = vpack.c.bf16 %v1593_v28, %v1589_v59  ;;  %v1658_v51 = vpack.c.bf16 %v3380_v0, %v3378_v25 }
 0x4d4   : > { %v1597_v46 = vpop.f32.mrf.mxu1 }
 0x4d5   : > { %1728 = vst.msk [vmem:[%s3987_s30 + $0x24] sm:$0xf] %vm1718_vm4, %v3031_v48  ;;  %3387 = vpow2.f32 %v1648_v49  ;;  %v1620_v6 = vmul.f32 0.35355338, %v1597_v46  ;;  %1759 = vrot.lane.b32.xlu0 %v1658_v51, %s3421_s25 }
 0x4d6   : > { %v3382_v10 = vpop.eup %3381  ;;  %v4030_v54 = vpop.f32.mrf.mxu1 }
 0x4d7   : > { %v3032_v55 = vpack.c.bf16 %v3382_v10, %v3382_v10  ;;  %v1650_v11 = vmul.f32 1.442695, %v1620_v6 }
 0x4d8   : > { %v1601_v13 = vpop.f32.mrf.mxu1 }
 0x4d9   : > { %1729 = vst.msk [vmem:[%s3987_s30 + $0x28] sm:$0xf] %vm1718_vm4, %v3032_v55  ;;  %3389 = vpow2.f32 %v1650_v11  ;;  %v1621_v14 = vmul.f32 0.35355338, %v1601_v13 }
 0x4da   : > { %v3384_v15 = vpop.eup %3383 }
 0x4db   : > { %v3033_v60 = vpack.c.bf16 %v3384_v15, %v3384_v15  ;;  %v1652_v61 = vmul.f32 1.442695, %v1621_v14  ;;  %v1659_v2 = vpack.c.bf16 %v3384_v15, %v3382_v10 }
 0x4dd   : > { %1730 = vst.msk [vmem:[%s3987_s30 + $0x2c] sm:$0xf] %vm1718_vm4, %v3033_v60  ;;  %3391 = vpow2.f32 %v1652_v61  ;;  %1761 = vrot.lane.b32.xlu1 %v1659_v2, %s3421_s25 }
 0x4de   : > { %v3386_v3 = vpop.eup %3385 }
 0x4df   : > { %v3034_v58 = vpack.c.bf16 %v3386_v3, %v3386_v3 }
 0x4e1   : > { %1731 = vst.msk [vmem:[%s3987_s30 + $0x30] sm:$0xf] %vm1718_vm4, %v3034_v58 }
 0x4e2   : > { %v3388_v56 = vpop.eup %3387 }
 0x4e3   : > { %v3035_v18 = vpack.c.bf16 %v3388_v56, %v3388_v56  ;;  %v1660_v20 = vpack.c.bf16 %v3388_v56, %v3386_v3 }
 0x4e5   : > { %1732 = vst.msk [vmem:[%s3987_s30 + $0x34] sm:$0xf] %vm1718_vm4, %v3035_v18  ;;  %1763 = vrot.lane.b32.xlu0 %v1660_v20, %s3421_s25 }
 0x4e6   : > { %v3390_v9 = vpop.eup %3389 }
 0x4e7   : > { %v3036_v21 = vpack.c.bf16 %v3390_v9, %v3390_v9 }
 0x4e9   : > { %1733 = vst.msk [vmem:[%s3987_s30 + $0x38] sm:$0xf] %vm1718_vm4, %v3036_v21 }
 0x4ea   : > { %v3392_v8 = vpop.eup %3391 }
 0x4eb   : > { %v3037_v23 = vpack.c.bf16 %v3392_v8, %v3392_v8  ;;  %v1661_v24 = vpack.c.bf16 %v3392_v8, %v3390_v9 }
 0x4ed   : > { %1734 = vst.msk [vmem:[%s3987_s30 + $0x3c] sm:$0xf] %vm1718_vm4, %v3037_v23  ;;  %1765 = vrot.lane.b32.xlu1 %v1661_v24, %s3421_s25 }
 0x527   : > { %v4053_v4 = vpop.permute.xlu0 %1751 }
 0x528   : > { %2963 = vmatmul.mubr.msk.bf16.vlgmr.msra.gmra.mxu0 %vm791_vm1, %v4053_v4  ;;  %2971 = vmatmul.mubr.msk.bf16.vlgmr.msra.gmra.mxu1 %vm791_vm1, %v4053_v4 }
 0x529   : > { %1913 = vmatprep.mubr.bf16.mxu0 %v4629_v1  ;;  %2026 = vmatprep.mubr.bf16.mxu1 %v4629_v1 }
 0x52a   : > { %2234 = vmatpush1.bf16.msra.mxu0 %v3305_v26  ;;  %2347 = vmatpush1.bf16.msra.mxu1 %v3311_v27 }
 0x52b   : > { %2235 = vmatprep.subr.bf16.mxu0 %v3310_v29  ;;  %2348 = vmatprep.subr.bf16.mxu1 %v3316_v63 }
 0x52e   : > { %2236 = vmatpush1.bf16.msra.mxu0 %v3308_v30  ;;  %2349 = vmatpush1.bf16.msra.mxu1 %v3314_v35 }
 0x52f   : > { %v4085_v45 = vpop.permute.xlu1 %1753  ;;  %2350 = vmatprep.subr.bf16.mxu1 %v3319_v39  ;;  %2237 = vmatprep.subr.bf16.mxu0 %v3322_v40 }
 0x530   : > { %2964 = vmatmul.mubr.msk.bf16.gmra.mxu0 %vm791_vm1, %v4085_v45  ;;  %2972 = vmatmul.mubr.msk.bf16.gmra.mxu1 %vm791_vm1, %v4085_v45 }
 0x531   : > { %1923 = vmatprep.mubr.bf16.mxu0 %v4629_v1  ;;  %2036 = vmatprep.mubr.bf16.mxu1 %v4629_v1 }
 0x532   : > { %2351 = vmatpush1.bf16.msra.mxu1 %v3317_v44  ;;  %2238 = vmatpush1.bf16.msra.mxu0 %v3320_v12 }
 0x533   : > { %2352 = vmatprep.subr.bf16.mxu1 %v3325_v7  ;;  %2239 = vmatprep.subr.bf16.mxu0 %v3328_v47 }
 0x536   : > { %2353 = vmatpush1.bf16.msra.mxu1 %v3323_v33  ;;  %2240 = vmatpush1.bf16.msra.mxu0 %v3326_v31 }
 0x537   : > { %v1756_v50 = vpop.permute.xlu0 %1755  ;;  %3206 = vmatprep.subr.bf16.mxu1 %v4630_v52 }
 0x538   : > { %2965 = vmatmul.mubr.msk.bf16.gmra.mxu0 %vm791_vm1, %v1756_v50  ;;  %2973 = vmatmul.mubr.msk.bf16.gmra.mxu1 %vm791_vm1, %v1756_v50 }
 0x539   : > { %1933 = vmatprep.mubr.bf16.mxu0 %v4629_v1  ;;  %2046 = vmatprep.mubr.bf16.mxu1 %v4629_v1 }
 0x53f   : > { %v1758_v16 = vpop.permute.xlu1 %1757 }
 0x540   : > { %2966 = vmatmul.mubr.msk.bf16.gmra.mxu0 %vm791_vm1, %v1758_v16  ;;  %2974 = vmatmul.mubr.msk.bf16.gmra.mxu1 %vm791_vm1, %v1758_v16 }
 0x541   : > { %1943 = vmatprep.mubr.bf16.mxu0 %v4629_v1  ;;  %2056 = vmatprep.mubr.bf16.mxu1 %v4629_v1 }
 0x547   : > { %v1760_v36 = vpop.permute.xlu0 %1759 }
 0x548   : > { %2967 = vmatmul.mubr.msk.bf16.gmra.mxu0 %vm791_vm1, %v1760_v36  ;;  %2975 = vmatmul.mubr.msk.bf16.gmra.mxu1 %vm791_vm1, %v1760_v36 }
 0x549   : > { %1953 = vmatprep.mubr.bf16.mxu0 %v4629_v1  ;;  %2066 = vmatprep.mubr.bf16.mxu1 %v4629_v1 }
 0x54f   : > { %v1762_v53 = vpop.permute.xlu1 %1761 }
 0x550   : > { %2968 = vmatmul.mubr.msk.bf16.gmra.mxu0 %vm791_vm1, %v1762_v53  ;;  %2976 = vmatmul.mubr.msk.bf16.gmra.mxu1 %vm791_vm1, %v1762_v53 }
 0x551   : > { %1963 = vmatprep.mubr.bf16.mxu0 %v4629_v1  ;;  %2076 = vmatprep.mubr.bf16.mxu1 %v4629_v1 }
 0x557   : > { %v1764_v57 = vpop.permute.xlu0 %1763 }
 0x558   : > { %2969 = vmatmul.mubr.msk.bf16.gmra.mxu0 %vm791_vm1, %v1764_v57  ;;  %2977 = vmatmul.mubr.msk.bf16.gmra.mxu1 %vm791_vm1, %v1764_v57 }
 0x559   : > { %1973 = vmatprep.mubr.bf16.mxu0 %v4629_v1  ;;  %2086 = vmatprep.mubr.bf16.mxu1 %v4629_v1 }
 0x55f   : > { %v1766_v25 = vpop.permute.xlu1 %1765 }
 0x560   : > { %2970 = vmatmul.mubr.msk.bf16.gmra.mxu0 %vm791_vm1, %v1766_v25  ;;  %2978 = vmatmul.mubr.msk.bf16.gmra.mxu1 %vm791_vm1, %v1766_v25 }
 0x561   : > { %2257 = vmatprep.mubr.bf16.mxu0 %v4629_v1  ;;  %2370 = vmatprep.mubr.bf16.mxu1 %v4629_v1 }
 0x568   : > { %2995 = vmatmul.mubr.msk.bf16.vlgmr.msra.gmra.mxu0 %vm791_vm1, %v3979_v19  ;;  %3003 = vmatmul.mubr.msk.bf16.vlgmr.msra.gmra.mxu1 %vm791_vm1, %v3979_v19  ;;  %v1603_v19 = vpop.f32.mrf.mxu1 }
 0x569   : > { %3207 = vmatpush3.bf16.msra.mxu1 %v1766_v25  ;;  %2267 = vmatprep.mubr.bf16.mxu0 %v4629_v1 }
 0x56a   : > { %3208 = vmatprep.subr.bf16.mxu1 %v4630_v52  ;;  %2380 = vmatprep.mubr.bf16.mxu1 %v4629_v1 }
 0x56d   : > { %3209 = vmatpush3.bf16.msra.mxu1 %v1764_v57 }
 0x56e   : > { %3210 = vmatprep.subr.bf16.mxu1 %v4630_v52 }
 0x570   : > { %2996 = vmatmul.mubr.msk.bf16.gmra.mxu0 %vm791_vm1, %v3982_v22  ;;  %3004 = vmatmul.mubr.msk.bf16.gmra.mxu1 %vm791_vm1, %v3982_v22  ;;  %v2104_v22 = vpack.c.bf16 %v1603_v19, %v4030_v54 }
 0x571   : > { %3211 = vmatpush3.bf16.msra.mxu1 %v1762_v53  ;;  %2277 = vmatprep.mubr.bf16.mxu0 %v4629_v1 }
 0x572   : > { %3212 = vmatprep.subr.bf16.mxu1 %v4630_v52  ;;  %2390 = vmatprep.mubr.bf16.mxu1 %v4629_v1 }
 0x575   : > { %3213 = vmatpush3.bf16.msra.mxu1 %v1760_v36  ;;  %v2515_v36 = vlaneseq }
 0x576   : > { %3214 = vmatprep.subr.bf16.mxu1 %v4630_v52 }
 0x578   : > { %2997 = vmatmul.mubr.msk.bf16.gmra.mxu0 %vm791_vm1, %v3991_v5  ;;  %3005 = vmatmul.mubr.msk.bf16.gmra.mxu1 %vm791_vm1, %v3991_v5 }
 0x579   : > { %3215 = vmatpush3.bf16.msra.mxu1 %v1758_v16  ;;  %2287 = vmatprep.mubr.bf16.mxu0 %v4629_v1 }
 0x57a   : > { %3216 = vmatprep.subr.bf16.mxu1 %v4630_v52  ;;  %2400 = vmatprep.mubr.bf16.mxu1 %v4629_v1 }
 0x57d   : > { %3217 = vmatpush3.bf16.msra.mxu1 %v1756_v50 }
 0x57e   : > { %3218 = vmatprep.subr.bf16.mxu1 %v4630_v52 }
 0x580   : > { %2998 = vmatmul.mubr.msk.bf16.gmra.mxu0 %vm791_vm1, %v3998_v17  ;;  %3006 = vmatmul.mubr.msk.bf16.gmra.mxu1 %vm791_vm1, %v3998_v17 }
 0x581   : > { %3219 = vmatpush3.bf16.msra.mxu1 %v4085_v45  ;;  %2297 = vmatprep.mubr.bf16.mxu0 %v4629_v1 }
 0x582   : > { %3220 = vmatprep.subr.bf16.mxu1 %v4630_v52  ;;  %2410 = vmatprep.mubr.bf16.mxu1 %v4629_v1 }
 0x585   : > { %3221 = vmatpush3.bf16.msra.mxu1 %v4053_v4 }
 0x588   : > { %2999 = vmatmul.mubr.msk.bf16.gmra.mxu0 %vm791_vm1, %v4008_v34  ;;  %3007 = vmatmul.mubr.msk.bf16.gmra.mxu1 %vm791_vm1, %v4008_v34 }
 0x589   : > { %2307 = vmatprep.mubr.bf16.mxu0 %v4629_v1  ;;  %2420 = vmatprep.mubr.bf16.mxu1 %v4629_v1 }
 0x590   : > { %3000 = vmatmul.mubr.msk.bf16.gmra.mxu0 %vm791_vm1, %v4015_v38  ;;  %3008 = vmatmul.mubr.msk.bf16.gmra.mxu1 %vm791_vm1, %v4015_v38 }
 0x591   : > { %2317 = vmatprep.mubr.bf16.mxu0 %v4629_v1  ;;  %2430 = vmatprep.mubr.bf16.mxu1 %v4629_v1 }
 0x598   : > { %3001 = vmatmul.mubr.msk.bf16.gmra.mxu0 %vm791_vm1, %v4025_v37  ;;  %3009 = vmatmul.mubr.msk.bf16.gmra.mxu1 %vm791_vm1, %v4025_v37 }
 0x599   : > { %2327 = vmatprep.mubr.bf16.mxu0 %v4629_v1  ;;  %2440 = vmatprep.mubr.bf16.mxu1 %v4629_v1 }
 0x5a0   : > { %3002 = vmatmul.mubr.msk.bf16.gmra.mxu0 %vm791_vm1, %v2104_v22  ;;  %3010 = vmatmul.mubr.msk.bf16.gmra.mxu1 %vm791_vm1, %v2104_v22  ;;  %v4313_v22 = vshrl.u32 %v2515_v36, 7 }
 0x5a1   : > { %2591 = vmatprep.mubr.bf16.mxu0 %v4629_v1 }
 0x5a2   : > { %4656 = vst [vmem:[#allocation10_spill] sm:$0xff] %v4313_v22 }
 0x5e8   : > { %v4185_v5 = vpop.f32.mrf.mxu0  ;;  %v4187_v17 = vpop.f32.mrf.mxu1 }
 0x5ea   : > { %v4189_v34 = vpop.f32.mrf.mxu0  ;;  %v4191_v38 = vpop.f32.mrf.mxu1 }
 0x5ec   : > { %v4193_v59 = vpop.f32.mrf.mxu0  ;;  %v4195_v62 = vpop.f32.mrf.mxu1 }
 0x5ee   : > { %v4197_v42 = vpop.f32.mrf.mxu0  ;;  %v4199_v43 = vpop.f32.mrf.mxu1 }
 0x5f0   : > { %v4201_v32 = vpop.f32.mrf.mxu0  ;;  %v4203_v0 = vpop.f32.mrf.mxu1 }
 0x5f2   : > { %v4205_v28 = vpop.f32.mrf.mxu0  ;;  %v4207_v41 = vpop.f32.mrf.mxu1 }
 0x5f4   : > { %v4209_v48 = vpop.f32.mrf.mxu0  ;;  %v4211_v49 = vpop.f32.mrf.mxu1 }
 0x5f6   : > { %v4213_v37 = vpop.f32.mrf.mxu0  ;;  %v4215_v51 = vpop.f32.mrf.mxu1 }
 0x5f8   : > { %v4217_v46 = vpop.f32.mrf.mxu0  ;;  %v4219_v6 = vpop.f32.mrf.mxu1 }
 0x5fa   : > { %v4221_v10 = vpop.f32.mrf.mxu0  ;;  %v4223_v54 = vpop.f32.mrf.mxu1 }
 0x5fc   : > { %v4225_v55 = vpop.f32.mrf.mxu0  ;;  %v4227_v11 = vpop.f32.mrf.mxu1 }
 0x5fe   : > { %v4229_v13 = vpop.f32.mrf.mxu0  ;;  %v4231_v14 = vpop.f32.mrf.mxu1 }
 0x600   : > { %v4233_v15 = vpop.f32.mrf.mxu0  ;;  %v4235_v60 = vpop.f32.mrf.mxu1 }
 0x602   : > { %v4237_v61 = vpop.f32.mrf.mxu0  ;;  %v4239_v2 = vpop.f32.mrf.mxu1 }
 0x604   : > { %v4241_v3 = vpop.f32.mrf.mxu0  ;;  %v4243_v58 = vpop.f32.mrf.mxu1 }
 0x606   : > { %v4245_v56 = vpop.f32.mrf.mxu0  ;;  %v4247_v18 = vpop.f32.mrf.mxu1 }
 0x608   : > { %v4249_v20 = vpop.f32.mrf.mxu0  ;;  %v4251_v9 = vpop.f32.mrf.mxu1 }
 0x60a   : > { %v4253_v21 = vpop.f32.mrf.mxu0  ;;  %v4255_v8 = vpop.f32.mrf.mxu1 }
 0x60c   : > { %v4257_v23 = vpop.f32.mrf.mxu0  ;;  %v4259_v24 = vpop.f32.mrf.mxu1 }
 0x60e   : > { %v4261_v26 = vpop.f32.mrf.mxu0  ;;  %v4263_v27 = vpop.f32.mrf.mxu1 }
 0x610   : > { %v4265_v4 = vpop.f32.mrf.mxu0  ;;  %v4267_v29 = vpop.f32.mrf.mxu1 }
 0x612   : > { %v4269_v63 = vpop.f32.mrf.mxu0  ;;  %v4271_v30 = vpop.f32.mrf.mxu1 }
 0x614   : > { %v4273_v35 = vpop.f32.mrf.mxu0  ;;  %v4275_v39 = vpop.f32.mrf.mxu1 }
 0x616   : > { %v4277_v40 = vpop.f32.mrf.mxu0  ;;  %v4279_v44 = vpop.f32.mrf.mxu1 }
 0x618   : > { %v4281_v12 = vpop.f32.mrf.mxu0  ;;  %v4283_v45 = vpop.f32.mrf.mxu1 }
 0x61a   : > { %v4286_v7 = vpop.f32.mrf.mxu0  ;;  %v4288_v47 = vpop.f32.mrf.mxu1 }
 0x61b   : > { %4648 = vst [vmem:[#allocation2_spill] sm:$0xff] %v4286_v7  ;;  %4649 = vst [vmem:[#allocation3_spill] sm:$0xff] %v4288_v47 }
 0x61c   : > { %v4290_v33 = vpop.f32.mrf.mxu0  ;;  %v4292_v31 = vpop.f32.mrf.mxu1 }
 0x61e   : > { %v4297_v50 = vpop.f32.mrf.mxu0  ;;  %v4299_v16 = vpop.f32.mrf.mxu1 }
 0x61f   : > { %4650 = vst [vmem:[#allocation4_spill] sm:$0xff] %v4297_v50  ;;  %4651 = vst [vmem:[#allocation5_spill] sm:$0xff] %v4299_v16  ;;  %v3011_v16 = vld [vmem:[%s439_s16] ss:$0 sm:$0xff] }
 0x620   : > { %v4301_v53 = vpop.f32.mrf.mxu0  ;;  %v4303_v57 = vpop.f32.mrf.mxu1  ;;  %vm2522_vm5 = vcmp.eq.s32.totalorder %v4313_v22, %v3011_v16 }
 0x621   : > { %4652 = vst [vmem:[#allocation6_spill] sm:$0xff] %v4301_v53  ;;  %4653 = vst [vmem:[#allocation7_spill] sm:$0xff] %v4303_v57 }
 0x622   : > { %v4309_v25 = vpop.f32.mrf.mxu0  ;;  %v4311_v19 = vpop.f32.mrf.mxu1  ;;  %vm4330_vm6 = vmpackc.low %vm2522_vm5, %vm2522_vm5 }
 0x623   : > { %4654 = vst [vmem:[#allocation8_spill] sm:$0xff] %v4309_v25  ;;  %4655 = vst [vmem:[#allocation9_spill] sm:$0xff] %v4311_v19 }
 0x624   : > { %v4315_v1 = vpop.f32.mrf.mxu0  ;;  %v4317_v52 = vpop.f32.mrf.mxu1 }
 0x625   : > { %4657 = vst [vmem:[#allocation11_spill] sm:$0xff] %v4315_v1  ;;  %4658 = vst [vmem:[#allocation12_spill] sm:$0xff] %v4317_v52 }
 0x626   : > { %v4319_v50 = vpop.f32.mrf.mxu0  ;;  %v4321_v53 = vpop.f32.mrf.mxu1 }
 0x627   : > { %4659 = vst [vmem:[#allocation13_spill] sm:$0xff] %v4319_v50  ;;  %4660 = vst [vmem:[#allocation14_spill] sm:$0xff] %v4321_v53  ;;  %v4664_v50 = vmov 0.0  }
 0x628   : > { %v2259_v57 = vpop.f32.mrf.mxu0  ;;  %v2372_v47 = vpop.f32.mrf.mxu1  ;;  %3222 = vmatprep.mubr.msk.bf16.mxu1 %vm3423_vm7, %v4664_v50 }
 0x629   : > { %v4325_v7 = vmul.f32 %v2259_v57, %v4185_v5  ;;  %v4328_v19 = vmul.f32 %v2372_v47, %v4187_v17  ;;  %v4633_v5 = vmov 1.0|1.0  }
 0x62a   : > { %v2261_v36 = vpop.f32.mrf.mxu0  ;;  %v2374_v25 = vpop.f32.mrf.mxu1  ;;  %3223 = vmatmul.mubr.msk.bf16.vlgmr.msra.gmra.mxu1 %vm4330_vm6, %v4633_v5 }
 0x62b   : > { %4661 = vst [vmem:[#allocation15_spill] sm:$0xff] %v4328_v19  ;;  %v4336_v53 = vmul.f32 %v2261_v36, %v4189_v34  ;;  %v4339_v16 = vmul.f32 %v2374_v25, %v4191_v38 }
 0x62c   : > { %v2263_v17 = vpop.f32.mrf.mxu0  ;;  %v2376_v47 = vpop.f32.mrf.mxu1 }
 0x62d   : > { %4665 = vst [vmem:[#allocation16_spill] sm:$0xff] %v4339_v16  ;;  %v4345_v57 = vmul.f32 %v2263_v17, %v4193_v59  ;;  %v4348_v22 = vmul.f32 %v2376_v47, %v4195_v62 }
 0x62e   : > { %v2265_v50 = vpop.f32.mrf.mxu0  ;;  %v2378_v52 = vpop.f32.mrf.mxu1 }
 0x62f   : > { %4666 = vst [vmem:[#allocation17_spill] sm:$0xff] %v4348_v22  ;;  %v4355_v25 = vmul.f32 %v2265_v50, %v4197_v42  ;;  %v4358_v36 = vmul.f32 %v2378_v52, %v4199_v43 }
 0x630   : > { %v2269_v5 = vpop.f32.mrf.mxu0  ;;  %v2382_v59 = vpop.f32.mrf.mxu1 }
 0x631   : > { %4667 = vst [vmem:[#allocation18_spill] sm:$0xff] %v4358_v36  ;;  %v4365_v47 = vmul.f32 %v2269_v5, %v4201_v32  ;;  %v4368_v34 = vmul.f32 %v2382_v59, %v4203_v0 }
 0x632   : > { %v2271_v38 = vpop.f32.mrf.mxu0  ;;  %v2384_v42 = vpop.f32.mrf.mxu1 }
 0x633   : > { %4668 = vst [vmem:[#allocation19_spill] sm:$0xff] %v4368_v34  ;;  %v4371_v50 = vmul.f32 %v2271_v38, %v4205_v28  ;;  %v4374_v52 = vmul.f32 %v2384_v42, %v4207_v41 }
 0x634   : > { %v2273_v43 = vpop.f32.mrf.mxu0  ;;  %v2386_v19 = vpop.f32.mrf.mxu1 }
 0x635   : > { %4669 = vst [vmem:[#allocation20_spill] sm:$0xff] %v4374_v52  ;;  %v4377_v62 = vmul.f32 %v2273_v43, %v4209_v48  ;;  %v4380_v17 = vmul.f32 %v2386_v19, %v4211_v49  ;;  %v4680_v52 = vld [vmem:[#allocation5_spill] sm:$0xff] }
 0x636   : > { %v2275_v32 = vpop.f32.mrf.mxu0  ;;  %v2388_v5 = vpop.f32.mrf.mxu1 }
 0x637   : > { %4670 = vst [vmem:[#allocation21_spill] sm:$0xff] %v4380_v17  ;;  %v4387_v38 = vmul.f32 %v2275_v32, %v4213_v37  ;;  %v4390_v41 = vmul.f32 %v2388_v5, %v4215_v51 }
 0x638   : > { %v2279_v59 = vpop.f32.mrf.mxu0  ;;  %v2392_v48 = vpop.f32.mrf.mxu1 }
 0x639   : > { %4671 = vst [vmem:[#allocation22_spill] sm:$0xff] %v4390_v41  ;;  %v4397_v42 = vmul.f32 %v2279_v59, %v4217_v46  ;;  %v4400_v43 = vmul.f32 %v2392_v48, %v4219_v6 }
 0x63a   : > { %v2281_v28 = vpop.f32.mrf.mxu0  ;;  %v2394_v37 = vpop.f32.mrf.mxu1 }
 0x63b   : > { %4672 = vst [vmem:[#allocation23_spill] sm:$0xff] %v4400_v43  ;;  %v4403_v32 = vmul.f32 %v2394_v37, %v4223_v54  ;;  %v4412_v19 = vmul.f32 %v2281_v28, %v4221_v10 }
 0x63c   : > { %v2283_v51 = vpop.f32.mrf.mxu0  ;;  %v2396_v5 = vpop.f32.mrf.mxu1 }
 0x63d   : > { %4673 = vst [vmem:[#allocation24_spill] sm:$0xff] %v4403_v32  ;;  %v4406_v0 = vmul.f32 %v2283_v51, %v4225_v55  ;;  %v4409_v49 = vmul.f32 %v2396_v5, %v4227_v11  ;;  %v4688_v32 = vld [vmem:[#allocation14_spill] sm:$0xff] }
 0x63e   : > { %v2285_v46 = vpop.f32.mrf.mxu0  ;;  %v2398_v59 = vpop.f32.mrf.mxu1 }
 0x63f   : > { %4674 = vst [vmem:[#allocation25_spill] sm:$0xff] %v4409_v49  ;;  %v4419_v48 = vmul.f32 %v2285_v46, %v4229_v13  ;;  %v4422_v55 = vmul.f32 %v2398_v59, %v4231_v14 }
 0x640   : > { %v2289_v37 = vpop.f32.mrf.mxu0  ;;  %v2402_v11 = vpop.f32.mrf.mxu1 }
 0x641   : > { %4675 = vst [vmem:[#allocation26_spill] sm:$0xff] %v4422_v55  ;;  %v4429_v54 = vmul.f32 %v2289_v37, %v4233_v15  ;;  %v4432_v13 = vmul.f32 %v2402_v11, %v4235_v60 }
 0x642   : > { %v2291_v51 = vpop.f32.mrf.mxu0  ;;  %v2404_v5 = vpop.f32.mrf.mxu1 }
 0x643   : > { %4676 = vst [vmem:[#allocation27_spill] sm:$0xff] %v4432_v13  ;;  %v4441_v59 = vmul.f32 %v2291_v51, %v4237_v61  ;;  %v4444_v28 = vmul.f32 %v2404_v5, %v4239_v2 }
 0x644   : > { %v2293_v6 = vpop.f32.mrf.mxu0  ;;  %v2406_v22 = vpop.f32.mrf.mxu1 }
 0x645   : > { %v4435_v14 = vmul.f32 %v2293_v6, %v4241_v3  ;;  %v4438_v46 = vmul.f32 %v2406_v22, %v4243_v58 }
 0x646   : > { %v2295_v10 = vpop.f32.mrf.mxu0  ;;  %v2408_v16 = vpop.f32.mrf.mxu1 }
 0x647   : > { %v4451_v3 = vmul.f32 %v2295_v10, %v4245_v56  ;;  %v4454_v58 = vmul.f32 %v2408_v16, %v4247_v18 }
 0x648   : > { %v2299_v22 = vpop.f32.mrf.mxu0  ;;  %v2412_v61 = vpop.f32.mrf.mxu1 }
 0x649   : > { %v4461_v60 = vmul.f32 %v2299_v22, %v4249_v20  ;;  %v4464_v56 = vmul.f32 %v2412_v61, %v4251_v9 }
 0x64a   : > { %v2301_v37 = vpop.f32.mrf.mxu0  ;;  %v2414_v11 = vpop.f32.mrf.mxu1 }
 0x64b   : > { %v4473_v10 = vmul.f32 %v2301_v37, %v4253_v21  ;;  %v4476_v6 = vmul.f32 %v2414_v11, %v4255_v8 }
 0x64c   : > { %v2303_v51 = vpop.f32.mrf.mxu0  ;;  %v2416_v5 = vpop.f32.mrf.mxu1 }
 0x64d   : > { %v4467_v18 = vmul.f32 %v2303_v51, %v4257_v23  ;;  %v4470_v16 = vmul.f32 %v2416_v5, %v4259_v24 }
 0x64e   : > { %v2305_v15 = vpop.f32.mrf.mxu0  ;;  %v2418_v2 = vpop.f32.mrf.mxu1 }
 0x64f   : > { %v4483_v23 = vmul.f32 %v2305_v15, %v4261_v26  ;;  %v4486_v24 = vmul.f32 %v2418_v2, %v4263_v27 }
 0x650   : > { %v2309_v22 = vpop.f32.mrf.mxu0  ;;  %v2422_v21 = vpop.f32.mrf.mxu1 }
 0x651   : > { %v2491_v9 = vmul.f32 %v2309_v22, %v4265_v4  ;;  %v4494_v26 = vmul.f32 %v2422_v21, %v4267_v29 }
 0x652   : > { %v2311_v37 = vpop.f32.mrf.mxu0  ;;  %v2424_v11 = vpop.f32.mrf.mxu1 }
 0x653   : > { %v2492_v2 = vmul.f32 %v2311_v37, %v4269_v63  ;;  %v4502_v20 = vmul.f32 %v2424_v11, %v4271_v30 }
 0x654   : > { %v2313_v51 = vpop.f32.mrf.mxu0  ;;  %v2426_v5 = vpop.f32.mrf.mxu1 }
 0x655   : > { %v2495_v27 = vmul.f32 %v2313_v51, %v4273_v35  ;;  %v4498_v15 = vmul.f32 %v2426_v5, %v4275_v39 }
 0x656   : > { %v2315_v61 = vpop.f32.mrf.mxu0  ;;  %v2428_v8 = vpop.f32.mrf.mxu1 }
 0x657   : > { %v2547_v36 = vpack.c.bf16 %v2495_v27, %v2491_v9  ;;  %v2496_v4 = vmul.f32 %v2315_v61, %v4277_v40  ;;  %v4508_v29 = vmul.f32 %v2428_v8, %v4279_v44  ;;  %v4677_v44 = vld [vmem:[#allocation2_spill] sm:$0xff]  ;;  %v4678_v61 = vld [vmem:[#allocation3_spill] sm:$0xff] }
 0x658   : > { %v2319_v35 = vpop.f32.mrf.mxu0  ;;  %v2432_v22 = vpop.f32.mrf.mxu1 }
 0x659   : > { %v2548_v39 = vpack.c.bf16 %v2496_v4, %v2492_v2  ;;  %v2550_v63 = vpack.c.bf16 %v4508_v29, %v4502_v20  ;;  %v2499_v9 = vmul.f32 %v2319_v35, %v4281_v12  ;;  %v2501_v51 = vmul.f32 %v2432_v22, %v4283_v45  ;;  %v4679_v29 = vld [vmem:[#allocation4_spill] sm:$0xff] }
 0x65a   : > { %v2321_v21 = vpop.f32.mrf.mxu0  ;;  %v2434_v30 = vpop.f32.mrf.mxu1 }
 0x65b   : > { %v2500_v8 = vmul.f32 %v2321_v21, %v4677_v44  ;;  %v2502_v27 = vmul.f32 %v2434_v30, %v4678_v61  ;;  %v4682_v44 = vld [vmem:[#allocation7_spill] sm:$0xff] }
 0x65c   : > { %v2323_v37 = vpop.f32.mrf.mxu0  ;;  %v2436_v11 = vpop.f32.mrf.mxu1  ;;  %v4683_v61 = vld [vmem:[#allocation11_spill] sm:$0xff] }
 0x65d   : > { %v2503_v5 = vmul.f32 %v2323_v37, %v4290_v33  ;;  %v2505_v40 = vmul.f32 %v2436_v11, %v4292_v31  ;;  %v4681_v11 = vld [vmem:[#allocation6_spill] sm:$0xff] }
 0x65e   : > { %v2325_v2 = vpop.f32.mrf.mxu0  ;;  %v2438_v4 = vpop.f32.mrf.mxu1 }
 0x65f   : > { %v2551_v34 = vpack.c.bf16 %v2503_v5, %v2499_v9  ;;  %v2553_v20 = vpack.c.bf16 %v2505_v40, %v2501_v51  ;;  %v2504_v17 = vmul.f32 %v2325_v2, %v4679_v29  ;;  %v2506_v41 = vmul.f32 %v2438_v4, %v4680_v52  ;;  %v4684_v9 = vld [vmem:[#allocation12_spill] sm:$0xff]  ;;  %v4686_v2 = vld [vmem:[#allocation9_spill] sm:$0xff] }
 0x660   : > { %v2329_v43 = vpop.f32.mrf.mxu0  ;;  %v2442_v12 = vpop.f32.mrf.mxu1  ;;  %v4685_v5 = vld [vmem:[#allocation8_spill] sm:$0xff] }
 0x661   : > { %v2552_v35 = vpack.c.bf16 %v2504_v17, %v2500_v8  ;;  %v2554_v45 = vpack.c.bf16 %v2506_v41, %v2502_v27  ;;  %v2507_v21 = vmul.f32 %v2329_v43, %v4681_v11  ;;  %v2509_v30 = vmul.f32 %v2442_v12, %v4682_v44  ;;  %v4687_v8 = vld [vmem:[#allocation13_spill] sm:$0xff] }
 0x662   : > { %v2331_v22 = vpop.f32.mrf.mxu0  ;;  %v2444_v33 = vpop.f32.mrf.mxu1  ;;  %v4689_v12 = vpack.c.bf16 %v4483_v23, %v4473_v10  ;;  %v4720_v10 = vld [vmem:[#allocation16_spill] sm:$0xff]  ;;  %v4722_v23 = vld [vmem:[#allocation17_spill] sm:$0xff] }
 0x663   : > { %v2508_v40 = vmul.f32 %v2331_v22, %v4685_v5  ;;  %v2510_v52 = vmul.f32 %v2444_v33, %v4686_v2  ;;  %v4691_v22 = vpack.c.bf16 %v4451_v3, %v4441_v59  ;;  %v4711_v59 = vld [vmem:[#allocation23_spill] sm:$0xff]  ;;  %v4713_v3 = vld [vmem:[#allocation22_spill] sm:$0xff] }
 0x664   : > { %v2333_v37 = vpop.f32.mrf.mxu0  ;;  %v2446_v31 = vpop.f32.mrf.mxu1 }
 0x665   : > { %v2511_v49 = vmul.f32 %v2333_v37, %v4683_v61  ;;  %v2513_v51 = vmul.f32 %v2446_v31, %v4684_v9 }
 0x666   : > { %v2335_v4 = vpop.f32.mrf.mxu0  ;;  %v2448_v29 = vpop.f32.mrf.mxu1 }
 0x667   : > { %v2555_v17 = vpack.c.bf16 %v2511_v49, %v2507_v21  ;;  %v2557_v41 = vpack.c.bf16 %v2513_v51, %v2509_v30  ;;  %v2512_v27 = vmul.f32 %v2335_v4, %v4687_v8  ;;  %v2514_v55 = vmul.f32 %v2448_v29, %v4688_v32  ;;  %v4726_v51 = vld [vmem:[#allocation10_spill] sm:$0xff] }
 0x668   : > { %v4690_v49 = vpack.c.bf16 %v4467_v18, %v4461_v60  ;;  %v4692_v32 = vpack.c.bf16 %v4435_v14, %v4429_v54  ;;  %v4697_v54 = vpack.c.bf16 %v4355_v25, %v4336_v53  ;;  %v4701_v53 = vpack.c.bf16 %v4498_v15, %v4494_v26  ;;  %v4710_v14 = vld [vmem:[#allocation25_spill] sm:$0xff] }
 0x669   : > { %v2556_v13 = vpack.c.bf16 %v2512_v27, %v2508_v40  ;;  %v2558_v43 = vpack.c.bf16 %v2514_v55, %v2510_v52  ;;  %v4695_v55 = vpack.c.bf16 %v4387_v38, %v4371_v50  ;;  %v4700_v50 = vmov 0   ;;  %v4708_v38 = vld [vmem:[#allocation24_spill] sm:$0xff]  ;;  %v4716_v18 = vld [vmem:[#allocation21_spill] sm:$0xff] }
 0x66a   : > { %v4704_v25 = vpack.c.bf16 %v4454_v58, %v4444_v28  ;;  %v4712_v60 = vpack.c.bf16 %v4710_v14, %v4711_v59  ;;  %v4719_v58 = vld [vmem:[#allocation18_spill] sm:$0xff]  ;;  %v4725_v15 = vmov 0.0   ;;  %v3425_v21 = vmov 1983009808  }
 0x66b   : > { %2559 = vmatprep.subr.bf16.mxu0 %v2556_v13  ;;  %v4696_v13 = vpack.c.bf16 %v4377_v62, %v4365_v47  ;;  %v4705_v62 = vld [vmem:[#allocation27_spill] sm:$0xff]  ;;  %465 = vst.msk [vmem:[%s457_s24] sm:$0x3] %vm464_vm8, %v4725_v15  ;;  %v2648_v44 = vunpack.c.l.s4 %v3425_v21 }
 0x66c   : > { %2560 = vmatpush1.bf16.msra.mxu0 %v2555_v17  ;;  %v4706_v47 = vpack.c.bf16 %v4438_v46, %v4705_v62  ;;  %v4721_v46 = vpack.c.bf16 %v4719_v58, %v4720_v10 }
 0x66d   : > { %2561 = vmatprep.subr.bf16.mxu0 %v2552_v35  ;;  %v2649_v30 = vunpack.c.0.s8 %v2648_v44 }
 0x66f   : > { %v2652_v5 = vsub.s32 %v2649_v30, %v4726_v51 }
 0x670   : > { %2562 = vmatpush1.bf16.msra.mxu0 %v2551_v34  ;;  %v4693_v34 = vpack.c.bf16 %v4419_v48, %v4412_v19  ;;  %v4698_v19 = vpack.c.bf16 %v4345_v57, %v4325_v7  ;;  %v4699_v48 = vmov 1.0|1.0   ;;  %v4702_v7 = vpack.c.bf16 %v4486_v24, %v4476_v6  ;;  %v4714_v6 = vld [vmem:[#allocation20_spill] sm:$0xff]  ;;  %v4723_v24 = vld [vmem:[#allocation15_spill] sm:$0xff] }
 0x671   : > { %2563 = vmatprep.subr.bf16.mxu0 %v2548_v39  ;;  %v4703_v57 = vpack.c.bf16 %v4470_v16, %v4464_v56  ;;  %v4715_v56 = vpack.c.bf16 %v4713_v3, %v4714_v6  ;;  %v4717_v16 = vld [vmem:[#allocation19_spill] sm:$0xff]  ;;  %v4724_v26 = vpack.c.bf16 %v4722_v23, %v4723_v24 }
 0x672   : > { %v4718_v28 = vpack.c.bf16 %v4716_v18, %v4717_v16  ;;  %v2665_v35 = vld [vmem:[%s457_s24] sm:$0x3] }
 0x674   : > { %2564 = vmatpush1.bf16.msra.mxu0 %v2547_v36  ;;  %v4694_v36 = vpack.c.bf16 %v4406_v0, %v4397_v42  ;;  %v4707_v0 = vld [vmem:[#allocation26_spill] sm:$0xff] }
 0x675   : > { %2565 = vmatprep.subr.bf16.mxu0 %v4689_v12  ;;  %v4709_v42 = vpack.c.bf16 %v4707_v0, %v4708_v38 }
 0x678   : > { %2566 = vmatpush1.bf16.msra.mxu0 %v4690_v49 }
 0x679   : > { %2567 = vmatprep.subr.bf16.mxu0 %v4691_v22 }
 0x67c   : > { %2568 = vmatpush1.bf16.msra.mxu0 %v4692_v32 }
 0x67d   : > { %2569 = vmatprep.subr.bf16.mxu0 %v4693_v34 }
 0x680   : > { %2570 = vmatpush1.bf16.msra.mxu0 %v4694_v36 }
 0x681   : > { %2571 = vmatprep.subr.bf16.mxu0 %v4695_v55 }
 0x684   : > { %2572 = vmatpush1.bf16.msra.mxu0 %v4696_v13 }
 0x685   : > { %2573 = vmatprep.subr.bf16.mxu0 %v4697_v54 }
 0x688   : > { %2574 = vmatpush1.bf16.msra.mxu0 %v4698_v19 }
 0x689   : > { %2600 = vmatprep.subr.bf16.mxu0 %v2558_v43 }
 0x68b   : > { %3014 = vmatmul.mubr.msk.bf16.vlgmr.msra.gmra.mxu0 %vm4330_vm6, %v4699_v48 }
 0x68c   : > { %2601 = vmatpush1.bf16.msra.mxu0 %v2557_v41  ;;  %2632 = vmatprep.mubr.bf16.mxu0 %v4700_v50 }
 0x68d   : > { %2602 = vmatprep.subr.bf16.mxu0 %v2554_v45 }
 0x690   : > { %2603 = vmatpush1.bf16.msra.mxu0 %v2553_v20 }
 0x691   : > { %2604 = vmatprep.subr.bf16.mxu0 %v2550_v63 }
 0x694   : > { %2605 = vmatpush1.bf16.msra.mxu0 %v4701_v53 }
 0x695   : > { %2606 = vmatprep.subr.bf16.mxu0 %v4702_v7 }
 0x698   : > { %2607 = vmatpush1.bf16.msra.mxu0 %v4703_v57 }
 0x699   : > { %2608 = vmatprep.subr.bf16.mxu0 %v4704_v25 }
 0x69c   : > { %2609 = vmatpush1.bf16.msra.mxu0 %v4706_v47 }
 0x69d   : > { %2610 = vmatprep.subr.bf16.mxu0 %v4709_v42 }
 0x6a0   : > { %2611 = vmatpush1.bf16.msra.mxu0 %v4712_v60 }
 0x6a1   : > { %2612 = vmatprep.subr.bf16.mxu0 %v4715_v56 }
 0x6a4   : > { %2613 = vmatpush1.bf16.msra.mxu0 %v4718_v28 }
 0x6a5   : > { %2614 = vmatprep.subr.bf16.mxu0 %v4721_v46 }
 0x6a8   : > { %2615 = vmatpush1.bf16.msra.mxu0 %v4724_v26 }
 0x6ab   : > { %3016 = vmatmul.mubr.msk.bf16.vlgmr.msra.gmra.mxu0 %vm4330_vm6, %v4699_v48 }
 0x6ea   : > { %v2708_v39 = vpop.f32.mrf.mxu1 }
 0x6eb   : > { %v2714_v33 = vadd.f32 %v2708_v39, %v2665_v35 }
 0x6ec   : > { %v3224_v63 = vpop.f32.mrf.mxu1 }
 0x6ed   : > { %2716 = vst.msk [vmem:[%s457_s24] sm:$0x3] %vm464_vm8, %v2714_v33 }
 0x6ee   : > { %v2711_v20 = vpop.f32.mrf.mxu1 }
 0x6f0   : > { %v3225_v45 = vpop.f32.mrf.mxu1 }
 0x74b   : > { %v2593_v37 = vpop.f32.mrf.mxu0 }
 0x74d   : > { %v2595_v31 = vpop.f32.mrf.mxu0 }
 0x74e   : > { %v2645_v9 = vcombine.low %v2593_v37, %v2595_v31 }
 0x74f   : > { %v2597_v1 = vpop.f32.mrf.mxu0 }
 0x750   : > { %v2653_v4 = vrot.slane %v2645_v9, %v2652_v5 }
 0x751   : > { %v2598_v11 = vpop.f32.mrf.mxu0 }
 0x76b   : > { %v2634_v61 = vpop.f32.mrf.mxu0 }
 0x76d   : > { %v2636_v40 = vpop.f32.mrf.mxu0 }
 0x76e   : > { %v2646_v2 = vcombine.low %v2634_v61, %v2636_v40 }
 0x76f   : > { %v2638_v52 = vpop.f32.mrf.mxu0 }
 0x770   : > { %v2660_v29 = vrot.slane %v2646_v2, %v2652_v5 }
 0x771   : > { %v2639_v17 = vpop.f32.mrf.mxu0 }
 0x772   : > { %v2661_v41 = vcombine.low %v2653_v4, %v2660_v29 }
 0x774   : > { %2664 = vst [vmem:[%s453_s29] sm:$0xff] %v2661_v41 }
 0x775 PF: > { %s22_s19 = sadd.s32 1, %s3415_s19   ;;  %s4727_s17 = smov %s3411_s18 }
 0x776   : > { %p19_p6 = scmp.ge.s32.totalorder %s22_s19, 4   ;;  %s4728_s18 = smov %s4730_s20 }
 0x778   :  { %21 = sbr.rel (!%p19_p6) target bundleno = 2 (0x2), region = 117 }

// kernel: att_message_forward.3
= control target key start
LH: loop header
LB: loop body
LE: loop exit
PB: predicated region body
PF: predicated region fallthrough
CT: control target
= control target key end

     0   :  { %s3275_s17 = smov 0   ;;  %s4060_s0 = inlined_call_operand.vmem [shape: bf16[256,64], index: 0, kind: input, shape index: {}]   ;;  %s4061_s1 = inlined_call_operand.vmem [shape: s32[256,1], index: 1, kind: input, shape index: {}]   ;;  %s4062_s2 = inlined_call_operand.vmem [shape: bf16[2,512], index: 2, kind: input, shape index: {}]   ;;  %s4063_s3 = inlined_call_operand.vmem [shape: bf16[2,64], index: 3, kind: input, shape index: {}]   ;;  %s4064_s4 = inlined_call_operand.vmem [shape: f32[64,8], index: 4, kind: input, shape index: {}]   ;;  %s4065_s5 = inlined_call_operand.vmem [shape: f32[8,64], index: 5, kind: input, shape index: {}]   ;;  %s4066_s6 = inlined_call_operand.vmem [shape: bf16[64,512], index: 6, kind: input, shape index: {}]   ;;  %s4067_s7 = inlined_call_operand.vmem [shape: bf16[512,64], index: 7, kind: input, shape index: {}]   ;;  %s4068_s8 = inlined_call_operand.vmem [shape: bf16[64,32], index: 8, kind: input, shape index: {}]   ;;  %s4069_s9 = inlined_call_operand.vmem [shape: f32[1,32], index: 9, kind: input, shape index: {}]   ;;  %s4070_s10 = inlined_call_operand.vmem [shape: f32[1,32], index: 10, kind: input, shape index: {}]   ;;  %s4071_s11 = inlined_call_operand.vmem [shape: f32[256,32], index: 11, kind: output, shape index: {}]  }
   0x1 LB: > { %s2595_s18 = sadd.s32 4294967295, %s3210_s17   ;;  %p2599_p0 = scmp.ge.s32.totalorder %s3210_s17, 1  ;;  %s3210_s17 = sphi %s3275_s17, %s21_s17  }
   0x2   : > { %p349_p1 = scmp.lt.s32.totalorder %s3210_s17, 3 }
   0x4   : > { %p350_p2 = pnand %p2599_p0, %p349_p1 }
   0x6   : > { %353 = sbr.rel (%p350_p2) target bundleno = 1432 (0x598), region = 64 }
   0xb   : > { %s2600_s19 = sshll.u32 %s2595_s18, 4  ;;  %v445_v0 = vlaneseq  ;;  %v4086_v1 = vmov 0   ;;  %v3213_v2 = vmov 1966171168   ;;  %vm593_vm0 = vcmask 1040384   ;;  %v981_v33 = vld [vmem:[%s4064_s4 + $0x38] sm:$0xff] }
   0xc   : > { %3111 = vset.pattern.permute.xlu1 %v4086_v1  ;;  %3110 = vset.pattern.permute.xlu0 %v4086_v1  ;;  %p395_p3 = scmp.lt.s32.totalorder %s2600_s19, 31  ;;  %v705_v3 = vunpack.c.l.s4 %v3213_v2  ;;  %v2630_v5 = vld.sshfl [vmem:[%s4062_s2] sm:$0x33 pattern:$0x75316420]  ;;  %vm568_vm5 = vcmask 15360  }
   0xd   : > { %v708_v4 = vshrl.u32 %v445_v0, 7  ;;  %764 = vmatprep.mubr.bf16.mxu1 %v4086_v1  ;;  %v703_v7 = vcombine.high %v2630_v5, %v2630_v5  ;;  %v567_v18 = vld [vmem:[%s4063_s3] sm:$0x1]  ;;  %v3329_v34 = vand.u32 127, %v445_v0  ;;  %v3214_v39 = vmov 0.0   ;;  %v980_v48 = vld [vmem:[%s4064_s4 + $0x30] sm:$0xff] }
   0xe   : > { %s4152_s19 = smov (!%p395_p3, %s2600_s19), 31  ;;  %v706_v6 = vunpack.c.0.s8 %v705_v3  ;;  %3098 = vmatprep.subr.msk.bf16.mxu0 %vm593_vm0, %v567_v18  ;;  %v595_v20 = vsel %vm593_vm0, %v567_v18, 0  ;;  %v979_v52 = vld [vmem:[%s4064_s4 + $0x28] sm:$0xff]  ;;  %v978_v55 = vld [vmem:[%s4064_s4 + $0x20] sm:$0xff]  ;;  %v977_v61 = vld [vmem:[%s4064_s4 + $0x18] sm:$0xff] }
   0xf   : > { %s2603_s22 = sshll.u32 %s4152_s19, 3  ;;  %2991 = vmatpush3.bf16.msra.mxu0 %v595_v20  ;;  %v976_v2 = vld [vmem:[%s4064_s4 + $0x10] sm:$0xff]  ;;  %v1208_v20 = vld [vmem:[%s4065_s5] sm:$0xff]  ;;  %s2601_s30 = sshll.u32 %s4152_s19, 2 }
  0x10   : > { %v709_v8 = vsub.s32 %v706_v6, %v708_v4  ;;  %s3298_s25 = scalar_lea.vmem %s4061_s1, %s2603_s22  ;;  %s3450_s14 = scalar_lea.vmem %s4060_s0, %s2601_s30 }
  0x11   : > { %v449_v9 = vld [vmem:[%s3298_s25 + $0x10] sm:$0xff]  ;;  %v447_v10 = vld [vmem:[%s3298_s25] sm:$0xff]  ;;  %v450_v13 = vld [vmem:[%s3298_s25 + $0x18] sm:$0xff]  ;;  %s3992_s13 = scalar_lea.vmem %s4071_s11, %s2603_s22 }
  0x12   : > { %v717_v11 = vrot.slane %v703_v7, %v709_v8  ;;  %v710_v12 = vrot.slane %v2630_v5, %v709_v8  ;;  %470 = vperm.xlu1 %3111, %v449_v9   ;;  %464 = vperm.xlu0 %3110, %v447_v10   ;;  %v448_v14 = vld [vmem:[%s3298_s25 + $0x8] sm:$0xff]  ;;  %v451_v19 = vld [vmem:[%s3298_s25 + $0x20] sm:$0xff]  ;;  %v454_v21 = vld [vmem:[%s3298_s25 + $0x38] sm:$0xff] }
  0x13   : > { %v452_v17 = vld [vmem:[%s3298_s25 + $0x28] sm:$0xff]  ;;  %v453_v22 = vld [vmem:[%s3298_s25 + $0x30] sm:$0xff]  ;;  %v455_v24 = vld [vmem:[%s3298_s25 + $0x40] sm:$0xff] }
  0x14   : > { %2631 = vmatprep.subr.msk.bf16.mxu1 %vm593_vm0, %v717_v11  ;;  %v721_v15 = vsel %vm593_vm0, %v710_v12, 0  ;;  %v719_v16 = vcombine.high %v717_v11, %v717_v11  ;;  %v456_v23 = vld [vmem:[%s3298_s25 + $0x48] sm:$0xff]  ;;  %v458_v25 = vld [vmem:[%s3298_s25 + $0x58] sm:$0xff]  ;;  %v457_v26 = vld [vmem:[%s3298_s25 + $0x50] sm:$0xff]  ;;  %v718_v31 = vcombine.high %v710_v12, %v710_v12 }
  0x15   : > { %747 = vmatpush1.bf16.msra.mxu1 %v721_v15  ;;  %v460_v27 = vld [vmem:[%s3298_s25 + $0x68] sm:$0xff]  ;;  %v459_v28 = vld [vmem:[%s3298_s25 + $0x60] sm:$0xff]  ;;  %v462_v29 = vld [vmem:[%s3298_s25 + $0x78] sm:$0xff] }
  0x16   : > { %473 = vperm.xlu1 %3111, %v450_v13   ;;  %467 = vperm.xlu0 %3110, %v448_v14   ;;  %v461_v30 = vld [vmem:[%s3298_s25 + $0x70] sm:$0xff]  ;;  %v727_v32 = vsel %vm593_vm0, %v718_v31, 0  ;;  %v975_v5 = vld [vmem:[%s4064_s4 + $0x8] sm:$0xff] }
  0x17   : > { %2640 = vmatprep.subr.msk.bf16.mxu0 %vm593_vm0, %v719_v16  ;;  %3008 = vmatprep.subr.mxu1 %v981_v33 }
  0x1a   : > { %479 = vperm.xlu1 %3111, %v452_v17   ;;  %476 = vperm.xlu0 %3110, %v451_v19   ;;  %v974_v19 = vld [vmem:[%s4064_s4] sm:$0xff] }
  0x1e   : > { %485 = vperm.xlu1 %3111, %v454_v21   ;;  %482 = vperm.xlu0 %3110, %v453_v22   ;;  %v3453_v21 = vld [vmem:[%s3450_s14] sm:$0xff]  }
  0x1f   : > { %v4088_v22 = vunpack.c.l.bf16 %v3453_v21 }
  0x22   : > { %491 = vperm.xlu1 %3111, %v456_v23   ;;  %488 = vperm.xlu0 %3110, %v455_v24   ;;  %v3457_v24 = vld [vmem:[%s3450_s14 + $0x8] sm:$0xff]  }
  0x26   : > { %497 = vperm.xlu1 %3111, %v458_v25   ;;  %494 = vperm.xlu0 %3110, %v457_v26  }
  0x2a   : > { %503 = vperm.xlu1 %3111, %v460_v27   ;;  %500 = vperm.xlu0 %3110, %v459_v28   ;;  %v4089_v27 = vunpack.c.h.bf16 %v3453_v21  ;;  %v4085_v28 = vunpack.c.l.bf16 %v3457_v24 }
  0x2e   : > { %509 = vperm.xlu1 %3111, %v462_v29   ;;  %506 = vperm.xlu0 %3110, %v461_v30   ;;  %v3464_v30 = vld [vmem:[%s3450_s14 + $0x10] sm:$0xff]  }
  0x8d   : > { %v471_v35 = vpop.permute.xlu1 %470  ;;  %v465_v36 = vpop.permute.xlu0 %464 }
  0x8e   : > { %vm513_vm1 = vcmp.eq.s32.totalorder %v3329_v34, %v471_v35  ;;  %vm511_vm2 = vcmp.eq.s32.totalorder %v3329_v34, %v465_v36 }
  0x8f   : > { %v2608_v40 = vsel %vm513_vm1, 1.0, %v3214_v39  ;;  %v2606_v41 = vsel %vm511_vm2, 1.0, %v3214_v39  ;;  %vm982_vm2 = vcmask 523264  }
  0x91   : > { %v474_v37 = vpop.permute.xlu1 %473  ;;  %v468_v38 = vpop.permute.xlu0 %467 }
  0x92   : > { %vm514_vm3 = vcmp.eq.s32.totalorder %v3329_v34, %v474_v37  ;;  %vm512_vm4 = vcmp.eq.s32.totalorder %v3329_v34, %v468_v38  ;;  %v3474_v37 = vld [vmem:[%s3450_s14 + $0x18] sm:$0xff]  }
  0x93   : > { %v2609_v42 = vsel %vm514_vm3, 1.0, %v3214_v39  ;;  %v2607_v43 = vsel %vm512_vm4, 1.0, %v3214_v39  ;;  %vm1209_vm3 = vcmask 64512   ;;  %vm2510_vm4 = vcmask 261120  }
  0x94   : > { %v3339_v44 = vpack.c.bf16 %v2609_v42, %v2608_v40  ;;  %v3341_v45 = vpack.c.bf16 %v2607_v43, %v2606_v41  ;;  %v4082_v41 = vunpack.c.h.bf16 %v3464_v30  ;;  %v4081_v42 = vunpack.c.l.bf16 %v3474_v37 }
  0x95   : > { %v480_v46 = vpop.permute.xlu1 %479  ;;  %v477_v47 = vpop.permute.xlu0 %476 }
  0x96   : > { %vm516_vm6 = vcmp.eq.s32.totalorder %v3329_v34, %v480_v46  ;;  %vm515_vm7 = vcmp.eq.s32.totalorder %v3329_v34, %v477_v47  ;;  %2992 = vmatprep.mubr.msk.bf16.mxu0 %vm568_vm5, %v3341_v45  ;;  %2632 = vmatmul.mubr.msk.bf16.vlgmr.msra.gmra.mxu1 %vm568_vm5, %v3341_v45  ;;  %v4080_v46 = vunpack.c.h.bf16 %v3474_v37 }
  0x97   : > { %v2611_v49 = vsel %vm516_vm6, 1.0, %v3214_v39  ;;  %v2610_v50 = vsel %vm515_vm7, 1.0, %v3214_v39  ;;  %2993 = vmatmul.mubr.msk.bf16.vlgmr.msra.gmra.mxu0 %vm568_vm5, %v3339_v44  ;;  %774 = vmatprep.mubr.bf16.mxu1 %v4086_v1 }
  0x98   : > { %v3357_v51 = vpack.c.bf16 %v2611_v49, %v2610_v50  ;;  %860 = vmatpush1.bf16.msra.mxu0 %v727_v32  ;;  %3009 = vmatpush3.msra.mxu1 %v981_v33  ;;  %v4084_v32 = vunpack.c.h.bf16 %v3457_v24 }
  0x99   : > { %v486_v53 = vpop.permute.xlu1 %485  ;;  %v483_v54 = vpop.permute.xlu0 %482  ;;  %3010 = vmatprep.subr.mxu1 %v980_v48  ;;  %3048 = vmatprep.subr.mxu0 %v1208_v20 }
  0x9a   : > { %vm518_vm8 = vcmp.eq.s32.totalorder %v3329_v34, %v486_v53  ;;  %vm517_vm9 = vcmp.eq.s32.totalorder %v3329_v34, %v483_v54  ;;  %2996 = vmatprep.mubr.msk.bf16.mxu0 %vm568_vm5, %v3357_v51  ;;  %3011 = vmatpush3.msra.mxu1 %v980_v48 }
  0x9b   : > { %v2613_v56 = vsel %vm518_vm8, 1.0, %v3214_v39  ;;  %v2612_v57 = vsel %vm517_vm9, 1.0, %v3214_v39  ;;  %3012 = vmatprep.subr.mxu1 %v979_v52 }
  0x9c   : > { %v3371_v58 = vpack.c.bf16 %v2613_v56, %v2612_v57  ;;  %3013 = vmatpush3.msra.mxu1 %v979_v52 }
  0x9d   : > { %v492_v59 = vpop.permute.xlu1 %491  ;;  %v489_v60 = vpop.permute.xlu0 %488  ;;  %3014 = vmatprep.subr.mxu1 %v978_v55 }
  0x9e   : > { %vm520_vm10 = vcmp.eq.s32.totalorder %v3329_v34, %v492_v59  ;;  %vm519_vm11 = vcmp.eq.s32.totalorder %v3329_v34, %v489_v60  ;;  %2633 = vmatmul.mubr.msk.bf16.gmra.mxu1 %vm568_vm5, %v3339_v44 }
  0x9f   : > { %v2615_v62 = vsel %vm520_vm10, 1.0, %v3214_v39  ;;  %v2614_v63 = vsel %vm519_vm11, 1.0, %v3214_v39  ;;  %2997 = vmatmul.mubr.msk.bf16.gmra.mxu0 %vm568_vm5, %v3371_v58  ;;  %784 = vmatprep.mubr.bf16.mxu1 %v4086_v1 }
  0xa0   : > { %v563_v0 = vpack.c.bf16 %v2615_v62, %v2614_v63  ;;  %3015 = vmatpush3.msra.mxu1 %v978_v55 }
  0xa1   : > { %v498_v3 = vpop.permute.xlu1 %497  ;;  %v495_v4 = vpop.permute.xlu0 %494  ;;  %3016 = vmatprep.subr.mxu1 %v977_v61 }
  0xa2   : > { %vm522_vm12 = vcmp.eq.s32.totalorder %v3329_v34, %v498_v3  ;;  %vm521_vm13 = vcmp.eq.s32.totalorder %v3329_v34, %v495_v4  ;;  %3000 = vmatprep.mubr.msk.bf16.mxu0 %vm568_vm5, %v563_v0  ;;  %3017 = vmatpush3.msra.mxu1 %v977_v61 }
  0xa3   : > { %v2617_v6 = vsel %vm522_vm12, 1.0, %v3214_v39  ;;  %v2616_v7 = vsel %vm521_vm13, 1.0, %v3214_v39  ;;  %3018 = vmatprep.subr.mxu1 %v976_v2 }
  0xa4   : > { %v564_v8 = vpack.c.bf16 %v2617_v6, %v2616_v7  ;;  %3019 = vmatpush3.msra.mxu1 %v976_v2  ;;  %v3518_v2 = vld [vmem:[%s3450_s14 + $0x38] sm:$0xff]  }
  0xa5   : > { %v504_v9 = vpop.permute.xlu1 %503  ;;  %v501_v10 = vpop.permute.xlu0 %500  ;;  %3020 = vmatprep.subr.mxu1 %v975_v5  ;;  %v4073_v7 = vunpack.c.l.bf16 %v3518_v2 }
  0xa6   : > { %vm524_vm14 = vcmp.eq.s32.totalorder %v3329_v34, %v504_v9  ;;  %vm523_vm15 = vcmp.eq.s32.totalorder %v3329_v34, %v501_v10  ;;  %2634 = vmatmul.mubr.msk.bf16.gmra.mxu1 %vm568_vm5, %v3357_v51  ;;  %v4072_v10 = vunpack.c.h.bf16 %v3518_v2 }
  0xa7   : > { %v2619_v11 = vsel %vm524_vm14, 1.0, %v3214_v39  ;;  %v2618_v12 = vsel %vm523_vm15, 1.0, %v3214_v39  ;;  %3001 = vmatmul.mubr.msk.bf16.gmra.mxu0 %vm568_vm5, %v564_v8  ;;  %794 = vmatprep.mubr.bf16.mxu1 %v4086_v1 }
  0xa8   : > { %v565_v13 = vpack.c.bf16 %v2619_v11, %v2618_v12  ;;  %3021 = vmatpush3.msra.mxu1 %v975_v5 }
  0xa9   : > { %v510_v14 = vpop.permute.xlu1 %509  ;;  %v507_v15 = vpop.permute.xlu0 %506  ;;  %3022 = vmatprep.subr.mxu1 %v974_v19 }
  0xaa   : > { %vm526_vm0 = vcmp.eq.s32.totalorder %v3329_v34, %v510_v14  ;;  %vm525_vm1 = vcmp.eq.s32.totalorder %v3329_v34, %v507_v15  ;;  %3004 = vmatprep.mubr.msk.bf16.mxu0 %vm568_vm5, %v565_v13  ;;  %3023 = vmatpush3.msra.mxu1 %v974_v19  ;;  %v4083_v34 = vunpack.c.l.bf16 %v3464_v30 }
  0xab   : > { %v2621_v16 = vsel %vm526_vm0, 1.0, %v3214_v39  ;;  %v2620_v17 = vsel %vm525_vm1, 1.0, %v3214_v39 }
  0xac   : > { %v566_v18 = vpack.c.bf16 %v2621_v16, %v2620_v17 }
  0xae   : > { %2635 = vmatmul.mubr.msk.bf16.gmra.mxu1 %vm568_vm5, %v3371_v58 }
  0xaf   : > { %3005 = vmatmul.mubr.msk.bf16.gmra.mxu0 %vm568_vm5, %v566_v18  ;;  %804 = vmatprep.mubr.bf16.mxu1 %v4086_v1 }
  0xb0   : > { %877 = vmatprep.mubr.bf16.mxu0 %v4086_v1 }
  0xb6   : > { %2636 = vmatmul.mubr.msk.bf16.gmra.mxu1 %vm568_vm5, %v563_v0 }
  0xb7   : > { %2641 = vmatmul.mubr.msk.bf16.vlgmr.msra.gmra.mxu0 %vm568_vm5, %v3341_v45  ;;  %814 = vmatprep.mubr.bf16.mxu1 %v4086_v1 }
  0xb8   : > { %887 = vmatprep.mubr.bf16.mxu0 %v4086_v1  ;;  %3049 = vmatpush3.msra.mxu0 %v1208_v20 }
  0xbe   : > { %2637 = vmatmul.mubr.msk.bf16.gmra.mxu1 %vm568_vm5, %v564_v8 }
  0xbf   : > { %2642 = vmatmul.mubr.msk.bf16.gmra.mxu0 %vm568_vm5, %v3339_v44  ;;  %824 = vmatprep.mubr.bf16.mxu1 %v4086_v1  ;;  %v3485_v44 = vld [vmem:[%s3450_s14 + $0x20] sm:$0xff]  }
  0xc0   : > { %897 = vmatprep.mubr.bf16.mxu0 %v4086_v1  ;;  %v4079_v48 = vunpack.c.l.bf16 %v3485_v44  ;;  %v4078_v55 = vunpack.c.h.bf16 %v3485_v44 }
  0xc6   : > { %2638 = vmatmul.mubr.msk.bf16.gmra.mxu1 %vm568_vm5, %v565_v13 }
  0xc7   : > { %2643 = vmatmul.mubr.msk.bf16.gmra.mxu0 %vm568_vm5, %v3357_v51  ;;  %834 = vmatprep.mubr.bf16.mxu1 %v4086_v1  ;;  %v3496_v51 = vld [vmem:[%s3450_s14 + $0x28] sm:$0xff]  }
  0xc8   : > { %907 = vmatprep.mubr.bf16.mxu0 %v4086_v1  ;;  %v4077_v56 = vunpack.c.l.bf16 %v3496_v51  ;;  %v4076_v60 = vunpack.c.h.bf16 %v3496_v51 }
  0xce   : > { %2639 = vmatmul.mubr.msk.bf16.gmra.mxu1 %vm568_vm5, %v566_v18 }
  0xcf   : > { %2644 = vmatmul.mubr.msk.bf16.gmra.mxu0 %vm568_vm5, %v3371_v58  ;;  %v3507_v58 = vld [vmem:[%s3450_s14 + $0x30] sm:$0xff]  }
  0xd0   : > { %917 = vmatprep.mubr.bf16.mxu0 %v4086_v1  ;;  %v4075_v62 = vunpack.c.l.bf16 %v3507_v58  ;;  %v4074_v6 = vunpack.c.h.bf16 %v3507_v58 }
  0xd7   : > { %2645 = vmatmul.mubr.msk.bf16.gmra.mxu0 %vm568_vm5, %v563_v0 }
  0xd8   : > { %927 = vmatprep.mubr.bf16.mxu0 %v4086_v1 }
  0xdf   : > { %2646 = vmatmul.mubr.msk.bf16.gmra.mxu0 %vm568_vm5, %v564_v8 }
  0xe0   : > { %937 = vmatprep.mubr.bf16.mxu0 %v4086_v1 }
  0xe7   : > { %2647 = vmatmul.mubr.msk.bf16.gmra.mxu0 %vm568_vm5, %v565_v13 }
  0xe8   : > { %947 = vmatprep.mubr.bf16.mxu0 %v4086_v1 }
  0xef   : > { %2648 = vmatmul.mubr.msk.bf16.gmra.mxu0 %vm568_vm5, %v566_v18 }
 0x156   : > { %v3541_v14 = vpop.f32.mrf.mxu1 }
 0x157   : > { %v2994_v23 = vpop.f32.mrf.mxu0 }
 0x158   : > { %v960_v35 = vmul.f32 %v2994_v23, %v4085_v28  ;;  %v3543_v15 = vpop.f32.mrf.mxu1 }
 0x159   : > { %v631_v25 = vpop.f32.mrf.mxu0 }
 0x15a   : > { %v958_v26 = vmul.f32 %v4088_v22, %v631_v25  ;;  %v3545_v16 = vpop.f32.mrf.mxu1 }
 0x15b   : > { %v2995_v29 = vpop.f32.mrf.mxu0 }
 0x15c   : > { %3024 = vmatprep.mubr.msk.f32.mxu1 %vm982_vm2, %v958_v26  ;;  %v961_v39 = vmul.f32 %v2995_v29, %v4084_v32  ;;  %v3547_v17 = vpop.f32.mrf.mxu1 }
 0x15d   : > { %v634_v31 = vpop.f32.mrf.mxu0 }
 0x15e   : > { %v959_v33 = vmul.f32 %v4089_v27, %v634_v31  ;;  %v3549_v18 = vpop.f32.mrf.mxu1 }
 0x15f   : > { %v2998_v36 = vpop.f32.mrf.mxu0 }
 0x160   : > { %3025 = vmatmul.mubr.msk.f32.vlgmr.msra.gmra.mxu1 %vm982_vm2, %v959_v33  ;;  %v964_v49 = vmul.f32 %v2998_v36, %v4081_v42  ;;  %v3551_v19 = vpop.f32.mrf.mxu1  ;;  %v3112_v33 = vld [vmem:[%s4066_s6 + $0x60] ss:$16 sps:$4 sm:$0xff]   ;;  %v3117_v36 = vld [vmem:[%s4066_s6 + $0x6c] ss:$16 sps:$4 sm:$0xff]  }
 0x161   : > { %v647_v38 = vpop.f32.mrf.mxu0  ;;  %3027 = vmatprep.mubr.msk.f32.mxu1 %vm982_vm2, %v960_v35  ;;  %v3114_v35 = vld [vmem:[%s4066_s6 + $0x64] ss:$16 sps:$4 sm:$0xff]   ;;  %1668 = vmatprep.subr.bf16.mxu0 %v3117_v36  ;;  %v3136_v42 = vld [vmem:[%s4067_s7 + $0x78] sm:$0xff]  }
 0x162   : > { %v962_v40 = vmul.f32 %v4083_v34, %v647_v38  ;;  %v3553_v20 = vpop.f32.mrf.mxu1  ;;  %v3120_v38 = vld [vmem:[%s4066_s6 + $0x44] ss:$16 sps:$4 sm:$0xff]   ;;  %1555 = vmatprep.subr.bf16.mxu1 %v3114_v35 }
 0x163   : > { %v2999_v43 = vpop.f32.mrf.mxu0  ;;  %1556 = vmatpush1.bf16.msra.mxu1 %v3112_v33 }
 0x164   : > { %3028 = vmatmul.mubr.msk.f32.gmra.mxu1 %vm982_vm2, %v961_v39  ;;  %v965_v53 = vmul.f32 %v2999_v43, %v4080_v46  ;;  %v3555_v23 = vpop.f32.mrf.mxu1  ;;  %1557 = vmatprep.subr.bf16.mxu1 %v3120_v38  ;;  %v3126_v43 = vld [vmem:[%s4066_s6 + $0x24] ss:$16 sps:$4 sm:$0xff]  }
 0x165   : > { %v650_v45 = vpop.f32.mrf.mxu0  ;;  %3030 = vmatprep.mubr.msk.f32.mxu1 %vm982_vm2, %v962_v40  ;;  %v3118_v40 = vld [vmem:[%s4066_s6 + $0x40] ss:$16 sps:$4 sm:$0xff]  }
 0x166   : > { %v963_v47 = vmul.f32 %v4082_v41, %v650_v45  ;;  %v3557_v25 = vpop.f32.mrf.mxu1  ;;  %v3137_v41 = vld [vmem:[%s4067_s7 + $0xf8] sm:$0xff]  }
 0x167   : > { %v3002_v50 = vpop.f32.mrf.mxu0  ;;  %1558 = vmatpush1.bf16.msra.mxu1 %v3118_v40 }
 0x168   : > { %3031 = vmatmul.mubr.msk.f32.gmra.mxu1 %vm982_vm2, %v963_v47  ;;  %v968_v63 = vmul.f32 %v3002_v50, %v4077_v56  ;;  %v3559_v26 = vpop.f32.mrf.mxu1  ;;  %v3124_v47 = vld [vmem:[%s4066_s6 + $0x20] ss:$16 sps:$4 sm:$0xff]   ;;  %1559 = vmatprep.subr.bf16.mxu1 %v3126_v43 }
 0x169   : > { %v663_v52 = vpop.f32.mrf.mxu0  ;;  %3033 = vmatprep.mubr.msk.f32.mxu1 %vm982_vm2, %v964_v49  ;;  %v3132_v49 = vld [vmem:[%s4066_s6 + $0x4] ss:$16 sps:$4 sm:$0xff]  }
 0x16a   : > { %v966_v54 = vmul.f32 %v4079_v48, %v663_v52  ;;  %v3561_v29 = vpop.f32.mrf.mxu1  ;;  %v3130_v52 = vld [vmem:[%s4066_s6] ss:$16 sps:$4 sm:$0xff]  }
 0x16b   : > { %v3003_v57 = vpop.f32.mrf.mxu0  ;;  %1560 = vmatpush1.bf16.msra.mxu1 %v3124_v47 }
 0x16c   : > { %3034 = vmatmul.mubr.msk.f32.gmra.mxu1 %vm982_vm2, %v965_v53  ;;  %v969_v4 = vmul.f32 %v3003_v57, %v4076_v60  ;;  %v3563_v31 = vpop.f32.mrf.mxu1  ;;  %1561 = vmatprep.subr.bf16.mxu1 %v3132_v49 }
 0x16d   : > { %v666_v59 = vpop.f32.mrf.mxu0  ;;  %3036 = vmatprep.mubr.msk.f32.mxu1 %vm982_vm2, %v966_v54 }
 0x16e   : > { %v967_v61 = vmul.f32 %v4078_v55, %v666_v59  ;;  %v3577_v39 = vpop.f32.mrf.mxu1 }
 0x16f   : > { %v3006_v0 = vpop.f32.mrf.mxu0  ;;  %1562 = vmatpush1.bf16.msra.mxu1 %v3130_v52 }
 0x170   : > { %3037 = vmatmul.mubr.msk.f32.gmra.mxu1 %vm982_vm2, %v967_v61  ;;  %v972_v12 = vmul.f32 %v3006_v0, %v4073_v7  ;;  %v3585_v45 = vpop.f32.mrf.mxu1  ;;  %2850 = vmatprep.subr.bf16.mxu1 %v3136_v42 }
 0x171   : > { %v679_v3 = vpop.f32.mrf.mxu0  ;;  %3039 = vmatprep.mubr.msk.f32.mxu1 %vm982_vm2, %v968_v63 }
 0x172   : > { %v970_v5 = vmul.f32 %v4075_v62, %v679_v3  ;;  %v3593_v50 = vpop.f32.mrf.mxu1 }
 0x173   : > { %v3007_v8 = vpop.f32.mrf.mxu0 }
 0x174   : > { %3040 = vmatmul.mubr.msk.f32.gmra.mxu1 %vm982_vm2, %v969_v4  ;;  %v973_v13 = vmul.f32 %v3007_v8, %v4072_v10  ;;  %v3598_v53 = vpop.f32.mrf.mxu1 }
 0x175   : > { %v682_v9 = vpop.f32.mrf.mxu0  ;;  %3042 = vmatprep.mubr.msk.f32.mxu1 %vm982_vm2, %v970_v5 }
 0x176   : > { %v971_v11 = vmul.f32 %v4074_v6, %v682_v9  ;;  %v3600_v54 = vpop.f32.mrf.mxu1 }
 0x178   : > { %3043 = vmatmul.mubr.msk.f32.gmra.mxu1 %vm982_vm2, %v971_v11  ;;  %v3602_v57 = vpop.f32.mrf.mxu1 }
 0x179   : > { %3045 = vmatprep.mubr.msk.f32.mxu1 %vm982_vm2, %v972_v12 }
 0x17a   : > { %v3604_v59 = vpop.f32.mrf.mxu1 }
 0x17c   : > { %3046 = vmatmul.mubr.msk.f32.gmra.mxu1 %vm982_vm2, %v973_v13  ;;  %v3606_v61 = vpop.f32.mrf.mxu1 }
 0x17d   : > { %1579 = vmatprep.mubr.bf16.mxu1 %v4086_v1 }
 0x17e   : > { %v3608_v63 = vpop.f32.mrf.mxu1 }
 0x17f   : > { %4090 = vst [vmem:[#allocation2_spill] sm:$0xff] %v3608_v63 }
 0x180   : > { %v3610_v0 = vpop.f32.mrf.mxu1 }
 0x181   : > { %4091 = vst [vmem:[#allocation3_spill] sm:$0xff] %v3610_v0  ;;  %v3148_v0 = vld [vmem:[%s4067_s7 + $0x60] sm:$0xff]  }
 0x182   : > { %v3612_v3 = vpop.f32.mrf.mxu1 }
 0x184   : > { %v3614_v4 = vpop.f32.mrf.mxu1 }
 0x185   : > { %4092 = vst [vmem:[#allocation4_spill] sm:$0xff] %v3614_v4 }
 0x186   : > { %v3616_v5 = vpop.f32.mrf.mxu1 }
 0x187   : > { %4093 = vst [vmem:[#allocation5_spill] sm:$0xff] %v3616_v5 }
 0x188   : > { %v3618_v8 = vpop.f32.mrf.mxu1 }
 0x189   : > { %4094 = vst [vmem:[#allocation6_spill] sm:$0xff] %v3618_v8 }
 0x18a   : > { %v3620_v9 = vpop.f32.mrf.mxu1 }
 0x18b   : > { %4095 = vst [vmem:[#allocation7_spill] sm:$0xff] %v3620_v9 }
 0x18c   : > { %v3622_v11 = vpop.f32.mrf.mxu1 }
 0x18d   : > { %4096 = vst [vmem:[#allocation8_spill] sm:$0xff] %v3622_v11 }
 0x18e   : > { %v3624_v12 = vpop.f32.mrf.mxu1 }
 0x18f   : > { %4097 = vst [vmem:[#allocation9_spill] sm:$0xff] %v3624_v12 }
 0x190   : > { %v3626_v13 = vpop.f32.mrf.mxu1 }
 0x191   : > { %4098 = vst [vmem:[#allocation10_spill] sm:$0xff] %v3626_v13 }
 0x192   : > { %v3628_v33 = vpop.f32.mrf.mxu1 }
 0x193   : > { %4099 = vst [vmem:[#allocation11_spill] sm:$0xff] %v3628_v33 }
 0x194   : > { %v3630_v35 = vpop.f32.mrf.mxu1 }
 0x195   : > { %4100 = vst [vmem:[#allocation12_spill] sm:$0xff] %v3630_v35 }
 0x220   : > { %v3026_v36 = vpop.f32.mrf.mxu1 }
 0x221   : > { %v1177_v38 = vmax.f32 %v3026_v36, 1e-12 }
 0x222   : > { %v1097_v40 = vpop.f32.mrf.mxu1 }
 0x223   : > { %v1176_v43 = vmax.f32 %v1097_v40, 1e-12 }
 0x224   : > { %v3029_v47 = vpop.f32.mrf.mxu1 }
 0x225   : > { %3172 = vrcp.f32 %v1176_v43  ;;  %v1179_v49 = vmax.f32 %v3029_v47, 1e-12  ;;  %v3129_v47 = vld [vmem:[%s4066_s6 + $0x2c] ss:$16 sps:$4 sm:$0xff]  }
 0x226   : > { %3174 = vrcp.f32 %v1177_v38  ;;  %v1107_v52 = vpop.f32.mrf.mxu1  ;;  %v3115_v38 = vld [vmem:[%s4066_s6 + $0x68] ss:$16 sps:$4 sm:$0xff]  }
 0x227   : > { %v1178_v10 = vmax.f32 %v1107_v52, 1e-12 }
 0x228   : > { %v3032_v7 = vpop.f32.mrf.mxu1 }
 0x229   : > { %3176 = vrcp.f32 %v1178_v10  ;;  %v1181_v6 = vmax.f32 %v3032_v7, 1e-12 }
 0x22a   : > { %3178 = vrcp.f32 %v1179_v49  ;;  %v1117_v62 = vpop.f32.mrf.mxu1 }
 0x22b   : > { %v1180_v60 = vmax.f32 %v1117_v62, 1e-12  ;;  %v3123_v62 = vld [vmem:[%s4066_s6 + $0x4c] ss:$16 sps:$4 sm:$0xff]  }
 0x22c   : > { %v3035_v56 = vpop.f32.mrf.mxu1 }
 0x22d   : > { %3180 = vrcp.f32 %v1180_v60  ;;  %v1183_v55 = vmax.f32 %v3035_v56, 1e-12  ;;  %v3121_v56 = vld [vmem:[%s4066_s6 + $0x48] ss:$16 sps:$4 sm:$0xff]  }
 0x22e   : > { %3182 = vrcp.f32 %v1181_v6  ;;  %v1127_v48 = vpop.f32.mrf.mxu1 }
 0x22f   : > { %v1182_v36 = vmax.f32 %v1127_v48, 1e-12 }
 0x230   : > { %v3038_v46 = vpop.f32.mrf.mxu1 }
 0x231   : > { %3184 = vrcp.f32 %v1182_v36  ;;  %v1185_v10 = vmax.f32 %v3038_v46, 1e-12 }
 0x232   : > { %v3173_v40 = vpop.eup %3172  ;;  %3186 = vrcp.f32 %v1183_v55  ;;  %v1137_v43 = vpop.f32.mrf.mxu1 }
 0x233   : > { %v3175_v60 = vpop.eup %3174  ;;  %v1184_v6 = vmax.f32 %v1137_v43, 1e-12  ;;  %3050 = vmatprep.mubr.msk.f32.mxu0 %vm1209_vm3, %v3173_v40 }
 0x234   : > { %v3041_v48 = vpop.f32.mrf.mxu1  ;;  %3051 = vmatmul.mubr.msk.f32.vlgmr.msra.gmra.mxu0 %vm1209_vm3, %v3175_v60 }
 0x235   : > { %3188 = vrcp.f32 %v1184_v6  ;;  %1669 = vmatpush1.bf16.msra.mxu0 %v3115_v38  ;;  %v1187_v46 = vmax.f32 %v3041_v48, 1e-12  ;;  %v3127_v38 = vld [vmem:[%s4066_s6 + $0x28] ss:$16 sps:$4 sm:$0xff]  }
 0x236   : > { %v3177_v55 = vpop.eup %3176  ;;  %3190 = vrcp.f32 %v1185_v10  ;;  %v1147_v7 = vpop.f32.mrf.mxu1  ;;  %1670 = vmatprep.subr.bf16.mxu0 %v3123_v62  ;;  %v3135_v62 = vld [vmem:[%s4066_s6 + $0xc] ss:$16 sps:$4 sm:$0xff]  }
 0x237   : > { %v3179_v49 = vpop.eup %3178  ;;  %v1186_v52 = vmax.f32 %v1147_v7, 1e-12  ;;  %3053 = vmatprep.mubr.msk.f32.mxu0 %vm1209_vm3, %v3177_v55 }
 0x238   : > { %v3044_v36 = vpop.f32.mrf.mxu1  ;;  %3054 = vmatmul.mubr.msk.f32.gmra.mxu0 %vm1209_vm3, %v3179_v49 }
 0x239   : > { %3192 = vrcp.f32 %v1186_v52  ;;  %1671 = vmatpush1.bf16.msra.mxu0 %v3121_v56  ;;  %v1189_v10 = vmax.f32 %v3044_v36, 1e-12  ;;  %v3133_v56 = vld [vmem:[%s4066_s6 + $0x8] ss:$16 sps:$4 sm:$0xff]  }
 0x23a   : > { %v3181_v40 = vpop.eup %3180  ;;  %3194 = vrcp.f32 %v1187_v46  ;;  %v1157_v43 = vpop.f32.mrf.mxu1  ;;  %1672 = vmatprep.subr.bf16.mxu0 %v3129_v47 }
 0x23b   : > { %v3183_v60 = vpop.eup %3182  ;;  %v1188_v6 = vmax.f32 %v1157_v43, 1e-12  ;;  %3056 = vmatprep.mubr.msk.f32.mxu0 %vm1209_vm3, %v3181_v40 }
 0x23c   : > { %v3047_v48 = vpop.f32.mrf.mxu1  ;;  %3057 = vmatmul.mubr.msk.f32.gmra.mxu0 %vm1209_vm3, %v3183_v60 }
 0x23d   : > { %3196 = vrcp.f32 %v1188_v6  ;;  %1673 = vmatpush1.bf16.msra.mxu0 %v3127_v38  ;;  %v1191_v46 = vmax.f32 %v3047_v48, 1e-12  ;;  %v3670_v6 = vpop.f32.mrf.mxu0 }
 0x23e   : > { %v3185_v55 = vpop.eup %3184  ;;  %3198 = vrcp.f32 %v1189_v10  ;;  %v1167_v7 = vpop.f32.mrf.mxu1  ;;  %1674 = vmatprep.subr.bf16.mxu0 %v3135_v62 }
 0x23f   : > { %v3187_v47 = vpop.eup %3186  ;;  %v1190_v49 = vmax.f32 %v1167_v7, 1e-12  ;;  %3059 = vmatprep.mubr.msk.f32.mxu0 %vm1209_vm3, %v3185_v55  ;;  %v3672_v48 = vpop.f32.mrf.mxu0 }
 0x240   : > { %3060 = vmatmul.mubr.msk.f32.gmra.mxu0 %vm1209_vm3, %v3187_v47 }
 0x241   : > { %3200 = vrcp.f32 %v1190_v49  ;;  %1675 = vmatpush1.bf16.msra.mxu0 %v3133_v56  ;;  %v3674_v56 = vpop.f32.mrf.mxu0 }
 0x242   : > { %v3189_v52 = vpop.eup %3188  ;;  %3202 = vrcp.f32 %v1191_v46  ;;  %2914 = vmatprep.subr.bf16.mxu0 %v3137_v41 }
 0x243   : > { %v3191_v36 = vpop.eup %3190  ;;  %3062 = vmatprep.mubr.msk.f32.mxu0 %vm1209_vm3, %v3189_v52  ;;  %v3676_v55 = vpop.f32.mrf.mxu0 }
 0x244   : > { %3063 = vmatmul.mubr.msk.f32.gmra.mxu0 %vm1209_vm3, %v3191_v36 }
 0x245   : > { %v3678_v46 = vpop.f32.mrf.mxu0 }
 0x246   : > { %v3193_v38 = vpop.eup %3192 }
 0x247   : > { %v3195_v40 = vpop.eup %3194  ;;  %3065 = vmatprep.mubr.msk.f32.mxu0 %vm1209_vm3, %v3193_v38  ;;  %v3680_v7 = vpop.f32.mrf.mxu0 }
 0x248   : > { %3066 = vmatmul.mubr.msk.f32.gmra.mxu0 %vm1209_vm3, %v3195_v40 }
 0x249   : > { %v3682_v47 = vpop.f32.mrf.mxu0 }
 0x24a   : > { %v3197_v10 = vpop.eup %3196 }
 0x24b   : > { %v3199_v43 = vpop.eup %3198  ;;  %3068 = vmatprep.mubr.msk.f32.mxu0 %vm1209_vm3, %v3197_v10  ;;  %v3684_v49 = vpop.f32.mrf.mxu0 }
 0x24c   : > { %3069 = vmatmul.mubr.msk.f32.gmra.mxu0 %vm1209_vm3, %v3199_v43 }
 0x24d   : > { %v3686_v52 = vpop.f32.mrf.mxu0 }
 0x24e   : > { %v3201_v62 = vpop.eup %3200 }
 0x24f   : > { %v3203_v60 = vpop.eup %3202  ;;  %3071 = vmatprep.mubr.msk.f32.mxu0 %vm1209_vm3, %v3201_v62  ;;  %v3688_v36 = vpop.f32.mrf.mxu0 }
 0x250   : > { %3072 = vmatmul.mubr.msk.f32.gmra.mxu0 %vm1209_vm3, %v3203_v60 }
 0x251   : > { %1692 = vmatprep.mubr.bf16.mxu0 %v4086_v1  ;;  %v3690_v38 = vpop.f32.mrf.mxu0 }
 0x253   : > { %v3692_v40 = vpop.f32.mrf.mxu0 }
 0x255   : > { %v3694_v10 = vpop.f32.mrf.mxu0 }
 0x257   : > { %v3696_v43 = vpop.f32.mrf.mxu0 }
 0x259   : > { %v3698_v62 = vpop.f32.mrf.mxu0 }
 0x25b   : > { %v3700_v60 = vpop.f32.mrf.mxu0 }
 0x25d   : > { %v3708_v34 = vpop.f32.mrf.mxu0 }
 0x25f   : > { %v3710_v32 = vpop.f32.mrf.mxu0 }
 0x261   : > { %v3712_v28 = vpop.f32.mrf.mxu0 }
 0x263   : > { %v3714_v1 = vpop.f32.mrf.mxu0 }
 0x265   : > { %v3716_v22 = vpop.f32.mrf.mxu0 }
 0x266   : > { %4101 = vst [vmem:[#allocation13_spill] sm:$0xff] %v3716_v22 }
 0x267   : > { %v3718_v27 = vpop.f32.mrf.mxu0 }
 0x268   : > { %4102 = vst [vmem:[#allocation14_spill] sm:$0xff] %v3718_v27 }
 0x269   : > { %v3720_v12 = vpop.f32.mrf.mxu0 }
 0x26b   : > { %v3722_v35 = vpop.f32.mrf.mxu0 }
 0x26c   : > { %4103 = vst [vmem:[#allocation15_spill] sm:$0xff] %v3722_v35  ;;  %v4112_v35 = vunpack.c.h.bf16 %v3453_v21 }
 0x26d   : > { %v3724_v13 = vpop.f32.mrf.mxu0 }
 0x26e   : > { %4104 = vst [vmem:[#allocation16_spill] sm:$0xff] %v3724_v13  ;;  %v4113_v13 = vunpack.c.l.bf16 %v3453_v21  ;;  %v3141_v21 = vld [vmem:[%s4067_s7 + $0xf0] sm:$0xff]  }
 0x26f   : > { %v3726_v42 = vpop.f32.mrf.mxu0 }
 0x270   : > { %4105 = vst [vmem:[#allocation17_spill] sm:$0xff] %v3726_v42 }
 0x271   : > { %v3728_v41 = vpop.f32.mrf.mxu0 }
 0x272   : > { %4106 = vst [vmem:[#allocation18_spill] sm:$0xff] %v3728_v41 }
 0x273   : > { %v3730_v33 = vpop.f32.mrf.mxu0 }
 0x274   : > { %4107 = vst [vmem:[#allocation19_spill] sm:$0xff] %v3730_v33  ;;  %v3146_v33 = vld [vmem:[%s4067_s7 + $0x28] sm:$0xff]  }
 0x275   : > { %v3732_v5 = vpop.f32.mrf.mxu0 }
 0x276   : > { %4108 = vst [vmem:[#allocation20_spill] sm:$0xff] %v3732_v5  ;;  %v3138_v5 = vld [vmem:[%s4067_s7 + $0x38] sm:$0xff]  }
 0x277   : > { %v3734_v11 = vpop.f32.mrf.mxu0 }
 0x278   : > { %4109 = vst [vmem:[#allocation21_spill] sm:$0xff] %v3734_v11  ;;  %v3139_v11 = vld [vmem:[%s4067_s7 + $0xb8] sm:$0xff]  }
 0x279   : > { %v3736_v8 = vpop.f32.mrf.mxu0 }
 0x27a   : > { %4110 = vst [vmem:[#allocation22_spill] sm:$0xff] %v3736_v8 }
 0x27b   : > { %v3738_v9 = vpop.f32.mrf.mxu0 }
 0x27c   : > { %4111 = vst [vmem:[#allocation23_spill] sm:$0xff] %v3738_v9  ;;  %v3140_v9 = vld [vmem:[%s4067_s7 + $0x70] sm:$0xff]  }
 0x2f4   : > { %v3052_v22 = vpop.f32.mrf.mxu0 }
 0x2f5   : > { %v1404_v4 = vmul.f32 %v3052_v22, %v4112_v35  ;;  %v4114_v22 = vmov 0   ;;  %v3143_v35 = vld [vmem:[%s4067_s7 + $0xb0] sm:$0xff]  }
 0x2f6   : > { %v1324_v63 = vpop.f32.mrf.mxu0 }
 0x2f7   : > { %v1403_v42 = vmul.f32 %v4113_v13, %v1324_v63  ;;  %v4115_v63 = vunpack.c.l.bf16 %v3457_v24  ;;  %v3142_v13 = vld [vmem:[%s4067_s7 + $0x30] sm:$0xff]  }
 0x2f8   : > { %v3055_v27 = vpop.f32.mrf.mxu0 }
 0x2f9   : > { %v1419_v41 = vpack.c.bf16 %v1404_v4, %v1403_v42 }
 0x2fa   : > { %v1334_v8 = vpop.f32.mrf.mxu0 }
 0x2fb   : > { %2697 = vmatmul.mubr.msk.bf16.vlgmr.msra.gmra.mxu1 %vm982_vm2, %v1419_v41  ;;  %2705 = vmatmul.mubr.msk.bf16.vlgmr.msra.gmra.mxu0 %vm982_vm2, %v1419_v41  ;;  %v1405_v4 = vmul.f32 %v4115_v63, %v1334_v8  ;;  %v3144_v41 = vld [vmem:[%s4067_s7 + $0x68] sm:$0xff]   ;;  %v4116_v8 = vunpack.c.h.bf16 %v3457_v24  ;;  %v3149_v24 = vld [vmem:[%s4067_s7 + $0xe0] sm:$0xff]  }
 0x2fc   : > { %1589 = vmatprep.mubr.bf16.mxu1 %v4114_v22  ;;  %1702 = vmatprep.mubr.bf16.mxu0 %v4114_v22  ;;  %v3058_v42 = vpop.f32.mrf.mxu0 }
 0x2fd   : > { %2851 = vmatpush3.bf16.msra.mxu1 %v3138_v5  ;;  %2915 = vmatpush3.bf16.msra.mxu0 %v3139_v11  ;;  %v3145_v5 = vld [vmem:[%s4067_s7 + $0xe8] sm:$0xff]   ;;  %v1406_v11 = vmul.f32 %v3055_v27, %v4116_v8  ;;  %v4117_v27 = vunpack.c.l.bf16 %v3464_v30  ;;  %v4118_v8 = vunpack.c.h.bf16 %v3464_v30  ;;  %v3157_v30 = vld [vmem:[%s4067_s7 + $0xd0] sm:$0xff]  }
 0x2fe   : > { %2852 = vmatprep.subr.bf16.mxu1 %v3140_v9  ;;  %2916 = vmatprep.subr.bf16.mxu0 %v3141_v21  ;;  %v3147_v9 = vld [vmem:[%s4067_s7 + $0xa8] sm:$0xff]   ;;  %v1344_v21 = vpop.f32.mrf.mxu0 }
 0x2ff   : > { %v1420_v63 = vpack.c.bf16 %v1406_v11, %v1405_v4  ;;  %v1407_v4 = vmul.f32 %v4117_v27, %v1344_v21  ;;  %v1408_v11 = vmul.f32 %v3058_v42, %v4118_v8  ;;  %v4119_v42 = vunpack.c.l.bf16 %v3474_v37 }
 0x300   : > { %v4120_v8 = vunpack.c.h.bf16 %v3474_v37  ;;  %v4121_v37 = vunpack.c.l.bf16 %v3485_v44 }
 0x301   : > { %2853 = vmatpush3.bf16.msra.mxu1 %v3142_v13  ;;  %2917 = vmatpush3.bf16.msra.mxu0 %v3143_v35  ;;  %v3150_v13 = vld [vmem:[%s4067_s7 + $0x20] sm:$0xff]  }
 0x302   : > { %2854 = vmatprep.subr.bf16.mxu1 %v3144_v41  ;;  %2918 = vmatprep.subr.bf16.mxu0 %v3145_v5  ;;  %v3151_v35 = vld [vmem:[%s4067_s7 + $0xa0] sm:$0xff]   ;;  %v3061_v41 = vpop.f32.mrf.mxu0  ;;  %v3152_v5 = vld [vmem:[%s4067_s7 + $0x58] sm:$0xff]  }
 0x303   : > { %2698 = vmatmul.mubr.msk.bf16.gmra.mxu1 %vm982_vm2, %v1420_v63  ;;  %2706 = vmatmul.mubr.msk.bf16.gmra.mxu0 %vm982_vm2, %v1420_v63  ;;  %v1421_v63 = vpack.c.bf16 %v1408_v11, %v1407_v4  ;;  %v3158_v4 = vld [vmem:[%s4067_s7 + $0x10] sm:$0xff]   ;;  %v1410_v11 = vmul.f32 %v3061_v41, %v4120_v8  ;;  %v4124_v8 = vunpack.c.h.bf16 %v3496_v51 }
 0x304   : > { %1599 = vmatprep.mubr.bf16.mxu1 %v4114_v22  ;;  %1712 = vmatprep.mubr.bf16.mxu0 %v4114_v22  ;;  %v1354_v21 = vpop.f32.mrf.mxu0 }
 0x305   : > { %2855 = vmatpush3.bf16.msra.mxu1 %v3146_v33  ;;  %2919 = vmatpush3.bf16.msra.mxu0 %v3147_v9  ;;  %v3153_v33 = vld [vmem:[%s4067_s7 + $0xd8] sm:$0xff]   ;;  %v1409_v27 = vmul.f32 %v4119_v42, %v1354_v21 }
 0x306   : > { %2856 = vmatprep.subr.bf16.mxu1 %v3148_v0  ;;  %2920 = vmatprep.subr.bf16.mxu0 %v3149_v24  ;;  %v3154_v9 = vld [vmem:[%s4067_s7 + $0x18] sm:$0xff]   ;;  %v3156_v24 = vld [vmem:[%s4067_s7 + $0x50] sm:$0xff]  }
 0x307   : > { %v3155_v0 = vld [vmem:[%s4067_s7 + $0x98] sm:$0xff]  }
 0x309   : > { %2857 = vmatpush3.bf16.msra.mxu1 %v3150_v13  ;;  %2921 = vmatpush3.bf16.msra.mxu0 %v3151_v35  ;;  %v3159_v13 = vld [vmem:[%s4067_s7 + $0x90] sm:$0xff]   ;;  %v3064_v35 = vpop.f32.mrf.mxu0 }
 0x30a   : > { %2858 = vmatprep.subr.bf16.mxu1 %v3152_v5  ;;  %2922 = vmatprep.subr.bf16.mxu0 %v3153_v33  ;;  %v3160_v5 = vld [vmem:[%s4067_s7 + $0x48] sm:$0xff]  }
 0x30b   : > { %2699 = vmatmul.mubr.msk.bf16.gmra.mxu1 %vm982_vm2, %v1421_v63  ;;  %2707 = vmatmul.mubr.msk.bf16.gmra.mxu0 %vm982_vm2, %v1421_v63  ;;  %v3161_v33 = vld [vmem:[%s4067_s7 + $0xc8] sm:$0xff]   ;;  %v1422_v63 = vpack.c.bf16 %v1410_v11, %v1409_v27  ;;  %v1364_v21 = vpop.f32.mrf.mxu0 }
 0x30c   : > { %1609 = vmatprep.mubr.bf16.mxu1 %v4114_v22  ;;  %1722 = vmatprep.mubr.bf16.mxu0 %v4114_v22  ;;  %v1411_v41 = vmul.f32 %v4121_v37, %v1364_v21  ;;  %v4126_v21 = vunpack.c.h.bf16 %v3507_v58 }
 0x30d   : > { %2859 = vmatpush3.bf16.msra.mxu1 %v3154_v9  ;;  %2923 = vmatpush3.bf16.msra.mxu0 %v3155_v0  ;;  %v3162_v9 = vld [vmem:[%s4067_s7 + $0x8] sm:$0xff]  }
 0x30e   : > { %2860 = vmatprep.subr.bf16.mxu1 %v3156_v24  ;;  %2924 = vmatprep.subr.bf16.mxu0 %v3157_v30  ;;  %v3163_v0 = vld [vmem:[%s4067_s7 + $0x88] sm:$0xff]   ;;  %v3067_v24 = vpop.f32.mrf.mxu0  ;;  %v4122_v30 = vunpack.c.h.bf16 %v3485_v44 }
 0x30f   : > { %v1414_v11 = vmul.f32 %v3067_v24, %v4124_v8  ;;  %v4127_v24 = vunpack.c.l.bf16 %v3518_v2 }
 0x310   : > { %v1412_v42 = vmul.f32 %v3064_v35, %v4122_v30  ;;  %v4125_v35 = vunpack.c.l.bf16 %v3507_v58  ;;  %v3164_v58 = vld [vmem:[%s4067_s7 + $0x40] sm:$0xff]  }
 0x311   : > { %2861 = vmatpush3.bf16.msra.mxu1 %v3158_v4  ;;  %2925 = vmatpush3.bf16.msra.mxu0 %v3159_v13  ;;  %v1374_v4 = vpop.f32.mrf.mxu0  ;;  %v4123_v13 = vunpack.c.l.bf16 %v3496_v51 }
 0x312   : > { %2862 = vmatprep.subr.bf16.mxu1 %v3160_v5  ;;  %2926 = vmatprep.subr.bf16.mxu0 %v3161_v33  ;;  %v1423_v27 = vpack.c.bf16 %v1412_v42, %v1411_v41  ;;  %v4128_v42 = vunpack.c.h.bf16 %v3518_v2  ;;  %v3166_v2 = vld [vmem:[%s4067_s7] sm:$0xff]  }
 0x313   : > { %2700 = vmatmul.mubr.msk.bf16.gmra.mxu1 %vm982_vm2, %v1422_v63  ;;  %2708 = vmatmul.mubr.msk.bf16.gmra.mxu0 %vm982_vm2, %v1422_v63  ;;  %v1413_v5 = vmul.f32 %v4123_v13, %v1374_v4  ;;  %v3070_v33 = vpop.f32.mrf.mxu0  ;;  %v3165_v13 = vld [vmem:[%s4067_s7 + $0xc0] sm:$0xff]  }
 0x314   : > { %1619 = vmatprep.mubr.bf16.mxu1 %v4114_v22  ;;  %1732 = vmatprep.mubr.bf16.mxu0 %v4114_v22  ;;  %v1416_v37 = vmul.f32 %v3070_v33, %v4126_v21 }
 0x315   : > { %2863 = vmatpush3.bf16.msra.mxu1 %v3162_v9  ;;  %2927 = vmatpush3.bf16.msra.mxu0 %v3163_v0  ;;  %v1424_v63 = vpack.c.bf16 %v1414_v11, %v1413_v5  ;;  %v1384_v44 = vpop.f32.mrf.mxu0  ;;  %v3168_v5 = vld [vmem:[%s4068_s8 + $0x18] sm:$0xff]  }
 0x316   : > { %v1415_v9 = vmul.f32 %v4125_v35, %v1384_v44  ;;  %2864 = vmatprep.subr.bf16.mxu1 %v3164_v58  ;;  %2928 = vmatprep.subr.bf16.mxu0 %v3165_v13 }
 0x317   : > { %v3073_v0 = vpop.f32.mrf.mxu0 }
 0x318   : > { %v1425_v41 = vpack.c.bf16 %v1416_v37, %v1415_v9 }
 0x319   : > { %v1394_v51 = vpop.f32.mrf.mxu0  ;;  %2865 = vmatpush3.bf16.msra.mxu1 %v3166_v2 }
 0x31a   : > { %v1417_v30 = vmul.f32 %v4127_v24, %v1394_v51  ;;  %3074 = vmatprep.subr.bf16.mxu1 %v3168_v5 }
 0x31b   : > { %2701 = vmatmul.mubr.msk.bf16.gmra.mxu1 %vm982_vm2, %v1423_v27  ;;  %2709 = vmatmul.mubr.msk.bf16.gmra.mxu0 %vm982_vm2, %v1423_v27  ;;  %v1418_v27 = vmul.f32 %v3073_v0, %v4128_v42 }
 0x31c   : > { %1629 = vmatprep.mubr.bf16.mxu1 %v4114_v22  ;;  %1742 = vmatprep.mubr.bf16.mxu0 %v4114_v22 }
 0x31d   : > { %v1426_v4 = vpack.c.bf16 %v1418_v27, %v1417_v30 }
 0x323   : > { %2702 = vmatmul.mubr.msk.bf16.gmra.mxu1 %vm982_vm2, %v1424_v63  ;;  %2710 = vmatmul.mubr.msk.bf16.gmra.mxu0 %vm982_vm2, %v1424_v63 }
 0x324   : > { %1639 = vmatprep.mubr.bf16.mxu1 %v4114_v22  ;;  %1752 = vmatprep.mubr.bf16.mxu0 %v4114_v22 }
 0x32b   : > { %2703 = vmatmul.mubr.msk.bf16.gmra.mxu1 %vm982_vm2, %v1425_v41  ;;  %2711 = vmatmul.mubr.msk.bf16.gmra.mxu0 %vm982_vm2, %v1425_v41 }
 0x32c   : > { %1649 = vmatprep.mubr.bf16.mxu1 %v4114_v22  ;;  %1762 = vmatprep.mubr.bf16.mxu0 %v4114_v22  ;;  %v3167_v22 = vld [vmem:[%s4067_s7 + $0x80] sm:$0xff]  }
 0x32d   : > { %2929 = vmatpush3.bf16.msra.mxu0 %v3167_v22 }
 0x333   : > { %2704 = vmatmul.mubr.msk.bf16.gmra.mxu1 %vm982_vm2, %v1426_v4  ;;  %2712 = vmatmul.mubr.msk.bf16.gmra.mxu0 %vm982_vm2, %v1426_v4 }
 0x3bb   : > { %v1581_v33 = vpop.f32.mrf.mxu1  ;;  %v1694_v8 = vpop.f32.mrf.mxu0 }
 0x3bc   : > { %v1773_v42 = vmul.f32 %v1581_v33, %v3541_v14  ;;  %v1775_v27 = vmul.f32 %v1694_v8, %v3670_v6 }
 0x3bd   : > { %v1583_v11 = vpop.f32.mrf.mxu1  ;;  %v1696_v63 = vpop.f32.mrf.mxu0 }
 0x3be   : > { %v1774_v41 = vmul.f32 %v1583_v11, %v3543_v15  ;;  %v1776_v51 = vmul.f32 %v1696_v63, %v3672_v48  ;;  %v3169_v15 = vld [vmem:[%s4068_s8 + $0x10] sm:$0xff]  }
 0x3bf   : > { %v1585_v44 = vpop.f32.mrf.mxu1  ;;  %v1698_v35 = vpop.f32.mrf.mxu0 }
 0x3c0   : > { %v1777_v9 = vmul.f32 %v1585_v44, %v3545_v16  ;;  %v1779_v0 = vmul.f32 %v1698_v35, %v3674_v56 }
 0x3c1   : > { %v1587_v21 = vpop.f32.mrf.mxu1  ;;  %v1700_v37 = vpop.f32.mrf.mxu0 }
 0x3c2   : > { %v1778_v24 = vmul.f32 %v1587_v21, %v3547_v17  ;;  %v1780_v30 = vmul.f32 %v1700_v37, %v3676_v55  ;;  %v1837_v2 = vpack.c.bf16 %v1777_v9, %v1773_v42  ;;  %v1839_v56 = vpack.c.bf16 %v1779_v0, %v1775_v27 }
 0x3c3   : > { %v1591_v4 = vpop.f32.mrf.mxu1  ;;  %v1704_v58 = vpop.f32.mrf.mxu0 }
 0x3c4   : > { %v1838_v13 = vpack.c.bf16 %v1778_v24, %v1774_v41  ;;  %v1840_v16 = vpack.c.bf16 %v1780_v30, %v1776_v51  ;;  %v1781_v9 = vmul.f32 %v1591_v4, %v3549_v18  ;;  %v1783_v0 = vmul.f32 %v1704_v58, %v3678_v46 }
 0x3c5   : > { %v1593_v22 = vpop.f32.mrf.mxu1  ;;  %v1706_v44 = vpop.f32.mrf.mxu0 }
 0x3c6   : > { %2157 = vmatprep.mubr.bf16.mxu1 %v1838_v13  ;;  %2254 = vmatprep.mubr.bf16.mxu0 %v1840_v16  ;;  %v1782_v8 = vmul.f32 %v1593_v22, %v3551_v19  ;;  %v1784_v11 = vmul.f32 %v1706_v44, %v3680_v7 }
 0x3c7   : > { %v1595_v17 = vpop.f32.mrf.mxu1  ;;  %v1708_v48 = vpop.f32.mrf.mxu0  ;;  %2158 = vmatmul.mubr.bf16.vlgmr.msra.gmra.mxu1 %v1837_v2  ;;  %2255 = vmatmul.mubr.bf16.vlgmr.msra.gmra.mxu0 %v1839_v56 }
 0x3c8   : > { %3075 = vmatpush3.bf16.msra.mxu1 %v3168_v5  ;;  %v1785_v14 = vmul.f32 %v1595_v17, %v3553_v20  ;;  %v1787_v6 = vmul.f32 %v1708_v48, %v3682_v47 }
 0x3c9   : > { %v1597_v55 = vpop.f32.mrf.mxu1  ;;  %v1710_v33 = vpop.f32.mrf.mxu0  ;;  %3076 = vmatprep.subr.bf16.mxu1 %v3169_v15 }
 0x3ca   : > { %v1786_v63 = vmul.f32 %v1597_v55, %v3555_v23  ;;  %v1788_v35 = vmul.f32 %v1710_v33, %v3684_v49  ;;  %v1841_v47 = vpack.c.bf16 %v1785_v14, %v1781_v9  ;;  %v1843_v41 = vpack.c.bf16 %v1787_v6, %v1783_v0 }
 0x3cb   : > { %v1601_v5 = vpop.f32.mrf.mxu1  ;;  %v1714_v21 = vpop.f32.mrf.mxu0 }
 0x3cc   : > { %v1842_v20 = vpack.c.bf16 %v1786_v63, %v1782_v8  ;;  %v1844_v37 = vpack.c.bf16 %v1788_v35, %v1784_v11  ;;  %3077 = vmatpush3.bf16.msra.mxu1 %v3169_v15  ;;  %v1789_v58 = vmul.f32 %v1601_v5, %v3557_v25  ;;  %v1791_v13 = vmul.f32 %v1714_v21, %v3686_v52 }
 0x3cd   : > { %v1603_v51 = vpop.f32.mrf.mxu1  ;;  %v1716_v24 = vpop.f32.mrf.mxu0 }
 0x3ce   : > { %2165 = vmatprep.mubr.bf16.mxu1 %v1842_v20  ;;  %2262 = vmatprep.mubr.bf16.mxu0 %v1844_v37  ;;  %v1790_v30 = vmul.f32 %v1603_v51, %v3559_v26  ;;  %v1792_v42 = vmul.f32 %v1716_v24, %v3688_v36 }
 0x3cf   : > { %v1605_v19 = vpop.f32.mrf.mxu1  ;;  %v1718_v7 = vpop.f32.mrf.mxu0  ;;  %2166 = vmatmul.mubr.bf16.gmra.mxu1 %v1841_v47  ;;  %2263 = vmatmul.mubr.bf16.gmra.mxu0 %v1843_v41 }
 0x3d0   : > { %v1793_v23 = vmul.f32 %v1605_v19, %v3561_v29  ;;  %v1795_v18 = vmul.f32 %v1718_v7, %v3690_v38 }
 0x3d1   : > { %v1607_v46 = vpop.f32.mrf.mxu1  ;;  %v1720_v49 = vpop.f32.mrf.mxu0 }
 0x3d2   : > { %v1794_v27 = vmul.f32 %v1607_v46, %v3563_v31  ;;  %v1796_v4 = vmul.f32 %v1720_v49, %v3692_v40  ;;  %v1845_v22 = vpack.c.bf16 %v1793_v23, %v1789_v58  ;;  %v1847_v38 = vpack.c.bf16 %v1795_v18, %v1791_v13  ;;  %v4129_v46 = vld [vmem:[#allocation3_spill] sm:$0xff] }
 0x3d3   : > { %v1611_v16 = vpop.f32.mrf.mxu1  ;;  %v1724_v2 = vpop.f32.mrf.mxu0  ;;  %v4132_v58 = vld [vmem:[#allocation15_spill] sm:$0xff] }
 0x3d4   : > { %v1846_v56 = vpack.c.bf16 %v1794_v27, %v1790_v30  ;;  %v1848_v29 = vpack.c.bf16 %v1796_v4, %v1792_v42  ;;  %v1797_v55 = vmul.f32 %v1611_v16, %v3577_v39  ;;  %v1799_v33 = vmul.f32 %v1724_v2, %v3694_v10  ;;  %v4130_v30 = vld [vmem:[#allocation14_spill] sm:$0xff]  ;;  %v4131_v27 = vld [vmem:[#allocation4_spill] sm:$0xff] }
 0x3d5   : > { %v1613_v44 = vpop.f32.mrf.mxu1  ;;  %v1726_v15 = vpop.f32.mrf.mxu0  ;;  %v4133_v16 = vld [vmem:[#allocation2_spill] sm:$0xff] }
 0x3d6   : > { %2173 = vmatprep.mubr.bf16.mxu1 %v1846_v56  ;;  %2270 = vmatprep.mubr.bf16.mxu0 %v1848_v29  ;;  %v1798_v17 = vmul.f32 %v1613_v44, %v3585_v45  ;;  %v1800_v48 = vmul.f32 %v1726_v15, %v3696_v43  ;;  %v4134_v56 = vld [vmem:[#allocation13_spill] sm:$0xff] }
 0x3d7   : > { %v1615_v26 = vpop.f32.mrf.mxu1  ;;  %v1728_v36 = vpop.f32.mrf.mxu0  ;;  %2174 = vmatmul.mubr.bf16.gmra.mxu1 %v1845_v22  ;;  %2271 = vmatmul.mubr.bf16.gmra.mxu0 %v1847_v38 }
 0x3d8   : > { %v1801_v31 = vmul.f32 %v1615_v26, %v3593_v50  ;;  %v1803_v25 = vmul.f32 %v1728_v36, %v3698_v62 }
 0x3d9   : > { %v1617_v40 = vpop.f32.mrf.mxu1  ;;  %v1730_v52 = vpop.f32.mrf.mxu0 }
 0x3da   : > { %v1802_v14 = vmul.f32 %v1617_v40, %v3598_v53  ;;  %v1804_v6 = vmul.f32 %v1730_v52, %v3700_v60  ;;  %v1849_v35 = vpack.c.bf16 %v1801_v31, %v1797_v55  ;;  %v1851_v62 = vpack.c.bf16 %v1803_v25, %v1799_v33  ;;  %v4135_v40 = vld [vmem:[#allocation7_spill] sm:$0xff]  ;;  %v4137_v55 = vld [vmem:[#allocation6_spill] sm:$0xff] }
 0x3db   : > { %v1621_v8 = vpop.f32.mrf.mxu1  ;;  %v1734_v11 = vpop.f32.mrf.mxu0 }
 0x3dc   : > { %v1850_v63 = vpack.c.bf16 %v1802_v14, %v1798_v17  ;;  %v1852_v50 = vpack.c.bf16 %v1804_v6, %v1800_v48  ;;  %v1805_v47 = vmul.f32 %v1621_v8, %v3600_v54  ;;  %v1807_v41 = vmul.f32 %v1734_v11, %v3708_v34  ;;  %v4136_v17 = vld [vmem:[#allocation18_spill] sm:$0xff]  ;;  %v4138_v8 = vld [vmem:[#allocation17_spill] sm:$0xff] }
 0x3dd   : > { %v1623_v9 = vpop.f32.mrf.mxu1  ;;  %v1736_v0 = vpop.f32.mrf.mxu0 }
 0x3de   : > { %2181 = vmatprep.mubr.bf16.mxu1 %v1850_v63  ;;  %2278 = vmatprep.mubr.bf16.mxu0 %v1852_v50  ;;  %v1806_v5 = vmul.f32 %v1623_v9, %v3602_v57  ;;  %v1808_v21 = vmul.f32 %v1736_v0, %v3710_v32  ;;  %v4139_v63 = vld [vmem:[#allocation8_spill] sm:$0xff]  ;;  %v4141_v9 = vld [vmem:[#allocation5_spill] sm:$0xff] }
 0x3df   : > { %v1625_v45 = vpop.f32.mrf.mxu1  ;;  %v1738_v43 = vpop.f32.mrf.mxu0  ;;  %2182 = vmatmul.mubr.bf16.gmra.mxu1 %v1849_v35  ;;  %2279 = vmatmul.mubr.bf16.gmra.mxu0 %v1851_v62  ;;  %v4140_v35 = vld [vmem:[#allocation19_spill] sm:$0xff] }
 0x3e0   : > { %v1809_v53 = vmul.f32 %v1625_v45, %v3604_v59  ;;  %v1811_v39 = vmul.f32 %v1738_v43, %v3712_v28  ;;  %v4142_v45 = vld [vmem:[#allocation16_spill] sm:$0xff] }
 0x3e1   : > { %v1627_v60 = vpop.f32.mrf.mxu1  ;;  %v1740_v10 = vpop.f32.mrf.mxu0 }
 0x3e2   : > { %v1810_v20 = vmul.f32 %v1627_v60, %v3606_v61  ;;  %v1812_v37 = vmul.f32 %v1740_v10, %v3714_v1  ;;  %v1853_v7 = vpack.c.bf16 %v1809_v53, %v1805_v47  ;;  %v1855_v28 = vpack.c.bf16 %v1811_v39, %v1807_v41 }
 0x3e3   : > { %v1631_v51 = vpop.f32.mrf.mxu1  ;;  %v1744_v24 = vpop.f32.mrf.mxu0 }
 0x3e4   : > { %v1854_v19 = vpack.c.bf16 %v1810_v20, %v1806_v5  ;;  %v1856_v59 = vpack.c.bf16 %v1812_v37, %v1808_v21  ;;  %v1813_v2 = vmul.f32 %v1631_v51, %v4133_v16  ;;  %v1815_v29 = vmul.f32 %v1744_v24, %v4134_v56  ;;  %v4143_v51 = vld [vmem:[#allocation11_spill] sm:$0xff] }
 0x3e5   : > { %v1633_v23 = vpop.f32.mrf.mxu1  ;;  %v1746_v18 = vpop.f32.mrf.mxu0  ;;  %v3170_v16 = vld [vmem:[%s4068_s8 + $0x8] sm:$0xff]  }
 0x3e6   : > { %2189 = vmatprep.mubr.bf16.mxu1 %v1854_v19  ;;  %2286 = vmatprep.mubr.bf16.mxu0 %v1856_v59  ;;  %v1814_v49 = vmul.f32 %v1633_v23, %v4129_v46  ;;  %v1816_v42 = vmul.f32 %v1746_v18, %v4130_v30  ;;  %v4144_v19 = vld [vmem:[#allocation22_spill] sm:$0xff]  ;;  %v4149_v46 = vld [vmem:[#allocation9_spill] sm:$0xff]  ;;  %v4150_v30 = vld [vmem:[#allocation20_spill] sm:$0xff] }
 0x3e7   : > { %v1635_v57 = vpop.f32.mrf.mxu1  ;;  %v1748_v32 = vpop.f32.mrf.mxu0  ;;  %2190 = vmatmul.mubr.bf16.gmra.mxu1 %v1853_v7  ;;  %2287 = vmatmul.mubr.bf16.gmra.mxu0 %v1855_v28  ;;  %v4145_v23 = vld [vmem:[#allocation10_spill] sm:$0xff] }
 0x3e8   : > { %v1817_v1 = vmul.f32 %v1635_v57, %v3612_v3  ;;  %v1819_v54 = vmul.f32 %v1748_v32, %v3720_v12  ;;  %v4146_v57 = vld [vmem:[#allocation21_spill] sm:$0xff]  ;;  %3078 = vmatprep.subr.bf16.mxu1 %v3170_v16 }
 0x3e9   : > { %v1637_v61 = vpop.f32.mrf.mxu1  ;;  %v1750_v34 = vpop.f32.mrf.mxu0  ;;  %3079 = vmatpush3.bf16.msra.mxu1 %v3170_v16 }
 0x3ea   : > { %v1818_v4 = vmul.f32 %v1637_v61, %v4131_v27  ;;  %v1820_v13 = vmul.f32 %v1750_v34, %v4132_v58  ;;  %v1857_v15 = vpack.c.bf16 %v1817_v1, %v1813_v2  ;;  %v1859_v12 = vpack.c.bf16 %v1819_v54, %v1815_v29  ;;  %v4147_v1 = vld [vmem:[#allocation12_spill] sm:$0xff]  ;;  %v4148_v61 = vld [vmem:[#allocation23_spill] sm:$0xff]  ;;  %v3171_v2 = vld [vmem:[%s4068_s8] sm:$0xff]  }
 0x3eb   : > { %v1641_v22 = vpop.f32.mrf.mxu1  ;;  %v1754_v38 = vpop.f32.mrf.mxu0  ;;  %3080 = vmatprep.subr.bf16.mxu1 %v3171_v2 }
 0x3ec   : > { %v1858_v44 = vpack.c.bf16 %v1818_v4, %v1814_v49  ;;  %v1860_v3 = vpack.c.bf16 %v1820_v13, %v1816_v42  ;;  %v1821_v0 = vmul.f32 %v1641_v22, %v4141_v9  ;;  %v1823_v43 = vmul.f32 %v1754_v38, %v4142_v45 }
 0x3ed   : > { %v1643_v26 = vpop.f32.mrf.mxu1  ;;  %v1756_v36 = vpop.f32.mrf.mxu0  ;;  %3081 = vmatpush3.bf16.msra.mxu1 %v3171_v2 }
 0x3ee   : > { %2197 = vmatprep.mubr.bf16.mxu1 %v1858_v44  ;;  %2294 = vmatprep.mubr.bf16.mxu0 %v1860_v3  ;;  %v1822_v33 = vmul.f32 %v1643_v26, %v4137_v55  ;;  %v1824_v11 = vmul.f32 %v1756_v36, %v4138_v8 }
 0x3ef   : > { %v1645_v31 = vpop.f32.mrf.mxu1  ;;  %v1758_v25 = vpop.f32.mrf.mxu0  ;;  %2198 = vmatmul.mubr.bf16.gmra.mxu1 %v1857_v15  ;;  %2295 = vmatmul.mubr.bf16.gmra.mxu0 %v1859_v12 }
 0x3f0   : > { %v1825_v52 = vmul.f32 %v1645_v31, %v4135_v40  ;;  %v1827_v48 = vmul.f32 %v1758_v25, %v4136_v17 }
 0x3f1   : > { %v1647_v14 = vpop.f32.mrf.mxu1  ;;  %v1760_v6 = vpop.f32.mrf.mxu0 }
 0x3f2   : > { %v1826_v50 = vmul.f32 %v1647_v14, %v4139_v63  ;;  %v1828_v62 = vmul.f32 %v1760_v6, %v4140_v35  ;;  %v1861_v5 = vpack.c.bf16 %v1825_v52, %v1821_v0  ;;  %v1863_v21 = vpack.c.bf16 %v1827_v48, %v1823_v43 }
 0x3f3   : > { %v1651_v53 = vpop.f32.mrf.mxu1  ;;  %v1764_v39 = vpop.f32.mrf.mxu0 }
 0x3f4   : > { %v1862_v60 = vpack.c.bf16 %v1826_v50, %v1822_v33  ;;  %v1864_v10 = vpack.c.bf16 %v1828_v62, %v1824_v11  ;;  %v1829_v49 = vmul.f32 %v1651_v53, %v4149_v46  ;;  %v1831_v42 = vmul.f32 %v1764_v39, %v4150_v30 }
 0x3f5   : > { %v1653_v20 = vpop.f32.mrf.mxu1  ;;  %v1766_v37 = vpop.f32.mrf.mxu0 }
 0x3f6   : > { %2205 = vmatprep.mubr.bf16.mxu1 %v1862_v60  ;;  %2302 = vmatprep.mubr.bf16.mxu0 %v1864_v10  ;;  %v1830_v18 = vmul.f32 %v1653_v20, %v4145_v23  ;;  %v1832_v32 = vmul.f32 %v1766_v37, %v4146_v57 }
 0x3f7   : > { %v1655_v47 = vpop.f32.mrf.mxu1  ;;  %v1768_v41 = vpop.f32.mrf.mxu0  ;;  %2206 = vmatmul.mubr.bf16.gmra.mxu1 %v1861_v5  ;;  %2303 = vmatmul.mubr.bf16.gmra.mxu0 %v1863_v21 }
 0x3f8   : > { %v1833_v24 = vmul.f32 %v1655_v47, %v4143_v51  ;;  %v1835_v59 = vmul.f32 %v1768_v41, %v4144_v19 }
 0x3f9   : > { %v1657_v7 = vpop.f32.mrf.mxu1  ;;  %v1770_v28 = vpop.f32.mrf.mxu0 }
 0x3fa   : > { %v1834_v54 = vmul.f32 %v1657_v7, %v4147_v1  ;;  %v1836_v34 = vmul.f32 %v1770_v28, %v4148_v61  ;;  %v1865_v58 = vpack.c.bf16 %v1833_v24, %v1829_v49  ;;  %v1867_v13 = vpack.c.bf16 %v1835_v59, %v1831_v42 }
 0x3fc   : > { %v1866_v27 = vpack.c.bf16 %v1834_v54, %v1830_v18  ;;  %v1868_v4 = vpack.c.bf16 %v1836_v34, %v1832_v32 }
 0x3fe   : > { %2213 = vmatprep.mubr.bf16.mxu1 %v1866_v27  ;;  %2310 = vmatprep.mubr.bf16.mxu0 %v1868_v4 }
 0x3ff   : > { %2214 = vmatmul.mubr.bf16.gmra.mxu1 %v1865_v58  ;;  %2311 = vmatmul.mubr.bf16.gmra.mxu0 %v1867_v13 }
 0x487   : > { %v2866_v56 = vpop.f32.mrf.mxu1  ;;  %v2930_v29 = vpop.f32.mrf.mxu0 }
 0x489   : > { %v2867_v22 = vpop.f32.mrf.mxu1  ;;  %v2931_v38 = vpop.f32.mrf.mxu0 }
 0x48a   : > { %v2868_v15 = vadd.f32 %v2867_v22, %v2866_v56  ;;  %v2932_v12 = vadd.f32 %v2931_v38, %v2930_v29 }
 0x48b   : > { %v2869_v44 = vpop.f32.mrf.mxu1  ;;  %v2933_v3 = vpop.f32.mrf.mxu0 }
 0x48c   : > { %v2257_v17 = vadd.f32 %v2932_v12, %v2868_v15 }
 0x48d   : > { %v2870_v26 = vpop.f32.mrf.mxu1  ;;  %v2934_v36 = vpop.f32.mrf.mxu0 }
 0x48e   : > { %v2871_v31 = vadd.f32 %v2870_v26, %v2869_v44  ;;  %v2935_v25 = vadd.f32 %v2934_v36, %v2933_v3 }
 0x48f   : > { %v2872_v40 = vpop.f32.mrf.mxu1  ;;  %v2936_v52 = vpop.f32.mrf.mxu0 }
 0x490   : > { %v2260_v48 = vadd.f32 %v2935_v25, %v2871_v31 }
 0x491   : > { %v2873_v14 = vpop.f32.mrf.mxu1  ;;  %v2937_v6 = vpop.f32.mrf.mxu0 }
 0x492   : > { %v2319_v55 = vpack.c.bf16 %v2260_v48, %v2257_v17  ;;  %v2874_v11 = vadd.f32 %v2873_v14, %v2872_v40  ;;  %v2938_v63 = vadd.f32 %v2937_v6, %v2936_v52 }
 0x493   : > { %v2875_v33 = vpop.f32.mrf.mxu1  ;;  %v2939_v8 = vpop.f32.mrf.mxu0 }
 0x494   : > { %3082 = vmatprep.mubr.msk.bf16.mxu1 %vm982_vm2, %v2319_v55  ;;  %v2265_v43 = vadd.f32 %v2938_v63, %v2874_v11 }
 0x495   : > { %v2876_v50 = vpop.f32.mrf.mxu1  ;;  %v2940_v35 = vpop.f32.mrf.mxu0 }
 0x496   : > { %v2877_v62 = vadd.f32 %v2876_v50, %v2875_v33  ;;  %v2941_v9 = vadd.f32 %v2940_v35, %v2939_v8 }
 0x497   : > { %v2878_v0 = vpop.f32.mrf.mxu1  ;;  %v2942_v45 = vpop.f32.mrf.mxu0 }
 0x498   : > { %v2268_v53 = vadd.f32 %v2941_v9, %v2877_v62 }
 0x499   : > { %v2879_v39 = vpop.f32.mrf.mxu1  ;;  %v2943_v60 = vpop.f32.mrf.mxu0 }
 0x49a   : > { %v2320_v10 = vpack.c.bf16 %v2268_v53, %v2265_v43  ;;  %v2880_v20 = vadd.f32 %v2879_v39, %v2878_v0  ;;  %v2944_v37 = vadd.f32 %v2943_v60, %v2942_v45 }
 0x49b   : > { %v2881_v5 = vpop.f32.mrf.mxu1  ;;  %v2945_v21 = vpop.f32.mrf.mxu0 }
 0x49c   : > { %3083 = vmatmul.mubr.msk.bf16.vlgmr.msra.gmra.mxu1 %vm982_vm2, %v2320_v10  ;;  %v2273_v7 = vadd.f32 %v2944_v37, %v2880_v20 }
 0x49d   : > { %v2882_v47 = vpop.f32.mrf.mxu1  ;;  %v2946_v41 = vpop.f32.mrf.mxu0 }
 0x49e   : > { %v2883_v51 = vadd.f32 %v2882_v47, %v2881_v5  ;;  %v2947_v24 = vadd.f32 %v2946_v41, %v2945_v21 }
 0x49f   : > { %v2884_v19 = vpop.f32.mrf.mxu1  ;;  %v2948_v59 = vpop.f32.mrf.mxu0 }
 0x4a0   : > { %v2276_v28 = vadd.f32 %v2947_v24, %v2883_v51 }
 0x4a1   : > { %v2885_v23 = vpop.f32.mrf.mxu1  ;;  %v2949_v18 = vpop.f32.mrf.mxu0 }
 0x4a2   : > { %v2321_v57 = vpack.c.bf16 %v2276_v28, %v2273_v7  ;;  %v2886_v54 = vadd.f32 %v2885_v23, %v2884_v19  ;;  %v2950_v61 = vadd.f32 %v2949_v18, %v2948_v59 }
 0x4a3   : > { %v2887_v32 = vpop.f32.mrf.mxu1  ;;  %v2951_v1 = vpop.f32.mrf.mxu0 }
 0x4a4   : > { %3086 = vmatprep.mubr.msk.bf16.mxu1 %vm982_vm2, %v2321_v57  ;;  %v2281_v4 = vadd.f32 %v2950_v61, %v2886_v54 }
 0x4a5   : > { %v2888_v34 = vpop.f32.mrf.mxu1  ;;  %v2952_v46 = vpop.f32.mrf.mxu0 }
 0x4a6   : > { %v2889_v49 = vadd.f32 %v2888_v34, %v2887_v32  ;;  %v2953_v30 = vadd.f32 %v2952_v46, %v2951_v1 }
 0x4a7   : > { %v2890_v42 = vpop.f32.mrf.mxu1  ;;  %v2954_v27 = vpop.f32.mrf.mxu0 }
 0x4a8   : > { %v2284_v58 = vadd.f32 %v2953_v30, %v2889_v49  ;;  %v3979_v30 = vld [vmem:[%s4069_s9] ss:$0 sm:$0xff] }
 0x4a9   : > { %v2891_v13 = vpop.f32.mrf.mxu1  ;;  %v2955_v16 = vpop.f32.mrf.mxu0 }
 0x4aa   : > { %v2322_v2 = vpack.c.bf16 %v2284_v58, %v2281_v4  ;;  %v2892_v22 = vadd.f32 %v2891_v13, %v2890_v42  ;;  %v2956_v38 = vadd.f32 %v2955_v16, %v2954_v27  ;;  %v3984_v27 = vld [vmem:[%s4070_s10] ss:$0 sm:$0xff] }
 0x4ab   : > { %v2893_v56 = vpop.f32.mrf.mxu1  ;;  %v2957_v29 = vpop.f32.mrf.mxu0 }
 0x4ac   : > { %3087 = vmatmul.mubr.msk.bf16.gmra.mxu1 %vm982_vm2, %v2322_v2  ;;  %v2289_v31 = vadd.f32 %v2956_v38, %v2892_v22 }
 0x4ad   : > { %v2894_v44 = vpop.f32.mrf.mxu1  ;;  %v2958_v3 = vpop.f32.mrf.mxu0 }
 0x4ae   : > { %v2895_v15 = vadd.f32 %v2894_v44, %v2893_v56  ;;  %v2959_v12 = vadd.f32 %v2958_v3, %v2957_v29 }
 0x4af   : > { %v2896_v26 = vpop.f32.mrf.mxu1  ;;  %v2960_v36 = vpop.f32.mrf.mxu0 }
 0x4b0   : > { %v2292_v25 = vadd.f32 %v2959_v12, %v2895_v15 }
 0x4b1   : > { %v2897_v40 = vpop.f32.mrf.mxu1  ;;  %v2961_v52 = vpop.f32.mrf.mxu0 }
 0x4b2   : > { %v2323_v17 = vpack.c.bf16 %v2292_v25, %v2289_v31  ;;  %v2898_v6 = vadd.f32 %v2897_v40, %v2896_v26  ;;  %v2962_v55 = vadd.f32 %v2961_v52, %v2960_v36 }
 0x4b3   : > { %v2899_v48 = vpop.f32.mrf.mxu1  ;;  %v2963_v14 = vpop.f32.mrf.mxu0 }
 0x4b4   : > { %3090 = vmatprep.mubr.msk.bf16.mxu1 %vm982_vm2, %v2323_v17  ;;  %v2297_v62 = vadd.f32 %v2962_v55, %v2898_v6 }
 0x4b5   : > { %v2900_v33 = vpop.f32.mrf.mxu1  ;;  %v2964_v8 = vpop.f32.mrf.mxu0 }
 0x4b6   : > { %v2901_v11 = vadd.f32 %v2900_v33, %v2899_v48  ;;  %v2965_v63 = vadd.f32 %v2964_v8, %v2963_v14 }
 0x4b7   : > { %v2902_v50 = vpop.f32.mrf.mxu1  ;;  %v2966_v35 = vpop.f32.mrf.mxu0 }
 0x4b8   : > { %v2300_v9 = vadd.f32 %v2965_v63, %v2901_v11 }
 0x4b9   : > { %v2903_v0 = vpop.f32.mrf.mxu1  ;;  %v2967_v45 = vpop.f32.mrf.mxu0 }
 0x4ba   : > { %v2324_v43 = vpack.c.bf16 %v2300_v9, %v2297_v62  ;;  %v2904_v60 = vadd.f32 %v2903_v0, %v2902_v50  ;;  %v2968_v10 = vadd.f32 %v2967_v45, %v2966_v35 }
 0x4bb   : > { %v2905_v53 = vpop.f32.mrf.mxu1  ;;  %v2969_v39 = vpop.f32.mrf.mxu0 }
 0x4bc   : > { %3091 = vmatmul.mubr.msk.bf16.gmra.mxu1 %vm982_vm2, %v2324_v43  ;;  %v2305_v51 = vadd.f32 %v2968_v10, %v2904_v60 }
 0x4bd   : > { %v2906_v5 = vpop.f32.mrf.mxu1  ;;  %v2970_v21 = vpop.f32.mrf.mxu0 }
 0x4be   : > { %v2907_v20 = vadd.f32 %v2906_v5, %v2905_v53  ;;  %v2971_v37 = vadd.f32 %v2970_v21, %v2969_v39 }
 0x4bf   : > { %v2908_v47 = vpop.f32.mrf.mxu1  ;;  %v2972_v41 = vpop.f32.mrf.mxu0 }
 0x4c0   : > { %v2308_v24 = vadd.f32 %v2971_v37, %v2907_v20 }
 0x4c1   : > { %v2909_v19 = vpop.f32.mrf.mxu1  ;;  %v2973_v59 = vpop.f32.mrf.mxu0 }
 0x4c2   : > { %v2325_v7 = vpack.c.bf16 %v2308_v24, %v2305_v51  ;;  %v2910_v18 = vadd.f32 %v2909_v19, %v2908_v47  ;;  %v2974_v57 = vadd.f32 %v2973_v59, %v2972_v41 }
 0x4c3   : > { %v2911_v28 = vpop.f32.mrf.mxu1  ;;  %v2975_v23 = vpop.f32.mrf.mxu0 }
 0x4c4   : > { %3094 = vmatprep.mubr.msk.bf16.mxu1 %vm982_vm2, %v2325_v7  ;;  %v2313_v34 = vadd.f32 %v2974_v57, %v2910_v18 }
 0x4c5   : > { %v2912_v32 = vpop.f32.mrf.mxu1  ;;  %v2976_v1 = vpop.f32.mrf.mxu0 }
 0x4c6   : > { %v2913_v54 = vadd.f32 %v2912_v32, %v2911_v28  ;;  %v2977_v61 = vadd.f32 %v2976_v1, %v2975_v23 }
 0x4c8   : > { %v2316_v46 = vadd.f32 %v2977_v61, %v2913_v54 }
 0x4ca   : > { %v2326_v49 = vpack.c.bf16 %v2316_v46, %v2313_v34 }
 0x4cc   : > { %3095 = vmatmul.mubr.msk.bf16.gmra.mxu1 %vm982_vm2, %v2326_v49 }
 0x55c   : > { %v3084_v42 = vpop.f32.mrf.mxu1 }
 0x55d   : > { %v2433_v4 = vadd.f32 %v3084_v42, %v3979_v30 }
 0x55e   : > { %v2424_v58 = vpop.f32.mrf.mxu1 }
 0x55f   : > { %v2496_v13 = vmul.f32 %v3984_v27, %v2433_v4  ;;  %v2425_v16 = vadd.f32 %v3979_v30, %v2424_v58 }
 0x560   : > { %v3085_v2 = vpop.f32.mrf.mxu1 }
 0x561   : > { %2513 = vst.msk [vmem:[%s3992_s13 + $0x10] sm:$0xff] %vm2510_vm4, %v2496_v13  ;;  %v2494_v56 = vmul.f32 %v3984_v27, %v2425_v16  ;;  %v2436_v29 = vadd.f32 %v3085_v2, %v3979_v30 }
 0x562   : > { %v2427_v22 = vpop.f32.mrf.mxu1 }
 0x563   : > { %2511 = vst.msk [vmem:[%s3992_s13] sm:$0xff] %vm2510_vm4, %v2494_v56  ;;  %v2497_v38 = vmul.f32 %v3984_v27, %v2436_v29  ;;  %v2428_v44 = vadd.f32 %v3979_v30, %v2427_v22 }
 0x565   : > { %2514 = vst.msk [vmem:[%s3992_s13 + $0x18] sm:$0xff] %vm2510_vm4, %v2497_v38  ;;  %v2495_v3 = vmul.f32 %v3984_v27, %v2428_v44 }
 0x567   : > { %2512 = vst.msk [vmem:[%s3992_s13 + $0x8] sm:$0xff] %vm2510_vm4, %v2495_v3 }
 0x56c   : > { %v3088_v15 = vpop.f32.mrf.mxu1 }
 0x56d   : > { %v2449_v12 = vadd.f32 %v3088_v15, %v3979_v30 }
 0x56e   : > { %v2440_v26 = vpop.f32.mrf.mxu1 }
 0x56f   : > { %v2500_v36 = vmul.f32 %v3984_v27, %v2449_v12  ;;  %v2441_v31 = vadd.f32 %v3979_v30, %v2440_v26 }
 0x570   : > { %v3089_v25 = vpop.f32.mrf.mxu1 }
 0x571   : > { %2517 = vst.msk [vmem:[%s3992_s13 + $0x30] sm:$0xff] %vm2510_vm4, %v2500_v36  ;;  %v2498_v40 = vmul.f32 %v3984_v27, %v2441_v31  ;;  %v2452_v52 = vadd.f32 %v3089_v25, %v3979_v30 }
 0x572   : > { %v2443_v17 = vpop.f32.mrf.mxu1 }
 0x573   : > { %2515 = vst.msk [vmem:[%s3992_s13 + $0x20] sm:$0xff] %vm2510_vm4, %v2498_v40  ;;  %v2501_v48 = vmul.f32 %v3984_v27, %v2452_v52  ;;  %v2444_v14 = vadd.f32 %v3979_v30, %v2443_v17 }
 0x575   : > { %2518 = vst.msk [vmem:[%s3992_s13 + $0x38] sm:$0xff] %vm2510_vm4, %v2501_v48  ;;  %v2499_v6 = vmul.f32 %v3984_v27, %v2444_v14 }
 0x577   : > { %2516 = vst.msk [vmem:[%s3992_s13 + $0x28] sm:$0xff] %vm2510_vm4, %v2499_v6 }
 0x57c   : > { %v3092_v55 = vpop.f32.mrf.mxu1 }
 0x57d   : > { %v2465_v33 = vadd.f32 %v3092_v55, %v3979_v30 }
 0x57e   : > { %v2456_v8 = vpop.f32.mrf.mxu1 }
 0x57f   : > { %v2504_v11 = vmul.f32 %v3984_v27, %v2465_v33  ;;  %v2457_v63 = vadd.f32 %v3979_v30, %v2456_v8 }
 0x580   : > { %v3093_v50 = vpop.f32.mrf.mxu1 }
 0x581   : > { %2521 = vst.msk [vmem:[%s3992_s13 + $0x50] sm:$0xff] %vm2510_vm4, %v2504_v11  ;;  %v2502_v35 = vmul.f32 %v3984_v27, %v2457_v63  ;;  %v2468_v62 = vadd.f32 %v3093_v50, %v3979_v30 }
 0x582   : > { %v2459_v9 = vpop.f32.mrf.mxu1 }
 0x583   : > { %2519 = vst.msk [vmem:[%s3992_s13 + $0x40] sm:$0xff] %vm2510_vm4, %v2502_v35  ;;  %v2505_v0 = vmul.f32 %v3984_v27, %v2468_v62  ;;  %v2460_v45 = vadd.f32 %v3979_v30, %v2459_v9 }
 0x585   : > { %2522 = vst.msk [vmem:[%s3992_s13 + $0x58] sm:$0xff] %vm2510_vm4, %v2505_v0  ;;  %v2503_v43 = vmul.f32 %v3984_v27, %v2460_v45 }
 0x587   : > { %2520 = vst.msk [vmem:[%s3992_s13 + $0x48] sm:$0xff] %vm2510_vm4, %v2503_v43 }
 0x58c   : > { %v3096_v53 = vpop.f32.mrf.mxu1 }
 0x58d   : > { %v2481_v39 = vadd.f32 %v3096_v53, %v3979_v30 }
 0x58e   : > { %v2472_v60 = vpop.f32.mrf.mxu1 }
 0x58f   : > { %v2508_v10 = vmul.f32 %v3984_v27, %v2481_v39  ;;  %v2473_v5 = vadd.f32 %v3979_v30, %v2472_v60 }
 0x590   : > { %v3097_v21 = vpop.f32.mrf.mxu1 }
 0x591   : > { %2525 = vst.msk [vmem:[%s3992_s13 + $0x70] sm:$0xff] %vm2510_vm4, %v2508_v10  ;;  %v2506_v20 = vmul.f32 %v3984_v27, %v2473_v5  ;;  %v2484_v37 = vadd.f32 %v3097_v21, %v3979_v30 }
 0x592   : > { %v2475_v47 = vpop.f32.mrf.mxu1 }
 0x593   : > { %2523 = vst.msk [vmem:[%s3992_s13 + $0x60] sm:$0xff] %vm2510_vm4, %v2506_v20  ;;  %v2509_v41 = vmul.f32 %v3984_v27, %v2484_v37  ;;  %v2476_v51 = vadd.f32 %v3979_v30, %v2475_v47 }
 0x595   : > { %2526 = vst.msk [vmem:[%s3992_s13 + $0x78] sm:$0xff] %vm2510_vm4, %v2509_v41  ;;  %v2507_v24 = vmul.f32 %v3984_v27, %v2476_v51 }
 0x597   : > { %2524 = vst.msk [vmem:[%s3992_s13 + $0x68] sm:$0xff] %vm2510_vm4, %v2507_v24 }
 0x598 PF: > { %s21_s17 = sadd.s32 1, %s3210_s17  }
 0x599   : > { %p18_p4 = scmp.ge.s32.totalorder %s21_s17, 4  }
 0x59b   :  { %20 = sbr.rel (!%p18_p4) target bundleno = 1 (0x1), region = 97 }

</bundles_post_ra>
